<compile_context>
chip_gen: v6e
topology: v6e:2x2x1
jax: 0.10.0
libtpu: 0.0.40
codegen_flags: <defaults>
</compile_context>

<pallas_src>
import jax
import jax.numpy as jnp
from jax import lax
from jax.experimental import pallas as pl
from jax.experimental.pallas import tpu as pltpu

BN_EPS = 1e-5
VMEM_LIMIT = 32 * 1024 * 1024  # safe on v5e/v6e (128 MiB) and v7x (64 MiB physical)


# ---------------------------------------------------------------------------
# small helpers
# ---------------------------------------------------------------------------
def _round_up(x, m):
    return ((x + m - 1) // m) * m


def _pick_tile(dim, target, mult):
    return target if dim >= target else _round_up(dim, mult)


def _pad_to(x, shape):
    pads = [(0, t - s) for s, t in zip(x.shape, shape)]
    if all(p == (0, 0) for p in pads):
        return x
    return jnp.pad(x, pads)


# ---------------------------------------------------------------------------
# Pallas kernels
# ---------------------------------------------------------------------------
def _mm_kernel(a_ref, b_ref, o_ref, acc_ref):
    """Grouped tiled matmul: (tm, tk) @ (tk, tn), accumulated over the K grid axis."""
    @pl.when(pl.program_id(3) == 0)
    def _():
        acc_ref[...] = jnp.zeros_like(acc_ref)

    acc_ref[...] += jnp.dot(a_ref[...], b_ref[...],
                            preferred_element_type=jnp.float32)

    @pl.when(pl.program_id(3) == pl.num_programs(3) - 1)
    def _():
        o_ref[...] = acc_ref[...].astype(o_ref.dtype)


def _mm_t_tanh_kernel(w_ref, p_ref, o_ref, acc_ref):
    """Transposed-orientation matmul (Cout, K) @ (K, M) with fused tanh epilogue."""
    @pl.when(pl.program_id(2) == 0)
    def _():
        acc_ref[...] = jnp.zeros_like(acc_ref)

    acc_ref[...] += jnp.dot(w_ref[...], p_ref[...],
                            preferred_element_type=jnp.float32)

    @pl.when(pl.program_id(2) == pl.num_programs(2) - 1)
    def _():
        o_ref[...] = jnp.tanh(acc_ref[...]).astype(o_ref.dtype)


def _bn_stats_kernel(y_ref, sum_ref, ssq_ref):
    """Streaming per-channel sum / sum-of-squares over M tiles (resident outputs)."""
    @pl.when(pl.program_id(0) == 0)
    def _():
        sum_ref[...] = jnp.zeros_like(sum_ref)
        ssq_ref[...] = jnp.zeros_like(ssq_ref)

    y = y_ref[...]
    sum_ref[...] += jnp.sum(y, axis=0, keepdims=True)
    ssq_ref[...] += jnp.sum(y * y, axis=0, keepdims=True)


def _scale_shift_relu_kernel(y_ref, sc_ref, sh_ref, o_ref):
    o_ref[...] = jnp.maximum(y_ref[...] * sc_ref[...] + sh_ref[...],
                             0.0).astype(o_ref.dtype)


# ---------------------------------------------------------------------------
# Pallas call wrappers
# ---------------------------------------------------------------------------
def _matmul_grouped(a, b):
    """a: (G, M, K), b: (G, K, N) (bf16) -> (G, M, N) f32 via tiled Pallas matmul."""
    g, m, k = a.shape
    n = b.shape[2]
    tm = _pick_tile(m, 512, 16)
    tk = _pick_tile(k, 512, 128)
    tn = _pick_tile(n, 256, 128)
    mp, kp, np_ = _round_up(m, tm), _round_up(k, tk), _round_up(n, tn)
    a = _pad_to(a, (g, mp, kp))
    b = _pad_to(b, (g, kp, np_))
    out = pl.pallas_call(
        _mm_kernel,
        out_shape=jax.ShapeDtypeStruct((g, mp, np_), jnp.float32),
        grid_spec=pltpu.PrefetchScalarGridSpec(
            num_scalar_prefetch=0,
            grid=(g, mp // tm, np_ // tn, kp // tk),
            in_specs=[
                pl.BlockSpec((None, tm, tk), lambda gi, i, j, ki: (gi, i, ki)),
                pl.BlockSpec((None, tk, tn), lambda gi, i, j, ki: (gi, ki, j)),
            ],
            out_specs=pl.BlockSpec((None, tm, tn), lambda gi, i, j, ki: (gi, i, j)),
            scratch_shapes=[pltpu.VMEM((tm, tn), jnp.float32)],
        ),
        compiler_params=pltpu.CompilerParams(
            dimension_semantics=("parallel", "parallel", "parallel", "arbitrary"),
            vmem_limit_bytes=VMEM_LIMIT,
        ),
    )(a, b)
    return out[:, :m, :n]


def _matmul_t_tanh(wt, pt):
    """wt: (G, Cp, K), pt: (G, K, M) (bf16) -> tanh(wt @ pt): (G, Cp, M) f32."""
    g, cp, k = wt.shape
    m = pt.shape[2]
    tk = _pick_tile(k, 512, 128)
    tm = _pick_tile(m, 512, 128)
    kp, mp = _round_up(k, tk), _round_up(m, tm)
    wt = _pad_to(wt, (g, cp, kp))
    pt = _pad_to(pt, (g, kp, mp))
    out = pl.pallas_call(
        _mm_t_tanh_kernel,
        out_shape=jax.ShapeDtypeStruct((g, cp, mp), jnp.float32),
        grid_spec=pltpu.PrefetchScalarGridSpec(
            num_scalar_prefetch=0,
            grid=(g, mp // tm, kp // tk),
            in_specs=[
                pl.BlockSpec((None, cp, tk), lambda gi, j, ki: (gi, 0, ki)),
                pl.BlockSpec((None, tk, tm), lambda gi, j, ki: (gi, ki, j)),
            ],
            out_specs=pl.BlockSpec((None, cp, tm), lambda gi, j, ki: (gi, 0, j)),
            scratch_shapes=[pltpu.VMEM((cp, tm), jnp.float32)],
        ),
        compiler_params=pltpu.CompilerParams(
            dimension_semantics=("parallel", "parallel", "arbitrary"),
            vmem_limit_bytes=VMEM_LIMIT,
        ),
    )(wt, pt)
    return out[:, :, :m]


def _batchnorm_relu(y, gamma, beta):
    """y: (M, C) f32 pre-BN activations -> (M, C) bf16 normalized + ReLU."""
    m, c = y.shape
    tm = _pick_tile(m, 512, 16)
    mp = _round_up(m, tm)
    yp = _pad_to(y, (mp, c))          # padded rows are exactly zero
    grid = (mp // tm,)

    s, ss = pl.pallas_call(
        _bn_stats_kernel,
        out_shape=(jax.ShapeDtypeStruct((1, c), jnp.float32),
                   jax.ShapeDtypeStruct((1, c), jnp.float32)),
        grid=grid,
        in_specs=[pl.BlockSpec((tm, c), lambda i: (i, 0))],
        out_specs=(pl.BlockSpec((1, c), lambda i: (0, 0)),
                   pl.BlockSpec((1, c), lambda i: (0, 0))),
        compiler_params=pltpu.CompilerParams(
            dimension_semantics=("arbitrary",)),
    )(yp)

    count = jnp.float32(m)                                 # true element count
    mean = s / count
    var = jnp.maximum(ss / count - mean * mean, 0.0)       # biased var (PyTorch BN fwd)
    scale = gamma.reshape(1, c) * lax.rsqrt(var + BN_EPS)
    shift = beta.reshape(1, c) - mean * scale

    out = pl.pallas_call(
        _scale_shift_relu_kernel,
        out_shape=jax.ShapeDtypeStruct((mp, c), jnp.bfloat16),
        grid=grid,
        in_specs=[pl.BlockSpec((tm, c), lambda i: (i, 0)),
                  pl.BlockSpec((1, c), lambda i: (0, 0)),
                  pl.BlockSpec((1, c), lambda i: (0, 0))],
        out_specs=pl.BlockSpec((tm, c), lambda i: (i, 0)),
        compiler_params=pltpu.CompilerParams(
            dimension_semantics=("parallel",)),
    )(yp, scale, shift)
    return out[:m]


# ---------------------------------------------------------------------------
# Plain-JAX glue: sub-pixel decomposition of ConvTranspose2d(k=4, s=2, p=1)
# ---------------------------------------------------------------------------
_PARITIES = ((0, 0), (0, 1), (1, 0), (1, 1))


def _subpixel_patches_nhwc(act, py, px):
    """act: (N, H, W, C) -> (N*H*W, 4*C) patches for output parity (py, px)."""
    n, h, w, c = act.shape
    xp = jnp.pad(act, ((0, 0), (1, 1), (1, 1), (0, 0)))
    taps = [xp[:, py + dy: py + dy + h, px + dx: px + dx + w, :]
            for dy in (0, 1) for dx in (0, 1)]
    return jnp.concatenate(taps, axis=-1).reshape(n * h * w, 4 * c)


def _subpixel_patches_cfirst(act_cf, py, px):
    """act_cf: (C, N, H, W) -> (4*C, N*H*W) transposed patches for parity (py, px)."""
    c, n, h, w = act_cf.shape
    xp = jnp.pad(act_cf, ((0, 0), (0, 0), (1, 1), (1, 1)))
    taps = [xp[:, :, py + dy: py + dy + h, px + dx: px + dx + w]
            for dy in (0, 1) for dx in (0, 1)]
    return jnp.concatenate(taps, axis=0).reshape(4 * c, n * h * w)


def _subpixel_weight(w, py, px, transposed=False):
    """w: (Cin, Cout, 4, 4) torch ConvTranspose2d weight -> 2x2 sub-kernel matrix."""
    taps = []
    for dy in (0, 1):
        for dx in (0, 1):
            ky = 3 - py - 2 * dy
            kx = 3 - px - 2 * dx
            taps.append(w[:, :, ky, kx])                       # (Cin, Cout)
    if transposed:
        return jnp.concatenate([t.T for t in taps], axis=1)    # (Cout, 4*Cin)
    return jnp.concatenate(taps, axis=0)                       # (4*Cin, Cout)


# ---------------------------------------------------------------------------
# Layers
# ---------------------------------------------------------------------------
def _layer_project(z, w, gamma, beta):
    """ConvTranspose2d(z, C, 4, 1, 0) on a 1x1 input == z @ W, then BN + ReLU."""
    n, zdim = z.shape
    cout = w.shape[1]
    wmat = jnp.transpose(w, (0, 2, 3, 1)).reshape(zdim, 16 * cout)
    y = _matmul_grouped(z[None].astype(jnp.bfloat16),
                        wmat[None].astype(jnp.bfloat16))[0]      # (N, 16*Cout) f32
    act = _batchnorm_relu(y.reshape(n * 16, cout), gamma, beta)  # (N*16, Cout) bf16
    return act.reshape(n, 4, 4, cout)                            # NHWC


def _layer_upsample_bn_relu(act, w, gamma, beta):
    """ConvTranspose2d(Cin, Cout, 4, 2, 1) + BN + ReLU via sub-pixel decomposition."""
    n, h, wd, cin = act.shape
    cout = w.shape[1]
    m = n * h * wd
    pats = jnp.stack([_subpixel_patches_nhwc(act, py, px) for py, px in _PARITIES])
    wmats = jnp.stack([_subpixel_weight(w, py, px) for py, px in _PARITIES])
    y = _matmul_grouped(pats.astype(jnp.bfloat16),
                        wmats.astype(jnp.bfloat16))              # (4, M, Cout) f32
    act_out = _batchnorm_relu(y.reshape(4 * m, cout), gamma, beta)
    act_out = act_out.reshape(2, 2, n, h, wd, cout)
    act_out = jnp.transpose(act_out, (2, 3, 0, 4, 1, 5))         # (N, H, 2, W, 2, C)
    return act_out.reshape(n, 2 * h, 2 * wd, cout)


def _layer_upsample_tanh(act, w):
    """Final ConvTranspose2d(Cin, 3, 4, 2, 1) + tanh, computed as (Cout, M) so the
    long spatial dim sits on the lane axis (lane-dense stores despite Cout=3)."""
    n, h, wd, cin = act.shape
    cout = w.shape[1]
    cpad = 16                                                    # sublane-friendly pad
    act_cf = jnp.transpose(act, (3, 0, 1, 2))                    # (C, N, H, W)
    pats = jnp.stack([_subpixel_patches_cfirst(act_cf, py, px) for py, px in _PARITIES])
    wmats = jnp.stack([_subpixel_weight(w, py, px, transposed=True)
                       for py, px in _PARITIES])                 # (4, Cout, 4*Cin)
    wmats = _pad_to(wmats, (4, cpad, wmats.shape[2]))
    y = _matmul_t_tanh(wmats.astype(jnp.bfloat16),
                       pats.astype(jnp.bfloat16))                # (4, cpad, M) f32
    y = y[:, :cout, :].reshape(2, 2, cout, n, h, wd)
    img = jnp.transpose(y, (3, 2, 4, 0, 5, 1))                   # (N, C, H, 2, W, 2)
    return img.reshape(n, cout, 2 * h, 2 * wd)                   # NCHW


def generator_forward(z, params):
    """z: (N, z_size) -> image (N, 3, 64, 64), matching the PyTorch Generator."""
    act = _layer_project(z, params["w1"], params["g1"], params["b1"])
    act = _layer_upsample_bn_relu(act, params["w2"], params["g2"], params["b2"])
    act = _layer_upsample_bn_relu(act, params["w3"], params["g3"], params["b3"])
    act = _layer_upsample_bn_relu(act, params["w4"], params["g4"], params["b4"])
    return _layer_upsample_tanh(act, params["w5"])


# ---------------------------------------------------------------------------
# Deterministic parameter init (synthetic; matches PyTorch module shapes)
# ---------------------------------------------------------------------------
def init_params(key, z_size, conv_dim):
    ks = jax.random.split(key, 5)
    std = 0.02
    cd = conv_dim
    params = {
        "w1": std * jax.random.normal(ks[0], (z_size, cd * 8, 4, 4), jnp.float32),
        "w2": std * jax.random.normal(ks[1], (cd * 8, cd * 4, 4, 4), jnp.float32),
        "w3": std * jax.random.normal(ks[2], (cd * 4, cd * 2, 4, 4), jnp.float32),
        "w4": std * jax.random.normal(ks[3], (cd * 2, cd, 4, 4), jnp.float32),
        "w5": std * jax.random.normal(ks[4], (cd, 3, 4, 4), jnp.float32),
    }
    for i, c in enumerate([cd * 8, cd * 4, cd * 2, cd], start=1):
        params[f"g{i}"] = jnp.ones((c,), jnp.float32)   # PyTorch BN default affine init
        params[f"b{i}"] = jnp.zeros((c,), jnp.float32)
    return params


if __name__ == "__main__":
    key = jax.random.PRNGKey(0)
    batch, z_size, conv_dim = 2, 16, 8

    pkey, zkey = jax.random.split(key)
    params = init_params(pkey, z_size, conv_dim)
    z = jax.random.normal(zkey, (batch, z_size), jnp.float32)

    fwd = jax.jit(generator_forward)
    out = jax.block_until_ready(fwd(z, params))

    assert out.shape == (batch, 3, 64, 64), out.shape
    assert bool(jnp.all(jnp.isfinite(out)))
    assert bool(jnp.all(jnp.abs(out) <= 1.0 + 1e-6))  # tanh output range
    print("KERNEL_OK")
</pallas_src>

<mosaic_0001>
module attributes {stable_mosaic.version = 11 : i64} {
  func.func @_mm_kernel(%arg0: i32, %arg1: i32, %arg2: i32, %arg3: i32, %arg4: memref<1x16x128xbf16, #tpu.memory_space<vmem>>, %arg5: memref<1x128x256xbf16, #tpu.memory_space<vmem>>, %arg6: memref<1x16x256xf32, #tpu.memory_space<vmem>>, %arg7: memref<16x256xf32, #tpu.memory_space<vmem>>) attributes {dimension_semantics = [#tpu.dimension_semantics<parallel>, #tpu.dimension_semantics<parallel>, #tpu.dimension_semantics<parallel>, #tpu.dimension_semantics<arbitrary>], iteration_bounds = array<i64: 1, 1, 4, 1>, scalar_prefetch = 0 : i64, scratch_operands = 1 : i64, tpu.core_type = #tpu.core_type<tc>, window_params = [{transform_indices = @transform_0, window_bounds = array<i64: 1, 16, 128>}, {transform_indices = @transform_1, window_bounds = array<i64: 1, 128, 256>}, {transform_indices = @transform_2, window_bounds = array<i64: 1, 16, 256>}]} {
    %c0_i32 = arith.constant 0 : i32
    %0 = arith.cmpi eq, %arg3, %c0_i32 : i32
    %1 = arith.extui %0 : i1 to i32
    %c0_i32_0 = arith.constant 0 : i32
    %2 = arith.cmpi ne, %1, %c0_i32_0 : i32
    scf.if %2 {
      %cst_12 = arith.constant 0.000000e+00 : f32
      %14 = vector.broadcast %cst_12 : f32 to vector<16x256xf32>
      %c0_13 = arith.constant 0 : index
      %c0_14 = arith.constant 0 : index
      %15 = vector.load %arg7[%c0_13, %c0_14] : memref<16x256xf32, #tpu.memory_space<vmem>>, vector<16x256xf32>
      tpu.vector_store %arg7[%c0_13, %c0_14], %14 {strides = array<i32>} : memref<16x256xf32, #tpu.memory_space<vmem>>, vector<16x256xf32>,
    } else {
    }
    %c0 = arith.constant 0 : index
    %c0_1 = arith.constant 0 : index
    %3 = vector.load %arg7[%c0, %c0_1] : memref<16x256xf32, #tpu.memory_space<vmem>>, vector<16x256xf32>
    %c0_2 = arith.constant 0 : index
    %c0_3 = arith.constant 0 : index
    %c0_4 = arith.constant 0 : index
    %4 = vector.load %arg4[%c0_2, %c0_3, %c0_4] : memref<1x16x128xbf16, #tpu.memory_space<vmem>>, vector<1x16x128xbf16>
    %5 = vector.shape_cast %4 : vector<1x16x128xbf16> to vector<16x128xbf16>
    %c0_5 = arith.constant 0 : index
    %c0_6 = arith.constant 0 : index
    %c0_7 = arith.constant 0 : index
    %6 = vector.load %arg5[%c0_5, %c0_6, %c0_7] : memref<1x128x256xbf16, #tpu.memory_space<vmem>>, vector<1x128x256xbf16>
    %7 = vector.shape_cast %6 : vector<1x128x256xbf16> to vector<128x256xbf16>
    %cst = arith.constant dense<0.000000e+00> : vector<16x256xf32>
    %8 = tpu.matmul %5, %7, %cst {dimension_numbers = #tpu.dot_dimension_numbers<[1], [0], [0], [1], [0, 0, 1, 1], [], []>} : vector<16x128xbf16>, vector<128x256xbf16>, vector<16x256xf32> -> vector<16x256xf32>
    %9 = arith.addf %3, %8 : vector<16x256xf32>
    %c0_8 = arith.constant 0 : index
    %c0_9 = arith.constant 0 : index
    %10 = vector.load %arg7[%c0_8, %c0_9] : memref<16x256xf32, #tpu.memory_space<vmem>>, vector<16x256xf32>
    tpu.vector_store %arg7[%c0_8, %c0_9], %9 {strides = array<i32>} : memref<16x256xf32, #tpu.memory_space<vmem>>, vector<16x256xf32>,
    %c0_i32_10 = arith.constant 0 : i32
    %11 = arith.cmpi eq, %arg3, %c0_i32_10 : i32
    %12 = arith.extui %11 : i1 to i32
    %c0_i32_11 = arith.constant 0 : i32
    %13 = arith.cmpi ne, %12, %c0_i32_11 : i32
    scf.if %13 {
      %c0_12 = arith.constant 0 : index
      %c0_13 = arith.constant 0 : index
      %14 = vector.load %arg7[%c0_12, %c0_13] : memref<16x256xf32, #tpu.memory_space<vmem>>, vector<16x256xf32>
      %c0_14 = arith.constant 0 : index
      %c0_15 = arith.constant 0 : index
      %c0_16 = arith.constant 0 : index
      %15 = vector.load %arg6[%c0_14, %c0_15, %c0_16] : memref<1x16x256xf32, #tpu.memory_space<vmem>>, vector<1x16x256xf32>
      %16 = vector.shape_cast %15 : vector<1x16x256xf32> to vector<16x256xf32>
      %17 = vector.shape_cast %14 : vector<16x256xf32> to vector<1x16x256xf32>
      tpu.vector_store %arg6[%c0_14, %c0_15, %c0_16], %17 {strides = array<i32>} : memref<1x16x256xf32, #tpu.memory_space<vmem>>, vector<1x16x256xf32>,
    } else {
    }
    return
  }
  func.func @transform_0(%arg0: i32, %arg1: i32, %arg2: i32, %arg3: i32) -> (i32, i32, i32) {
    %c0_i32 = arith.constant 0 : i32
    return %arg0, %arg1, %arg3 : i32, i32, i32
  }
  func.func @transform_1(%arg0: i32, %arg1: i32, %arg2: i32, %arg3: i32) -> (i32, i32, i32) {
    %c0_i32 = arith.constant 0 : i32
    return %arg0, %arg3, %arg2 : i32, i32, i32
  }
  func.func @transform_2(%arg0: i32, %arg1: i32, %arg2: i32, %arg3: i32) -> (i32, i32, i32) {
    %c0_i32 = arith.constant 0 : i32
    return %arg0, %arg1, %arg2 : i32, i32, i32
  }
}

module attributes {stable_mosaic.version = 11 : i64} {
  func.func @_bn_stats_kernel(%arg0: i32, %arg1: memref<32x64xf32, #tpu.memory_space<vmem>>, %arg2: memref<1x64xf32, #tpu.memory_space<vmem>>, %arg3: memref<1x64xf32, #tpu.memory_space<vmem>>) attributes {dimension_semantics = [#tpu.dimension_semantics<arbitrary>], iteration_bounds = array<i64: 1>, scalar_prefetch = 0 : i64, scratch_operands = 0 : i64, tpu.core_type = #tpu.core_type<tc>, window_params = [{transform_indices = @transform_0, window_bounds = array<i64: 32, 64>}, {pipeline_mode = #tpu.pipeline_mode<synchronous>, transform_indices = @transform_1, window_bounds = array<i64: 1, 64>}, {pipeline_mode = #tpu.pipeline_mode<synchronous>, transform_indices = @transform_2, window_bounds = array<i64: 1, 64>}]} {
    %c0_i32 = arith.constant 0 : i32
    %0 = arith.cmpi eq, %arg0, %c0_i32 : i32
    %1 = arith.extui %0 : i1 to i32
    %c0_i32_0 = arith.constant 0 : i32
    %2 = arith.cmpi ne, %1, %c0_i32_0 : i32
    scf.if %2 {
      %cst_11 = arith.constant 0.000000e+00 : f32
      %15 = vector.broadcast %cst_11 : f32 to vector<1x64xf32>
      %c0_12 = arith.constant 0 : index
      %c0_13 = arith.constant 0 : index
      %16 = vector.load %arg2[%c0_12, %c0_13] : memref<1x64xf32, #tpu.memory_space<vmem>>, vector<1x64xf32>
      tpu.vector_store %arg2[%c0_12, %c0_13], %15 {strides = array<i32>} : memref<1x64xf32, #tpu.memory_space<vmem>>, vector<1x64xf32>,
      %cst_14 = arith.constant 0.000000e+00 : f32
      %17 = vector.broadcast %cst_14 : f32 to vector<1x64xf32>
      %c0_15 = arith.constant 0 : index
      %c0_16 = arith.constant 0 : index
      %18 = vector.load %arg3[%c0_15, %c0_16] : memref<1x64xf32, #tpu.memory_space<vmem>>, vector<1x64xf32>
      tpu.vector_store %arg3[%c0_15, %c0_16], %17 {strides = array<i32>} : memref<1x64xf32, #tpu.memory_space<vmem>>, vector<1x64xf32>,
    } else {
    }
    %c0 = arith.constant 0 : index
    %c0_1 = arith.constant 0 : index
    %3 = vector.load %arg1[%c0, %c0_1] : memref<32x64xf32, #tpu.memory_space<vmem>>, vector<32x64xf32>
    %c0_2 = arith.constant 0 : index
    %c0_3 = arith.constant 0 : index
    %4 = vector.load %arg2[%c0_2, %c0_3] : memref<1x64xf32, #tpu.memory_space<vmem>>, vector<1x64xf32>
    %cst = arith.constant dense<0.000000e+00> : vector<64xf32>
    %5 = vector.multi_reduction <add>, %3, %cst [0] : vector<32x64xf32> to vector<64xf32>
    %6 = vector.shape_cast %5 : vector<64xf32> to vector<1x64xf32>
    %7 = arith.addf %4, %6 : vector<1x64xf32>
    %c0_4 = arith.constant 0 : index
    %c0_5 = arith.constant 0 : index
    %8 = vector.load %arg2[%c0_4, %c0_5] : memref<1x64xf32, #tpu.memory_space<vmem>>, vector<1x64xf32>
    tpu.vector_store %arg2[%c0_4, %c0_5], %7 {strides = array<i32>} : memref<1x64xf32, #tpu.memory_space<vmem>>, vector<1x64xf32>,
    %c0_6 = arith.constant 0 : index
    %c0_7 = arith.constant 0 : index
    %9 = vector.load %arg3[%c0_6, %c0_7] : memref<1x64xf32, #tpu.memory_space<vmem>>, vector<1x64xf32>
    %10 = arith.mulf %3, %3 : vector<32x64xf32>
    %cst_8 = arith.constant dense<0.000000e+00> : vector<64xf32>
    %11 = vector.multi_reduction <add>, %10, %cst_8 [0] : vector<32x64xf32> to vector<64xf32>
    %12 = vector.shape_cast %11 : vector<64xf32> to vector<1x64xf32>
    %13 = arith.addf %9, %12 : vector<1x64xf32>
    %c0_9 = arith.constant 0 : index
    %c0_10 = arith.constant 0 : index
    %14 = vector.load %arg3[%c0_9, %c0_10] : memref<1x64xf32, #tpu.memory_space<vmem>>, vector<1x64xf32>
    tpu.vector_store %arg3[%c0_9, %c0_10], %13 {strides = array<i32>} : memref<1x64xf32, #tpu.memory_space<vmem>>, vector<1x64xf32>,
    return
  }
  func.func @transform_0(%arg0: i32) -> (i32, i32) {
    %c0_i32 = arith.constant 0 : i32
    %c0_i32_0 = arith.constant 0 : i32
    return %arg0, %c0_i32 : i32, i32
  }
  func.func @transform_1(%arg0: i32) -> (i32, i32) {
    %c0_i32 = arith.constant 0 : i32
    %c0_i32_0 = arith.constant 0 : i32
    %c0_i32_1 = arith.constant 0 : i32
    return %c0_i32, %c0_i32_0 : i32, i32
  }
  func.func @transform_2(%arg0: i32) -> (i32, i32) {
    %c0_i32 = arith.constant 0 : i32
    %c0_i32_0 = arith.constant 0 : i32
    %c0_i32_1 = arith.constant 0 : i32
    return %c0_i32, %c0_i32_0 : i32, i32
  }
}

module attributes {stable_mosaic.version = 11 : i64} {
  func.func @_scale_shift_relu_kernel(%arg0: i32, %arg1: memref<32x64xf32, #tpu.memory_space<vmem>>, %arg2: memref<1x64xf32, #tpu.memory_space<vmem>>, %arg3: memref<1x64xf32, #tpu.memory_space<vmem>>, %arg4: memref<32x64xbf16, #tpu.memory_space<vmem>>) attributes {dimension_semantics = [#tpu.dimension_semantics<parallel>], iteration_bounds = array<i64: 1>, scalar_prefetch = 0 : i64, scratch_operands = 0 : i64, tpu.core_type = #tpu.core_type<tc>, window_params = [{transform_indices = @transform_0, window_bounds = array<i64: 32, 64>}, {pipeline_mode = #tpu.pipeline_mode<synchronous>, transform_indices = @transform_1, window_bounds = array<i64: 1, 64>}, {pipeline_mode = #tpu.pipeline_mode<synchronous>, transform_indices = @transform_2, window_bounds = array<i64: 1, 64>}, {transform_indices = @transform_3, window_bounds = array<i64: 32, 64>}]} {
    %c0 = arith.constant 0 : index
    %c0_0 = arith.constant 0 : index
    %0 = vector.load %arg1[%c0, %c0_0] : memref<32x64xf32, #tpu.memory_space<vmem>>, vector<32x64xf32>
    %c0_1 = arith.constant 0 : index
    %c0_2 = arith.constant 0 : index
    %1 = vector.load %arg2[%c0_1, %c0_2] : memref<1x64xf32, #tpu.memory_space<vmem>>, vector<1x64xf32>
    %2 = vector.broadcast %1 : vector<1x64xf32> to vector<32x64xf32>
    %3 = arith.mulf %0, %2 : vector<32x64xf32>
    %c0_3 = arith.constant 0 : index
    %c0_4 = arith.constant 0 : index
    %4 = vector.load %arg3[%c0_3, %c0_4] : memref<1x64xf32, #tpu.memory_space<vmem>>, vector<1x64xf32>
    %5 = vector.broadcast %4 : vector<1x64xf32> to vector<32x64xf32>
    %6 = arith.addf %3, %5 : vector<32x64xf32>
    %cst = arith.constant 0.000000e+00 : f32
    %7 = vector.broadcast %cst : f32 to vector<32x64xf32>
    %8 = arith.maximumf %6, %7 : vector<32x64xf32>
    %9 = arith.truncf %8 : vector<32x64xf32> to vector<32x64xbf16>
    %c0_5 = arith.constant 0 : index
    %c0_6 = arith.constant 0 : index
    %10 = vector.load %arg4[%c0_5, %c0_6] : memref<32x64xbf16, #tpu.memory_space<vmem>>, vector<32x64xbf16>
    tpu.vector_store %arg4[%c0_5, %c0_6], %9 {strides = array<i32>} : memref<32x64xbf16, #tpu.memory_space<vmem>>, vector<32x64xbf16>,
    return
  }
  func.func @transform_0(%arg0: i32) -> (i32, i32) {
    %c0_i32 = arith.constant 0 : i32
    %c0_i32_0 = arith.constant 0 : i32
    return %arg0, %c0_i32 : i32, i32
  }
  func.func @transform_1(%arg0: i32) -> (i32, i32) {
    %c0_i32 = arith.constant 0 : i32
    %c0_i32_0 = arith.constant 0 : i32
    %c0_i32_1 = arith.constant 0 : i32
    return %c0_i32, %c0_i32_0 : i32, i32
  }
  func.func @transform_2(%arg0: i32) -> (i32, i32) {
    %c0_i32 = arith.constant 0 : i32
    %c0_i32_0 = arith.constant 0 : i32
    %c0_i32_1 = arith.constant 0 : i32
    return %c0_i32, %c0_i32_0 : i32, i32
  }
  func.func @transform_3(%arg0: i32) -> (i32, i32) {
    %c0_i32 = arith.constant 0 : i32
    %c0_i32_0 = arith.constant 0 : i32
    return %arg0, %c0_i32 : i32, i32
  }
}

module attributes {stable_mosaic.version = 11 : i64} {
  func.func @_mm_kernel(%arg0: i32, %arg1: i32, %arg2: i32, %arg3: i32, %arg4: memref<1x32x256xbf16, #tpu.memory_space<vmem>>, %arg5: memref<1x256x128xbf16, #tpu.memory_space<vmem>>, %arg6: memref<1x32x128xf32, #tpu.memory_space<vmem>>, %arg7: memref<32x128xf32, #tpu.memory_space<vmem>>) attributes {dimension_semantics = [#tpu.dimension_semantics<parallel>, #tpu.dimension_semantics<parallel>, #tpu.dimension_semantics<parallel>, #tpu.dimension_semantics<arbitrary>], iteration_bounds = array<i64: 4, 1, 1, 1>, scalar_prefetch = 0 : i64, scratch_operands = 1 : i64, tpu.core_type = #tpu.core_type<tc>, window_params = [{transform_indices = @transform_0, window_bounds = array<i64: 1, 32, 256>}, {transform_indices = @transform_1, window_bounds = array<i64: 1, 256, 128>}, {transform_indices = @transform_2, window_bounds = array<i64: 1, 32, 128>}]} {
    %c0_i32 = arith.constant 0 : i32
    %0 = arith.cmpi eq, %arg3, %c0_i32 : i32
    %1 = arith.extui %0 : i1 to i32
    %c0_i32_0 = arith.constant 0 : i32
    %2 = arith.cmpi ne, %1, %c0_i32_0 : i32
    scf.if %2 {
      %cst_12 = arith.constant 0.000000e+00 : f32
      %14 = vector.broadcast %cst_12 : f32 to vector<32x128xf32>
      %c0_13 = arith.constant 0 : index
      %c0_14 = arith.constant 0 : index
      %15 = vector.load %arg7[%c0_13, %c0_14] : memref<32x128xf32, #tpu.memory_space<vmem>>, vector<32x128xf32>
      tpu.vector_store %arg7[%c0_13, %c0_14], %14 {strides = array<i32>} : memref<32x128xf32, #tpu.memory_space<vmem>>, vector<32x128xf32>,
    } else {
    }
    %c0 = arith.constant 0 : index
    %c0_1 = arith.constant 0 : index
    %3 = vector.load %arg7[%c0, %c0_1] : memref<32x128xf32, #tpu.memory_space<vmem>>, vector<32x128xf32>
    %c0_2 = arith.constant 0 : index
    %c0_3 = arith.constant 0 : index
    %c0_4 = arith.constant 0 : index
    %4 = vector.load %arg4[%c0_2, %c0_3, %c0_4] : memref<1x32x256xbf16, #tpu.memory_space<vmem>>, vector<1x32x256xbf16>
    %5 = vector.shape_cast %4 : vector<1x32x256xbf16> to vector<32x256xbf16>
    %c0_5 = arith.constant 0 : index
    %c0_6 = arith.constant 0 : index
    %c0_7 = arith.constant 0 : index
    %6 = vector.load %arg5[%c0_5, %c0_6, %c0_7] : memref<1x256x128xbf16, #tpu.memory_space<vmem>>, vector<1x256x128xbf16>
    %7 = vector.shape_cast %6 : vector<1x256x128xbf16> to vector<256x128xbf16>
    %cst = arith.constant dense<0.000000e+00> : vector<32x128xf32>
    %8 = tpu.matmul %5, %7, %cst {dimension_numbers = #tpu.dot_dimension_numbers<[1], [0], [0], [1], [0, 0, 1, 1], [], []>} : vector<32x256xbf16>, vector<256x128xbf16>, vector<32x128xf32> -> vector<32x128xf32>
    %9 = arith.addf %3, %8 : vector<32x128xf32>
    %c0_8 = arith.constant 0 : index
    %c0_9 = arith.constant 0 : index
    %10 = vector.load %arg7[%c0_8, %c0_9] : memref<32x128xf32, #tpu.memory_space<vmem>>, vector<32x128xf32>
    tpu.vector_store %arg7[%c0_8, %c0_9], %9 {strides = array<i32>} : memref<32x128xf32, #tpu.memory_space<vmem>>, vector<32x128xf32>,
    %c0_i32_10 = arith.constant 0 : i32
    %11 = arith.cmpi eq, %arg3, %c0_i32_10 : i32
    %12 = arith.extui %11 : i1 to i32
    %c0_i32_11 = arith.constant 0 : i32
    %13 = arith.cmpi ne, %12, %c0_i32_11 : i32
    scf.if %13 {
      %c0_12 = arith.constant 0 : index
      %c0_13 = arith.constant 0 : index
      %14 = vector.load %arg7[%c0_12, %c0_13] : memref<32x128xf32, #tpu.memory_space<vmem>>, vector<32x128xf32>
      %c0_14 = arith.constant 0 : index
      %c0_15 = arith.constant 0 : index
      %c0_16 = arith.constant 0 : index
      %15 = vector.load %arg6[%c0_14, %c0_15, %c0_16] : memref<1x32x128xf32, #tpu.memory_space<vmem>>, vector<1x32x128xf32>
      %16 = vector.shape_cast %15 : vector<1x32x128xf32> to vector<32x128xf32>
      %17 = vector.shape_cast %14 : vector<32x128xf32> to vector<1x32x128xf32>
      tpu.vector_store %arg6[%c0_14, %c0_15, %c0_16], %17 {strides = array<i32>} : memref<1x32x128xf32, #tpu.memory_space<vmem>>, vector<1x32x128xf32>,
    } else {
    }
    return
  }
  func.func @transform_0(%arg0: i32, %arg1: i32, %arg2: i32, %arg3: i32) -> (i32, i32, i32) {
    %c0_i32 = arith.constant 0 : i32
    return %arg0, %arg1, %arg3 : i32, i32, i32
  }
  func.func @transform_1(%arg0: i32, %arg1: i32, %arg2: i32, %arg3: i32) -> (i32, i32, i32) {
    %c0_i32 = arith.constant 0 : i32
    return %arg0, %arg3, %arg2 : i32, i32, i32
  }
  func.func @transform_2(%arg0: i32, %arg1: i32, %arg2: i32, %arg3: i32) -> (i32, i32, i32) {
    %c0_i32 = arith.constant 0 : i32
    return %arg0, %arg1, %arg2 : i32, i32, i32
  }
}

module attributes {stable_mosaic.version = 11 : i64} {
  func.func @_bn_stats_kernel(%arg0: i32, %arg1: memref<128x32xf32, #tpu.memory_space<vmem>>, %arg2: memref<1x32xf32, #tpu.memory_space<vmem>>, %arg3: memref<1x32xf32, #tpu.memory_space<vmem>>) attributes {dimension_semantics = [#tpu.dimension_semantics<arbitrary>], iteration_bounds = array<i64: 1>, scalar_prefetch = 0 : i64, scratch_operands = 0 : i64, tpu.core_type = #tpu.core_type<tc>, window_params = [{transform_indices = @transform_0, window_bounds = array<i64: 128, 32>}, {pipeline_mode = #tpu.pipeline_mode<synchronous>, transform_indices = @transform_1, window_bounds = array<i64: 1, 32>}, {pipeline_mode = #tpu.pipeline_mode<synchronous>, transform_indices = @transform_2, window_bounds = array<i64: 1, 32>}]} {
    %c0_i32 = arith.constant 0 : i32
    %0 = arith.cmpi eq, %arg0, %c0_i32 : i32
    %1 = arith.extui %0 : i1 to i32
    %c0_i32_0 = arith.constant 0 : i32
    %2 = arith.cmpi ne, %1, %c0_i32_0 : i32
    scf.if %2 {
      %cst_11 = arith.constant 0.000000e+00 : f32
      %15 = vector.broadcast %cst_11 : f32 to vector<1x32xf32>
      %c0_12 = arith.constant 0 : index
      %c0_13 = arith.constant 0 : index
      %16 = vector.load %arg2[%c0_12, %c0_13] : memref<1x32xf32, #tpu.memory_space<vmem>>, vector<1x32xf32>
      tpu.vector_store %arg2[%c0_12, %c0_13], %15 {strides = array<i32>} : memref<1x32xf32, #tpu.memory_space<vmem>>, vector<1x32xf32>,
      %cst_14 = arith.constant 0.000000e+00 : f32
      %17 = vector.broadcast %cst_14 : f32 to vector<1x32xf32>
      %c0_15 = arith.constant 0 : index
      %c0_16 = arith.constant 0 : index
      %18 = vector.load %arg3[%c0_15, %c0_16] : memref<1x32xf32, #tpu.memory_space<vmem>>, vector<1x32xf32>
      tpu.vector_store %arg3[%c0_15, %c0_16], %17 {strides = array<i32>} : memref<1x32xf32, #tpu.memory_space<vmem>>, vector<1x32xf32>,
    } else {
    }
    %c0 = arith.constant 0 : index
    %c0_1 = arith.constant 0 : index
    %3 = vector.load %arg1[%c0, %c0_1] : memref<128x32xf32, #tpu.memory_space<vmem>>, vector<128x32xf32>
    %c0_2 = arith.constant 0 : index
    %c0_3 = arith.constant 0 : index
    %4 = vector.load %arg2[%c0_2, %c0_3] : memref<1x32xf32, #tpu.memory_space<vmem>>, vector<1x32xf32>
    %cst = arith.constant dense<0.000000e+00> : vector<32xf32>
    %5 = vector.multi_reduction <add>, %3, %cst [0] : vector<128x32xf32> to vector<32xf32>
    %6 = vector.shape_cast %5 : vector<32xf32> to vector<1x32xf32>
    %7 = arith.addf %4, %6 : vector<1x32xf32>
    %c0_4 = arith.constant 0 : index
    %c0_5 = arith.constant 0 : index
    %8 = vector.load %arg2[%c0_4, %c0_5] : memref<1x32xf32, #tpu.memory_space<vmem>>, vector<1x32xf32>
    tpu.vector_store %arg2[%c0_4, %c0_5], %7 {strides = array<i32>} : memref<1x32xf32, #tpu.memory_space<vmem>>, vector<1x32xf32>,
    %c0_6 = arith.constant 0 : index
    %c0_7 = arith.constant 0 : index
    %9 = vector.load %arg3[%c0_6, %c0_7] : memref<1x32xf32, #tpu.memory_space<vmem>>, vector<1x32xf32>
    %10 = arith.mulf %3, %3 : vector<128x32xf32>
    %cst_8 = arith.constant dense<0.000000e+00> : vector<32xf32>
    %11 = vector.multi_reduction <add>, %10, %cst_8 [0] : vector<128x32xf32> to vector<32xf32>
    %12 = vector.shape_cast %11 : vector<32xf32> to vector<1x32xf32>
    %13 = arith.addf %9, %12 : vector<1x32xf32>
    %c0_9 = arith.constant 0 : index
    %c0_10 = arith.constant 0 : index
    %14 = vector.load %arg3[%c0_9, %c0_10] : memref<1x32xf32, #tpu.memory_space<vmem>>, vector<1x32xf32>
    tpu.vector_store %arg3[%c0_9, %c0_10], %13 {strides = array<i32>} : memref<1x32xf32, #tpu.memory_space<vmem>>, vector<1x32xf32>,
    return
  }
  func.func @transform_0(%arg0: i32) -> (i32, i32) {
    %c0_i32 = arith.constant 0 : i32
    %c0_i32_0 = arith.constant 0 : i32
    return %arg0, %c0_i32 : i32, i32
  }
  func.func @transform_1(%arg0: i32) -> (i32, i32) {
    %c0_i32 = arith.constant 0 : i32
    %c0_i32_0 = arith.constant 0 : i32
    %c0_i32_1 = arith.constant 0 : i32
    return %c0_i32, %c0_i32_0 : i32, i32
  }
  func.func @transform_2(%arg0: i32) -> (i32, i32) {
    %c0_i32 = arith.constant 0 : i32
    %c0_i32_0 = arith.constant 0 : i32
    %c0_i32_1 = arith.constant 0 : i32
    return %c0_i32, %c0_i32_0 : i32, i32
  }
}

module attributes {stable_mosaic.version = 11 : i64} {
  func.func @_scale_shift_relu_kernel(%arg0: i32, %arg1: memref<128x32xf32, #tpu.memory_space<vmem>>, %arg2: memref<1x32xf32, #tpu.memory_space<vmem>>, %arg3: memref<1x32xf32, #tpu.memory_space<vmem>>, %arg4: memref<128x32xbf16, #tpu.memory_space<vmem>>) attributes {dimension_semantics = [#tpu.dimension_semantics<parallel>], iteration_bounds = array<i64: 1>, scalar_prefetch = 0 : i64, scratch_operands = 0 : i64, tpu.core_type = #tpu.core_type<tc>, window_params = [{transform_indices = @transform_0, window_bounds = array<i64: 128, 32>}, {pipeline_mode = #tpu.pipeline_mode<synchronous>, transform_indices = @transform_1, window_bounds = array<i64: 1, 32>}, {pipeline_mode = #tpu.pipeline_mode<synchronous>, transform_indices = @transform_2, window_bounds = array<i64: 1, 32>}, {transform_indices = @transform_3, window_bounds = array<i64: 128, 32>}]} {
    %c0 = arith.constant 0 : index
    %c0_0 = arith.constant 0 : index
    %0 = vector.load %arg1[%c0, %c0_0] : memref<128x32xf32, #tpu.memory_space<vmem>>, vector<128x32xf32>
    %c0_1 = arith.constant 0 : index
    %c0_2 = arith.constant 0 : index
    %1 = vector.load %arg2[%c0_1, %c0_2] : memref<1x32xf32, #tpu.memory_space<vmem>>, vector<1x32xf32>
    %2 = vector.broadcast %1 : vector<1x32xf32> to vector<128x32xf32>
    %3 = arith.mulf %0, %2 : vector<128x32xf32>
    %c0_3 = arith.constant 0 : index
    %c0_4 = arith.constant 0 : index
    %4 = vector.load %arg3[%c0_3, %c0_4] : memref<1x32xf32, #tpu.memory_space<vmem>>, vector<1x32xf32>
    %5 = vector.broadcast %4 : vector<1x32xf32> to vector<128x32xf32>
    %6 = arith.addf %3, %5 : vector<128x32xf32>
    %cst = arith.constant 0.000000e+00 : f32
    %7 = vector.broadcast %cst : f32 to vector<128x32xf32>
    %8 = arith.maximumf %6, %7 : vector<128x32xf32>
    %9 = arith.truncf %8 : vector<128x32xf32> to vector<128x32xbf16>
    %c0_5 = arith.constant 0 : index
    %c0_6 = arith.constant 0 : index
    %10 = vector.load %arg4[%c0_5, %c0_6] : memref<128x32xbf16, #tpu.memory_space<vmem>>, vector<128x32xbf16>
    tpu.vector_store %arg4[%c0_5, %c0_6], %9 {strides = array<i32>} : memref<128x32xbf16, #tpu.memory_space<vmem>>, vector<128x32xbf16>,
    return
  }
  func.func @transform_0(%arg0: i32) -> (i32, i32) {
    %c0_i32 = arith.constant 0 : i32
    %c0_i32_0 = arith.constant 0 : i32
    return %arg0, %c0_i32 : i32, i32
  }
  func.func @transform_1(%arg0: i32) -> (i32, i32) {
    %c0_i32 = arith.constant 0 : i32
    %c0_i32_0 = arith.constant 0 : i32
    %c0_i32_1 = arith.constant 0 : i32
    return %c0_i32, %c0_i32_0 : i32, i32
  }
  func.func @transform_2(%arg0: i32) -> (i32, i32) {
    %c0_i32 = arith.constant 0 : i32
    %c0_i32_0 = arith.constant 0 : i32
    %c0_i32_1 = arith.constant 0 : i32
    return %c0_i32, %c0_i32_0 : i32, i32
  }
  func.func @transform_3(%arg0: i32) -> (i32, i32) {
    %c0_i32 = arith.constant 0 : i32
    %c0_i32_0 = arith.constant 0 : i32
    return %arg0, %c0_i32 : i32, i32
  }
}

module attributes {stable_mosaic.version = 11 : i64} {
  func.func @_mm_kernel(%arg0: i32, %arg1: i32, %arg2: i32, %arg3: i32, %arg4: memref<1x128x128xbf16, #tpu.memory_space<vmem>>, %arg5: memref<1x128x128xbf16, #tpu.memory_space<vmem>>, %arg6: memref<1x128x128xf32, #tpu.memory_space<vmem>>, %arg7: memref<128x128xf32, #tpu.memory_space<vmem>>) attributes {dimension_semantics = [#tpu.dimension_semantics<parallel>, #tpu.dimension_semantics<parallel>, #tpu.dimension_semantics<parallel>, #tpu.dimension_semantics<arbitrary>], iteration_bounds = array<i64: 4, 1, 1, 1>, scalar_prefetch = 0 : i64, scratch_operands = 1 : i64, tpu.core_type = #tpu.core_type<tc>, window_params = [{transform_indices = @transform_0, window_bounds = array<i64: 1, 128, 128>}, {transform_indices = @transform_1, window_bounds = array<i64: 1, 128, 128>}, {transform_indices = @transform_2, window_bounds = array<i64: 1, 128, 128>}]} {
    %c0_i32 = arith.constant 0 : i32
    %0 = arith.cmpi eq, %arg3, %c0_i32 : i32
    %1 = arith.extui %0 : i1 to i32
    %c0_i32_0 = arith.constant 0 : i32
    %2 = arith.cmpi ne, %1, %c0_i32_0 : i32
    scf.if %2 {
      %cst_12 = arith.constant 0.000000e+00 : f32
      %14 = vector.broadcast %cst_12 : f32 to vector<128x128xf32>
      %c0_13 = arith.constant 0 : index
      %c0_14 = arith.constant 0 : index
      %15 = vector.load %arg7[%c0_13, %c0_14] : memref<128x128xf32, #tpu.memory_space<vmem>>, vector<128x128xf32>
      tpu.vector_store %arg7[%c0_13, %c0_14], %14 {strides = array<i32>} : memref<128x128xf32, #tpu.memory_space<vmem>>, vector<128x128xf32>,
    } else {
    }
    %c0 = arith.constant 0 : index
    %c0_1 = arith.constant 0 : index
    %3 = vector.load %arg7[%c0, %c0_1] : memref<128x128xf32, #tpu.memory_space<vmem>>, vector<128x128xf32>
    %c0_2 = arith.constant 0 : index
    %c0_3 = arith.constant 0 : index
    %c0_4 = arith.constant 0 : index
    %4 = vector.load %arg4[%c0_2, %c0_3, %c0_4] : memref<1x128x128xbf16, #tpu.memory_space<vmem>>, vector<1x128x128xbf16>
    %5 = vector.shape_cast %4 : vector<1x128x128xbf16> to vector<128x128xbf16>
    %c0_5 = arith.constant 0 : index
    %c0_6 = arith.constant 0 : index
    %c0_7 = arith.constant 0 : index
    %6 = vector.load %arg5[%c0_5, %c0_6, %c0_7] : memref<1x128x128xbf16, #tpu.memory_space<vmem>>, vector<1x128x128xbf16>
    %7 = vector.shape_cast %6 : vector<1x128x128xbf16> to vector<128x128xbf16>
    %cst = arith.constant dense<0.000000e+00> : vector<128x128xf32>
    %8 = tpu.matmul %5, %7, %cst {dimension_numbers = #tpu.dot_dimension_numbers<[1], [0], [0], [1], [0, 0, 1, 1], [], []>} : vector<128x128xbf16>, vector<128x128xbf16>, vector<128x128xf32> -> vector<128x128xf32>
    %9 = arith.addf %3, %8 : vector<128x128xf32>
    %c0_8 = arith.constant 0 : index
    %c0_9 = arith.constant 0 : index
    %10 = vector.load %arg7[%c0_8, %c0_9] : memref<128x128xf32, #tpu.memory_space<vmem>>, vector<128x128xf32>
    tpu.vector_store %arg7[%c0_8, %c0_9], %9 {strides = array<i32>} : memref<128x128xf32, #tpu.memory_space<vmem>>, vector<128x128xf32>,
    %c0_i32_10 = arith.constant 0 : i32
    %11 = arith.cmpi eq, %arg3, %c0_i32_10 : i32
    %12 = arith.extui %11 : i1 to i32
    %c0_i32_11 = arith.constant 0 : i32
    %13 = arith.cmpi ne, %12, %c0_i32_11 : i32
    scf.if %13 {
      %c0_12 = arith.constant 0 : index
      %c0_13 = arith.constant 0 : index
      %14 = vector.load %arg7[%c0_12, %c0_13] : memref<128x128xf32, #tpu.memory_space<vmem>>, vector<128x128xf32>
      %c0_14 = arith.constant 0 : index
      %c0_15 = arith.constant 0 : index
      %c0_16 = arith.constant 0 : index
      %15 = vector.load %arg6[%c0_14, %c0_15, %c0_16] : memref<1x128x128xf32, #tpu.memory_space<vmem>>, vector<1x128x128xf32>
      %16 = vector.shape_cast %15 : vector<1x128x128xf32> to vector<128x128xf32>
      %17 = vector.shape_cast %14 : vector<128x128xf32> to vector<1x128x128xf32>
      tpu.vector_store %arg6[%c0_14, %c0_15, %c0_16], %17 {strides = array<i32>} : memref<1x128x128xf32, #tpu.memory_space<vmem>>, vector<1x128x128xf32>,
    } else {
    }
    return
  }
  func.func @transform_0(%arg0: i32, %arg1: i32, %arg2: i32, %arg3: i32) -> (i32, i32, i32) {
    %c0_i32 = arith.constant 0 : i32
    return %arg0, %arg1, %arg3 : i32, i32, i32
  }
  func.func @transform_1(%arg0: i32, %arg1: i32, %arg2: i32, %arg3: i32) -> (i32, i32, i32) {
    %c0_i32 = arith.constant 0 : i32
    return %arg0, %arg3, %arg2 : i32, i32, i32
  }
  func.func @transform_2(%arg0: i32, %arg1: i32, %arg2: i32, %arg3: i32) -> (i32, i32, i32) {
    %c0_i32 = arith.constant 0 : i32
    return %arg0, %arg1, %arg2 : i32, i32, i32
  }
}

module attributes {stable_mosaic.version = 11 : i64} {
  func.func @_bn_stats_kernel(%arg0: i32, %arg1: memref<512x16xf32, #tpu.memory_space<vmem>>, %arg2: memref<1x16xf32, #tpu.memory_space<vmem>>, %arg3: memref<1x16xf32, #tpu.memory_space<vmem>>) attributes {dimension_semantics = [#tpu.dimension_semantics<arbitrary>], iteration_bounds = array<i64: 1>, scalar_prefetch = 0 : i64, scratch_operands = 0 : i64, tpu.core_type = #tpu.core_type<tc>, window_params = [{transform_indices = @transform_0, window_bounds = array<i64: 512, 16>}, {pipeline_mode = #tpu.pipeline_mode<synchronous>, transform_indices = @transform_1, window_bounds = array<i64: 1, 16>}, {pipeline_mode = #tpu.pipeline_mode<synchronous>, transform_indices = @transform_2, window_bounds = array<i64: 1, 16>}]} {
    %c0_i32 = arith.constant 0 : i32
    %0 = arith.cmpi eq, %arg0, %c0_i32 : i32
    %1 = arith.extui %0 : i1 to i32
    %c0_i32_0 = arith.constant 0 : i32
    %2 = arith.cmpi ne, %1, %c0_i32_0 : i32
    scf.if %2 {
      %cst_11 = arith.constant 0.000000e+00 : f32
      %15 = vector.broadcast %cst_11 : f32 to vector<1x16xf32>
      %c0_12 = arith.constant 0 : index
      %c0_13 = arith.constant 0 : index
      %16 = vector.load %arg2[%c0_12, %c0_13] : memref<1x16xf32, #tpu.memory_space<vmem>>, vector<1x16xf32>
      tpu.vector_store %arg2[%c0_12, %c0_13], %15 {strides = array<i32>} : memref<1x16xf32, #tpu.memory_space<vmem>>, vector<1x16xf32>,
      %cst_14 = arith.constant 0.000000e+00 : f32
      %17 = vector.broadcast %cst_14 : f32 to vector<1x16xf32>
      %c0_15 = arith.constant 0 : index
      %c0_16 = arith.constant 0 : index
      %18 = vector.load %arg3[%c0_15, %c0_16] : memref<1x16xf32, #tpu.memory_space<vmem>>, vector<1x16xf32>
      tpu.vector_store %arg3[%c0_15, %c0_16], %17 {strides = array<i32>} : memref<1x16xf32, #tpu.memory_space<vmem>>, vector<1x16xf32>,
    } else {
    }
    %c0 = arith.constant 0 : index
    %c0_1 = arith.constant 0 : index
    %3 = vector.load %arg1[%c0, %c0_1] : memref<512x16xf32, #tpu.memory_space<vmem>>, vector<512x16xf32>
    %c0_2 = arith.constant 0 : index
    %c0_3 = arith.constant 0 : index
    %4 = vector.load %arg2[%c0_2, %c0_3] : memref<1x16xf32, #tpu.memory_space<vmem>>, vector<1x16xf32>
    %cst = arith.constant dense<0.000000e+00> : vector<16xf32>
    %5 = vector.multi_reduction <add>, %3, %cst [0] : vector<512x16xf32> to vector<16xf32>
    %6 = vector.shape_cast %5 : vector<16xf32> to vector<1x16xf32>
    %7 = arith.addf %4, %6 : vector<1x16xf32>
    %c0_4 = arith.constant 0 : index
    %c0_5 = arith.constant 0 : index
    %8 = vector.load %arg2[%c0_4, %c0_5] : memref<1x16xf32, #tpu.memory_space<vmem>>, vector<1x16xf32>
    tpu.vector_store %arg2[%c0_4, %c0_5], %7 {strides = array<i32>} : memref<1x16xf32, #tpu.memory_space<vmem>>, vector<1x16xf32>,
    %c0_6 = arith.constant 0 : index
    %c0_7 = arith.constant 0 : index
    %9 = vector.load %arg3[%c0_6, %c0_7] : memref<1x16xf32, #tpu.memory_space<vmem>>, vector<1x16xf32>
    %10 = arith.mulf %3, %3 : vector<512x16xf32>
    %cst_8 = arith.constant dense<0.000000e+00> : vector<16xf32>
    %11 = vector.multi_reduction <add>, %10, %cst_8 [0] : vector<512x16xf32> to vector<16xf32>
    %12 = vector.shape_cast %11 : vector<16xf32> to vector<1x16xf32>
    %13 = arith.addf %9, %12 : vector<1x16xf32>
    %c0_9 = arith.constant 0 : index
    %c0_10 = arith.constant 0 : index
    %14 = vector.load %arg3[%c0_9, %c0_10] : memref<1x16xf32, #tpu.memory_space<vmem>>, vector<1x16xf32>
    tpu.vector_store %arg3[%c0_9, %c0_10], %13 {strides = array<i32>} : memref<1x16xf32, #tpu.memory_space<vmem>>, vector<1x16xf32>,
    return
  }
  func.func @transform_0(%arg0: i32) -> (i32, i32) {
    %c0_i32 = arith.constant 0 : i32
    %c0_i32_0 = arith.constant 0 : i32
    return %arg0, %c0_i32 : i32, i32
  }
  func.func @transform_1(%arg0: i32) -> (i32, i32) {
    %c0_i32 = arith.constant 0 : i32
    %c0_i32_0 = arith.constant 0 : i32
    %c0_i32_1 = arith.constant 0 : i32
    return %c0_i32, %c0_i32_0 : i32, i32
  }
  func.func @transform_2(%arg0: i32) -> (i32, i32) {
    %c0_i32 = arith.constant 0 : i32
    %c0_i32_0 = arith.constant 0 : i32
    %c0_i32_1 = arith.constant 0 : i32
    return %c0_i32, %c0_i32_0 : i32, i32
  }
}

module attributes {stable_mosaic.version = 11 : i64} {
  func.func @_scale_shift_relu_kernel(%arg0: i32, %arg1: memref<512x16xf32, #tpu.memory_space<vmem>>, %arg2: memref<1x16xf32, #tpu.memory_space<vmem>>, %arg3: memref<1x16xf32, #tpu.memory_space<vmem>>, %arg4: memref<512x16xbf16, #tpu.memory_space<vmem>>) attributes {dimension_semantics = [#tpu.dimension_semantics<parallel>], iteration_bounds = array<i64: 1>, scalar_prefetch = 0 : i64, scratch_operands = 0 : i64, tpu.core_type = #tpu.core_type<tc>, window_params = [{transform_indices = @transform_0, window_bounds = array<i64: 512, 16>}, {pipeline_mode = #tpu.pipeline_mode<synchronous>, transform_indices = @transform_1, window_bounds = array<i64: 1, 16>}, {pipeline_mode = #tpu.pipeline_mode<synchronous>, transform_indices = @transform_2, window_bounds = array<i64: 1, 16>}, {transform_indices = @transform_3, window_bounds = array<i64: 512, 16>}]} {
    %c0 = arith.constant 0 : index
    %c0_0 = arith.constant 0 : index
    %0 = vector.load %arg1[%c0, %c0_0] : memref<512x16xf32, #tpu.memory_space<vmem>>, vector<512x16xf32>
    %c0_1 = arith.constant 0 : index
    %c0_2 = arith.constant 0 : index
    %1 = vector.load %arg2[%c0_1, %c0_2] : memref<1x16xf32, #tpu.memory_space<vmem>>, vector<1x16xf32>
    %2 = vector.broadcast %1 : vector<1x16xf32> to vector<512x16xf32>
    %3 = arith.mulf %0, %2 : vector<512x16xf32>
    %c0_3 = arith.constant 0 : index
    %c0_4 = arith.constant 0 : index
    %4 = vector.load %arg3[%c0_3, %c0_4] : memref<1x16xf32, #tpu.memory_space<vmem>>, vector<1x16xf32>
    %5 = vector.broadcast %4 : vector<1x16xf32> to vector<512x16xf32>
    %6 = arith.addf %3, %5 : vector<512x16xf32>
    %cst = arith.constant 0.000000e+00 : f32
    %7 = vector.broadcast %cst : f32 to vector<512x16xf32>
    %8 = arith.maximumf %6, %7 : vector<512x16xf32>
    %9 = arith.truncf %8 : vector<512x16xf32> to vector<512x16xbf16>
    %c0_5 = arith.constant 0 : index
    %c0_6 = arith.constant 0 : index
    %10 = vector.load %arg4[%c0_5, %c0_6] : memref<512x16xbf16, #tpu.memory_space<vmem>>, vector<512x16xbf16>
    tpu.vector_store %arg4[%c0_5, %c0_6], %9 {strides = array<i32>} : memref<512x16xbf16, #tpu.memory_space<vmem>>, vector<512x16xbf16>,
    return
  }
  func.func @transform_0(%arg0: i32) -> (i32, i32) {
    %c0_i32 = arith.constant 0 : i32
    %c0_i32_0 = arith.constant 0 : i32
    return %arg0, %c0_i32 : i32, i32
  }
  func.func @transform_1(%arg0: i32) -> (i32, i32) {
    %c0_i32 = arith.constant 0 : i32
    %c0_i32_0 = arith.constant 0 : i32
    %c0_i32_1 = arith.constant 0 : i32
    return %c0_i32, %c0_i32_0 : i32, i32
  }
  func.func @transform_2(%arg0: i32) -> (i32, i32) {
    %c0_i32 = arith.constant 0 : i32
    %c0_i32_0 = arith.constant 0 : i32
    %c0_i32_1 = arith.constant 0 : i32
    return %c0_i32, %c0_i32_0 : i32, i32
  }
  func.func @transform_3(%arg0: i32) -> (i32, i32) {
    %c0_i32 = arith.constant 0 : i32
    %c0_i32_0 = arith.constant 0 : i32
    return %arg0, %c0_i32 : i32, i32
  }
}

module attributes {stable_mosaic.version = 11 : i64} {
  func.func @_mm_kernel(%arg0: i32, %arg1: i32, %arg2: i32, %arg3: i32, %arg4: memref<1x512x128xbf16, #tpu.memory_space<vmem>>, %arg5: memref<1x128x128xbf16, #tpu.memory_space<vmem>>, %arg6: memref<1x512x128xf32, #tpu.memory_space<vmem>>, %arg7: memref<512x128xf32, #tpu.memory_space<vmem>>) attributes {dimension_semantics = [#tpu.dimension_semantics<parallel>, #tpu.dimension_semantics<parallel>, #tpu.dimension_semantics<parallel>, #tpu.dimension_semantics<arbitrary>], iteration_bounds = array<i64: 4, 1, 1, 1>, scalar_prefetch = 0 : i64, scratch_operands = 1 : i64, tpu.core_type = #tpu.core_type<tc>, window_params = [{transform_indices = @transform_0, window_bounds = array<i64: 1, 512, 128>}, {transform_indices = @transform_1, window_bounds = array<i64: 1, 128, 128>}, {transform_indices = @transform_2, window_bounds = array<i64: 1, 512, 128>}]} {
    %c0_i32 = arith.constant 0 : i32
    %0 = arith.cmpi eq, %arg3, %c0_i32 : i32
    %1 = arith.extui %0 : i1 to i32
    %c0_i32_0 = arith.constant 0 : i32
    %2 = arith.cmpi ne, %1, %c0_i32_0 : i32
    scf.if %2 {
      %cst_12 = arith.constant 0.000000e+00 : f32
      %14 = vector.broadcast %cst_12 : f32 to vector<512x128xf32>
      %c0_13 = arith.constant 0 : index
      %c0_14 = arith.constant 0 : index
      %15 = vector.load %arg7[%c0_13, %c0_14] : memref<512x128xf32, #tpu.memory_space<vmem>>, vector<512x128xf32>
      tpu.vector_store %arg7[%c0_13, %c0_14], %14 {strides = array<i32>} : memref<512x128xf32, #tpu.memory_space<vmem>>, vector<512x128xf32>,
    } else {
    }
    %c0 = arith.constant 0 : index
    %c0_1 = arith.constant 0 : index
    %3 = vector.load %arg7[%c0, %c0_1] : memref<512x128xf32, #tpu.memory_space<vmem>>, vector<512x128xf32>
    %c0_2 = arith.constant 0 : index
    %c0_3 = arith.constant 0 : index
    %c0_4 = arith.constant 0 : index
    %4 = vector.load %arg4[%c0_2, %c0_3, %c0_4] : memref<1x512x128xbf16, #tpu.memory_space<vmem>>, vector<1x512x128xbf16>
    %5 = vector.shape_cast %4 : vector<1x512x128xbf16> to vector<512x128xbf16>
    %c0_5 = arith.constant 0 : index
    %c0_6 = arith.constant 0 : index
    %c0_7 = arith.constant 0 : index
    %6 = vector.load %arg5[%c0_5, %c0_6, %c0_7] : memref<1x128x128xbf16, #tpu.memory_space<vmem>>, vector<1x128x128xbf16>
    %7 = vector.shape_cast %6 : vector<1x128x128xbf16> to vector<128x128xbf16>
    %cst = arith.constant dense<0.000000e+00> : vector<512x128xf32>
    %8 = tpu.matmul %5, %7, %cst {dimension_numbers = #tpu.dot_dimension_numbers<[1], [0], [0], [1], [0, 0, 1, 1], [], []>} : vector<512x128xbf16>, vector<128x128xbf16>, vector<512x128xf32> -> vector<512x128xf32>
    %9 = arith.addf %3, %8 : vector<512x128xf32>
    %c0_8 = arith.constant 0 : index
    %c0_9 = arith.constant 0 : index
    %10 = vector.load %arg7[%c0_8, %c0_9] : memref<512x128xf32, #tpu.memory_space<vmem>>, vector<512x128xf32>
    tpu.vector_store %arg7[%c0_8, %c0_9], %9 {strides = array<i32>} : memref<512x128xf32, #tpu.memory_space<vmem>>, vector<512x128xf32>,
    %c0_i32_10 = arith.constant 0 : i32
    %11 = arith.cmpi eq, %arg3, %c0_i32_10 : i32
    %12 = arith.extui %11 : i1 to i32
    %c0_i32_11 = arith.constant 0 : i32
    %13 = arith.cmpi ne, %12, %c0_i32_11 : i32
    scf.if %13 {
      %c0_12 = arith.constant 0 : index
      %c0_13 = arith.constant 0 : index
      %14 = vector.load %arg7[%c0_12, %c0_13] : memref<512x128xf32, #tpu.memory_space<vmem>>, vector<512x128xf32>
      %c0_14 = arith.constant 0 : index
      %c0_15 = arith.constant 0 : index
      %c0_16 = arith.constant 0 : index
      %15 = vector.load %arg6[%c0_14, %c0_15, %c0_16] : memref<1x512x128xf32, #tpu.memory_space<vmem>>, vector<1x512x128xf32>
      %16 = vector.shape_cast %15 : vector<1x512x128xf32> to vector<512x128xf32>
      %17 = vector.shape_cast %14 : vector<512x128xf32> to vector<1x512x128xf32>
      tpu.vector_store %arg6[%c0_14, %c0_15, %c0_16], %17 {strides = array<i32>} : memref<1x512x128xf32, #tpu.memory_space<vmem>>, vector<1x512x128xf32>,
    } else {
    }
    return
  }
  func.func @transform_0(%arg0: i32, %arg1: i32, %arg2: i32, %arg3: i32) -> (i32, i32, i32) {
    %c0_i32 = arith.constant 0 : i32
    return %arg0, %arg1, %arg3 : i32, i32, i32
  }
  func.func @transform_1(%arg0: i32, %arg1: i32, %arg2: i32, %arg3: i32) -> (i32, i32, i32) {
    %c0_i32 = arith.constant 0 : i32
    return %arg0, %arg3, %arg2 : i32, i32, i32
  }
  func.func @transform_2(%arg0: i32, %arg1: i32, %arg2: i32, %arg3: i32) -> (i32, i32, i32) {
    %c0_i32 = arith.constant 0 : i32
    return %arg0, %arg1, %arg2 : i32, i32, i32
  }
}

module attributes {stable_mosaic.version = 11 : i64} {
  func.func @_bn_stats_kernel(%arg0: i32, %arg1: memref<512x8xf32, #tpu.memory_space<vmem>>, %arg2: memref<1x8xf32, #tpu.memory_space<vmem>>, %arg3: memref<1x8xf32, #tpu.memory_space<vmem>>) attributes {dimension_semantics = [#tpu.dimension_semantics<arbitrary>], iteration_bounds = array<i64: 4>, scalar_prefetch = 0 : i64, scratch_operands = 0 : i64, tpu.core_type = #tpu.core_type<tc>, window_params = [{transform_indices = @transform_0, window_bounds = array<i64: 512, 8>}, {pipeline_mode = #tpu.pipeline_mode<synchronous>, transform_indices = @transform_1, window_bounds = array<i64: 1, 8>}, {pipeline_mode = #tpu.pipeline_mode<synchronous>, transform_indices = @transform_2, window_bounds = array<i64: 1, 8>}]} {
    %c0_i32 = arith.constant 0 : i32
    %0 = arith.cmpi eq, %arg0, %c0_i32 : i32
    %1 = arith.extui %0 : i1 to i32
    %c0_i32_0 = arith.constant 0 : i32
    %2 = arith.cmpi ne, %1, %c0_i32_0 : i32
    scf.if %2 {
      %cst_11 = arith.constant 0.000000e+00 : f32
      %15 = vector.broadcast %cst_11 : f32 to vector<1x8xf32>
      %c0_12 = arith.constant 0 : index
      %c0_13 = arith.constant 0 : index
      %16 = vector.load %arg2[%c0_12, %c0_13] : memref<1x8xf32, #tpu.memory_space<vmem>>, vector<1x8xf32>
      tpu.vector_store %arg2[%c0_12, %c0_13], %15 {strides = array<i32>} : memref<1x8xf32, #tpu.memory_space<vmem>>, vector<1x8xf32>,
      %cst_14 = arith.constant 0.000000e+00 : f32
      %17 = vector.broadcast %cst_14 : f32 to vector<1x8xf32>
      %c0_15 = arith.constant 0 : index
      %c0_16 = arith.constant 0 : index
      %18 = vector.load %arg3[%c0_15, %c0_16] : memref<1x8xf32, #tpu.memory_space<vmem>>, vector<1x8xf32>
      tpu.vector_store %arg3[%c0_15, %c0_16], %17 {strides = array<i32>} : memref<1x8xf32, #tpu.memory_space<vmem>>, vector<1x8xf32>,
    } else {
    }
    %c0 = arith.constant 0 : index
    %c0_1 = arith.constant 0 : index
    %3 = vector.load %arg1[%c0, %c0_1] : memref<512x8xf32, #tpu.memory_space<vmem>>, vector<512x8xf32>
    %c0_2 = arith.constant 0 : index
    %c0_3 = arith.constant 0 : index
    %4 = vector.load %arg2[%c0_2, %c0_3] : memref<1x8xf32, #tpu.memory_space<vmem>>, vector<1x8xf32>
    %cst = arith.constant dense<0.000000e+00> : vector<8xf32>
    %5 = vector.multi_reduction <add>, %3, %cst [0] : vector<512x8xf32> to vector<8xf32>
    %6 = vector.shape_cast %5 : vector<8xf32> to vector<1x8xf32>
    %7 = arith.addf %4, %6 : vector<1x8xf32>
    %c0_4 = arith.constant 0 : index
    %c0_5 = arith.constant 0 : index
    %8 = vector.load %arg2[%c0_4, %c0_5] : memref<1x8xf32, #tpu.memory_space<vmem>>, vector<1x8xf32>
    tpu.vector_store %arg2[%c0_4, %c0_5], %7 {strides = array<i32>} : memref<1x8xf32, #tpu.memory_space<vmem>>, vector<1x8xf32>,
    %c0_6 = arith.constant 0 : index
    %c0_7 = arith.constant 0 : index
    %9 = vector.load %arg3[%c0_6, %c0_7] : memref<1x8xf32, #tpu.memory_space<vmem>>, vector<1x8xf32>
    %10 = arith.mulf %3, %3 : vector<512x8xf32>
    %cst_8 = arith.constant dense<0.000000e+00> : vector<8xf32>
    %11 = vector.multi_reduction <add>, %10, %cst_8 [0] : vector<512x8xf32> to vector<8xf32>
    %12 = vector.shape_cast %11 : vector<8xf32> to vector<1x8xf32>
    %13 = arith.addf %9, %12 : vector<1x8xf32>
    %c0_9 = arith.constant 0 : index
    %c0_10 = arith.constant 0 : index
    %14 = vector.load %arg3[%c0_9, %c0_10] : memref<1x8xf32, #tpu.memory_space<vmem>>, vector<1x8xf32>
    tpu.vector_store %arg3[%c0_9, %c0_10], %13 {strides = array<i32>} : memref<1x8xf32, #tpu.memory_space<vmem>>, vector<1x8xf32>,
    return
  }
  func.func @transform_0(%arg0: i32) -> (i32, i32) {
    %c0_i32 = arith.constant 0 : i32
    %c0_i32_0 = arith.constant 0 : i32
    return %arg0, %c0_i32 : i32, i32
  }
  func.func @transform_1(%arg0: i32) -> (i32, i32) {
    %c0_i32 = arith.constant 0 : i32
    %c0_i32_0 = arith.constant 0 : i32
    %c0_i32_1 = arith.constant 0 : i32
    return %c0_i32, %c0_i32_0 : i32, i32
  }
  func.func @transform_2(%arg0: i32) -> (i32, i32) {
    %c0_i32 = arith.constant 0 : i32
    %c0_i32_0 = arith.constant 0 : i32
    %c0_i32_1 = arith.constant 0 : i32
    return %c0_i32, %c0_i32_0 : i32, i32
  }
}

module attributes {stable_mosaic.version = 11 : i64} {
  func.func @_scale_shift_relu_kernel(%arg0: i32, %arg1: memref<512x8xf32, #tpu.memory_space<vmem>>, %arg2: memref<1x8xf32, #tpu.memory_space<vmem>>, %arg3: memref<1x8xf32, #tpu.memory_space<vmem>>, %arg4: memref<512x8xbf16, #tpu.memory_space<vmem>>) attributes {dimension_semantics = [#tpu.dimension_semantics<parallel>], iteration_bounds = array<i64: 4>, scalar_prefetch = 0 : i64, scratch_operands = 0 : i64, tpu.core_type = #tpu.core_type<tc>, window_params = [{transform_indices = @transform_0, window_bounds = array<i64: 512, 8>}, {pipeline_mode = #tpu.pipeline_mode<synchronous>, transform_indices = @transform_1, window_bounds = array<i64: 1, 8>}, {pipeline_mode = #tpu.pipeline_mode<synchronous>, transform_indices = @transform_2, window_bounds = array<i64: 1, 8>}, {transform_indices = @transform_3, window_bounds = array<i64: 512, 8>}]} {
    %c0 = arith.constant 0 : index
    %c0_0 = arith.constant 0 : index
    %0 = vector.load %arg1[%c0, %c0_0] : memref<512x8xf32, #tpu.memory_space<vmem>>, vector<512x8xf32>
    %c0_1 = arith.constant 0 : index
    %c0_2 = arith.constant 0 : index
    %1 = vector.load %arg2[%c0_1, %c0_2] : memref<1x8xf32, #tpu.memory_space<vmem>>, vector<1x8xf32>
    %2 = vector.broadcast %1 : vector<1x8xf32> to vector<512x8xf32>
    %3 = arith.mulf %0, %2 : vector<512x8xf32>
    %c0_3 = arith.constant 0 : index
    %c0_4 = arith.constant 0 : index
    %4 = vector.load %arg3[%c0_3, %c0_4] : memref<1x8xf32, #tpu.memory_space<vmem>>, vector<1x8xf32>
    %5 = vector.broadcast %4 : vector<1x8xf32> to vector<512x8xf32>
    %6 = arith.addf %3, %5 : vector<512x8xf32>
    %cst = arith.constant 0.000000e+00 : f32
    %7 = vector.broadcast %cst : f32 to vector<512x8xf32>
    %8 = arith.maximumf %6, %7 : vector<512x8xf32>
    %9 = arith.truncf %8 : vector<512x8xf32> to vector<512x8xbf16>
    %c0_5 = arith.constant 0 : index
    %c0_6 = arith.constant 0 : index
    %10 = vector.load %arg4[%c0_5, %c0_6] : memref<512x8xbf16, #tpu.memory_space<vmem>>, vector<512x8xbf16>
    tpu.vector_store %arg4[%c0_5, %c0_6], %9 {strides = array<i32>} : memref<512x8xbf16, #tpu.memory_space<vmem>>, vector<512x8xbf16>,
    return
  }
  func.func @transform_0(%arg0: i32) -> (i32, i32) {
    %c0_i32 = arith.constant 0 : i32
    %c0_i32_0 = arith.constant 0 : i32
    return %arg0, %c0_i32 : i32, i32
  }
  func.func @transform_1(%arg0: i32) -> (i32, i32) {
    %c0_i32 = arith.constant 0 : i32
    %c0_i32_0 = arith.constant 0 : i32
    %c0_i32_1 = arith.constant 0 : i32
    return %c0_i32, %c0_i32_0 : i32, i32
  }
  func.func @transform_2(%arg0: i32) -> (i32, i32) {
    %c0_i32 = arith.constant 0 : i32
    %c0_i32_0 = arith.constant 0 : i32
    %c0_i32_1 = arith.constant 0 : i32
    return %c0_i32, %c0_i32_0 : i32, i32
  }
  func.func @transform_3(%arg0: i32) -> (i32, i32) {
    %c0_i32 = arith.constant 0 : i32
    %c0_i32_0 = arith.constant 0 : i32
    return %arg0, %c0_i32 : i32, i32
  }
}

module attributes {stable_mosaic.version = 11 : i64} {
  func.func @_mm_t_tanh_kernel(%arg0: i32, %arg1: i32, %arg2: i32, %arg3: memref<1x16x128xbf16, #tpu.memory_space<vmem>>, %arg4: memref<1x128x512xbf16, #tpu.memory_space<vmem>>, %arg5: memref<1x16x512xf32, #tpu.memory_space<vmem>>, %arg6: memref<16x512xf32, #tpu.memory_space<vmem>>) attributes {dimension_semantics = [#tpu.dimension_semantics<parallel>, #tpu.dimension_semantics<parallel>, #tpu.dimension_semantics<arbitrary>], iteration_bounds = array<i64: 4, 4, 1>, scalar_prefetch = 0 : i64, scratch_operands = 1 : i64, tpu.core_type = #tpu.core_type<tc>, window_params = [{transform_indices = @transform_0, window_bounds = array<i64: 1, 16, 128>}, {transform_indices = @transform_1, window_bounds = array<i64: 1, 128, 512>}, {transform_indices = @transform_2, window_bounds = array<i64: 1, 16, 512>}]} {
    %c0_i32 = arith.constant 0 : i32
    %0 = arith.cmpi eq, %arg2, %c0_i32 : i32
    %1 = arith.extui %0 : i1 to i32
    %c0_i32_0 = arith.constant 0 : i32
    %2 = arith.cmpi ne, %1, %c0_i32_0 : i32
    scf.if %2 {
      %cst_12 = arith.constant 0.000000e+00 : f32
      %14 = vector.broadcast %cst_12 : f32 to vector<16x512xf32>
      %c0_13 = arith.constant 0 : index
      %c0_14 = arith.constant 0 : index
      %15 = vector.load %arg6[%c0_13, %c0_14] : memref<16x512xf32, #tpu.memory_space<vmem>>, vector<16x512xf32>
      tpu.vector_store %arg6[%c0_13, %c0_14], %14 {strides = array<i32>} : memref<16x512xf32, #tpu.memory_space<vmem>>, vector<16x512xf32>,
    } else {
    }
    %c0 = arith.constant 0 : index
    %c0_1 = arith.constant 0 : index
    %3 = vector.load %arg6[%c0, %c0_1] : memref<16x512xf32, #tpu.memory_space<vmem>>, vector<16x512xf32>
    %c0_2 = arith.constant 0 : index
    %c0_3 = arith.constant 0 : index
    %c0_4 = arith.constant 0 : index
    %4 = vector.load %arg3[%c0_2, %c0_3, %c0_4] : memref<1x16x128xbf16, #tpu.memory_space<vmem>>, vector<1x16x128xbf16>
    %5 = vector.shape_cast %4 : vector<1x16x128xbf16> to vector<16x128xbf16>
    %c0_5 = arith.constant 0 : index
    %c0_6 = arith.constant 0 : index
    %c0_7 = arith.constant 0 : index
    %6 = vector.load %arg4[%c0_5, %c0_6, %c0_7] : memref<1x128x512xbf16, #tpu.memory_space<vmem>>, vector<1x128x512xbf16>
    %7 = vector.shape_cast %6 : vector<1x128x512xbf16> to vector<128x512xbf16>
    %cst = arith.constant dense<0.000000e+00> : vector<16x512xf32>
    %8 = tpu.matmul %5, %7, %cst {dimension_numbers = #tpu.dot_dimension_numbers<[1], [0], [0], [1], [0, 0, 1, 1], [], []>} : vector<16x128xbf16>, vector<128x512xbf16>, vector<16x512xf32> -> vector<16x512xf32>
    %9 = arith.addf %3, %8 : vector<16x512xf32>
    %c0_8 = arith.constant 0 : index
    %c0_9 = arith.constant 0 : index
    %10 = vector.load %arg6[%c0_8, %c0_9] : memref<16x512xf32, #tpu.memory_space<vmem>>, vector<16x512xf32>
    tpu.vector_store %arg6[%c0_8, %c0_9], %9 {strides = array<i32>} : memref<16x512xf32, #tpu.memory_space<vmem>>, vector<16x512xf32>,
    %c0_i32_10 = arith.constant 0 : i32
    %11 = arith.cmpi eq, %arg2, %c0_i32_10 : i32
    %12 = arith.extui %11 : i1 to i32
    %c0_i32_11 = arith.constant 0 : i32
    %13 = arith.cmpi ne, %12, %c0_i32_11 : i32
    scf.if %13 {
      %c0_12 = arith.constant 0 : index
      %c0_13 = arith.constant 0 : index
      %14 = vector.load %arg6[%c0_12, %c0_13] : memref<16x512xf32, #tpu.memory_space<vmem>>, vector<16x512xf32>
      %15 = math.tanh %14 : vector<16x512xf32>
      %c0_14 = arith.constant 0 : index
      %c0_15 = arith.constant 0 : index
      %c0_16 = arith.constant 0 : index
      %16 = vector.load %arg5[%c0_14, %c0_15, %c0_16] : memref<1x16x512xf32, #tpu.memory_space<vmem>>, vector<1x16x512xf32>
      %17 = vector.shape_cast %16 : vector<1x16x512xf32> to vector<16x512xf32>
      %18 = vector.shape_cast %15 : vector<16x512xf32> to vector<1x16x512xf32>
      tpu.vector_store %arg5[%c0_14, %c0_15, %c0_16], %18 {strides = array<i32>} : memref<1x16x512xf32, #tpu.memory_space<vmem>>, vector<1x16x512xf32>,
    } else {
    }
    return
  }
  func.func @transform_0(%arg0: i32, %arg1: i32, %arg2: i32) -> (i32, i32, i32) {
    %c0_i32 = arith.constant 0 : i32
    %c0_i32_0 = arith.constant 0 : i32
    return %arg0, %c0_i32, %arg2 : i32, i32, i32
  }
  func.func @transform_1(%arg0: i32, %arg1: i32, %arg2: i32) -> (i32, i32, i32) {
    %c0_i32 = arith.constant 0 : i32
    return %arg0, %arg2, %arg1 : i32, i32, i32
  }
  func.func @transform_2(%arg0: i32, %arg1: i32, %arg2: i32) -> (i32, i32, i32) {
    %c0_i32 = arith.constant 0 : i32
    %c0_i32_0 = arith.constant 0 : i32
    return %arg0, %c0_i32, %arg1 : i32, i32, i32
  }
}

</mosaic_0001>

<bundles_post_ra>
// kernel: squeeze.65
= control target key start
LH: loop header
LB: loop body
LE: loop exit
PB: predicated region body
PF: predicated region fallthrough
CT: control target
= control target key end

     0   :  { %vm42_vm0 = vcmask 523264   ;;  %vm81_vm1 = vcmask 1047556   ;;  %s122_s8 = smov 64   ;;  %s199_s0 = inlined_call_operand.vmem [shape: f32[1,2,1024], index: 0, kind: input, shape index: {}]   ;;  %s200_s1 = inlined_call_operand.vmem [shape: f32[32,64], index: 1, kind: output, shape index: {}]  }
   0x1   :  { %v105_v0 = vld [vmem:[%s199_s0 + $0xe] sm:$0x3]  ;;  %v106_v1 = vld [vmem:[%s199_s0 + $0xc] sm:$0x3]  ;;  %v107_v2 = vld [vmem:[%s199_s0 + $0xa] sm:$0x3] }
   0x2   :  { %9 = vst [vmem:[#allocation0 + $0x38] sm:$0x3] %v105_v0  ;;  %14 = vst [vmem:[#allocation0 + $0x30] sm:$0x3] %v106_v1  ;;  %v108_v3 = vld [vmem:[%s199_s0 + $0x8] sm:$0x3] }
   0x3   :  { %19 = vst [vmem:[#allocation0 + $0x28] sm:$0x3] %v107_v2  ;;  %v109_v4 = vld [vmem:[%s199_s0 + $0x6] sm:$0x3]  ;;  %v110_v5 = vld [vmem:[%s199_s0 + $0x4] sm:$0x3] }
   0x4   :  { %24 = vst [vmem:[#allocation0 + $0x20] sm:$0x3] %v108_v3  ;;  %29 = vst [vmem:[#allocation0 + $0x18] sm:$0x3] %v109_v4  ;;  %v111_v6 = vld [vmem:[%s199_s0 + $0x2] sm:$0x3] }
   0x5   :  { %34 = vst [vmem:[#allocation0 + $0x10] sm:$0x3] %v110_v5  ;;  %v39_v7 = vld [vmem:[%s199_s0] sm:$0x3]  ;;  %38 = vst [vmem:[#allocation0 + $0x8] sm:$0x3] %v111_v6 }
   0x6   :  { %40 = vst [vmem:[#allocation0] sm:$0x3] %v39_v7 }
   0x9   :  { %v70_v9 = vld [vmem:[#allocation0 + $0x30] sm:$0x3]   ;;  %v75_v10 = vld [vmem:[#allocation0 + $0x38] sm:$0x3]  }
   0xa   :  { %v65_v8 = vld [vmem:[#allocation0 + $0x28] sm:$0x3]   ;;  %117 = vst.msk [vmem:[%s200_s1 + $0xc] ss:$16 sm:$0x3] %vm42_vm0, %v70_v9  }
   0xb   :  { %v55_v12 = vld [vmem:[#allocation0 + $0x18] sm:$0x3]   ;;  %v60_v13 = vld [vmem:[#allocation0 + $0x20] sm:$0x3]  }
   0xc   :  { %v50_v11 = vld [vmem:[#allocation0 + $0x10] sm:$0x3]   ;;  %116 = vst.msk [vmem:[%s200_s1 + $0xa] ss:$16 sm:$0x3] %vm42_vm0, %v65_v8  }
   0xd   :  { %118 = vst.msk [vmem:[%s200_s1 + $0xe] ss:$16 sm:$0x3] %vm42_vm0, %v75_v10   ;;  %v41_v14 = vld [vmem:[#allocation0] sm:$0x3]  }
   0xe   :  { %v45_v15 = vld [vmem:[#allocation0 + $0x8] sm:$0x3]   ;;  %113 = vst.msk [vmem:[%s200_s1 + $0x4] ss:$16 sm:$0x3] %vm42_vm0, %v50_v11  }
   0xf   :  { %114 = vst.msk [vmem:[%s200_s1 + $0x6] ss:$16 sm:$0x3] %vm42_vm0, %v55_v12   ;;  %115 = vst.msk [vmem:[%s200_s1 + $0x8] ss:$16 sm:$0x3] %vm42_vm0, %v60_v13  }
  0x10   :  { %43 = vst.msk [vmem:[%s200_s1] ss:$16 sm:$0x3] %vm42_vm0, %v41_v14   ;;  %112 = vst.msk [vmem:[%s200_s1 + $0x2] ss:$16 sm:$0x3] %vm42_vm0, %v45_v15  }
  0x11   :  { %v79_v16 = vld [vmem:[#allocation0] ss:$8 sm:$0xf]   ;;  %v89_v19 = vld [vmem:[#allocation0 + $0x1] ss:$8 sm:$0xf]  }
  0x12   :  { %v80_v17 = vld [vmem:[#allocation0] ss:$8 sm:$0xf0]   ;;  %v91_v20 = vld [vmem:[#allocation0 + $0x1] ss:$8 sm:$0xf0]  }
  0x13   :  { %v82_v18 = vsel %vm81_vm1, %v80_v17, %v79_v16  ;;  %v93_v21 = vsel %vm81_vm1, %v91_v20, %v89_v19 }
  0x14   :  { %83 = vrot.lane.b32.xlu0 %v82_v18, %s122_s8 }
  0x18   :  { %94 = vrot.lane.b32.xlu0 %v93_v21, %s122_s8 }
  0x86   :  { %v84_v22 = vpop.permute.xlu0 %83  }
  0x87   :  { %119 = vst.msk [vmem:[%s200_s1 + $0x1] ss:$2 sm:$0xff] %vm42_vm0, %v84_v22  }
  0x8a   :  { %v95_v23 = vpop.permute.xlu0 %94  }
  0x8b   :  { %120 = vst.msk [vmem:[%s200_s1 + $0x11] ss:$2 sm:$0xff] %vm42_vm0, %v95_v23  }

// kernel: generator_forward.15
= control target key start
LH: loop header
LB: loop body
LE: loop exit
PB: predicated region body
PF: predicated region fallthrough
CT: control target
= control target key end

     0   :  { %vm60_vm0 = vcmask 519168   ;;  %s129_s0 = inlined_call_operand.vmem [shape: f32[32,64], index: 0, kind: input, shape index: {}]   ;;  %s130_s1 = inlined_call_operand.vmem [shape: f32[1,64], index: 1, kind: input, shape index: {}]   ;;  %s131_s2 = inlined_call_operand.vmem [shape: f32[1,64], index: 2, kind: input, shape index: {}]   ;;  %s132_s3 = inlined_call_operand.vmem [shape: bf16[32,64], index: 3, kind: output, shape index: {}]  }
   0x1   :  { %v14_v0 = vld [vmem:[%s129_s0] sm:$0xff]  ;;  %v15_v4 = vld [vmem:[%s129_s0 + $0x8] sm:$0xff]  ;;  %v16_v5 = vld [vmem:[%s129_s0 + $0x10] sm:$0xff] }
   0x2   :  { %v69_v1 = vld [vmem:[%s130_s1] ss:$0 sm:$0xff]  ;;  %v17_v6 = vld [vmem:[%s129_s0 + $0x18] sm:$0xff] }
   0x3   :  { %v70_v2 = vld [vmem:[%s131_s2] ss:$0 sm:$0xff]  ;;  %v25_v3 = vmul.f32 %v69_v1, %v14_v0  ;;  %v26_v7 = vmul.f32 %v69_v1, %v15_v4  ;;  %v27_v8 = vmul.f32 %v69_v1, %v16_v5  ;;  %v28_v9 = vmul.f32 %v69_v1, %v17_v6 }
   0x5   :  { %v36_v10 = vadd.f32 %v70_v2, %v25_v3  ;;  %v37_v11 = vadd.f32 %v70_v2, %v26_v7  ;;  %v38_v12 = vadd.f32 %v70_v2, %v27_v8  ;;  %v39_v13 = vadd.f32 %v70_v2, %v28_v9 }
   0x7   :  { %v40_v14 = vmax.f32 %v36_v10, 0.0  ;;  %v41_v15 = vmax.f32 %v37_v11, 0.0  ;;  %v42_v16 = vmax.f32 %v38_v12, 0.0  ;;  %v43_v17 = vmax.f32 %v39_v13, 0.0 }
   0x9   :  { %v75_v18 = vpack.c.bf16 %v40_v14, %v40_v14  ;;  %v76_v19 = vpack.c.bf16 %v41_v15, %v41_v15  ;;  %v77_v20 = vpack.c.bf16 %v42_v16, %v42_v16  ;;  %v78_v21 = vpack.c.bf16 %v43_v17, %v43_v17 }
   0xb   :  { %61 = vst.msk [vmem:[%s132_s3] sm:$0xf] %vm60_vm0, %v75_v18  ;;  %62 = vst.msk [vmem:[%s132_s3 + $0x4] sm:$0xf] %vm60_vm0, %v76_v19 }
   0xc   :  { %63 = vst.msk [vmem:[%s132_s3 + $0x8] sm:$0xf] %vm60_vm0, %v77_v20  ;;  %64 = vst.msk [vmem:[%s132_s3 + $0xc] sm:$0xf] %vm60_vm0, %v78_v21 }

// kernel: generator_forward.14
= control target key start
LH: loop header
LB: loop body
LE: loop exit
PB: predicated region body
PF: predicated region fallthrough
CT: control target
= control target key end

     0   :  { %vm14_vm0 = vcmask 516096   ;;  %vm22_vm1 = vcmask 523264   ;;  %v68_v0 = vmov 0.0   ;;  %s126_s0 = inlined_call_operand.vmem [shape: f32[32,64], index: 0, kind: input, shape index: {}]   ;;  %s127_s1 = inlined_call_operand.vmem [shape: f32[1,64], index: 1, kind: output, shape index: {0}]   ;;  %s128_s2 = inlined_call_operand.vmem [shape: f32[1,64], index: 2, kind: output, shape index: {1}]  }
   0x1   :  { %15 = vst.msk [vmem:[%s127_s1] sm:$0x1] %vm14_vm0, %v68_v0  ;;  %v17_v1 = vld [vmem:[%s126_s0] sm:$0xff]  ;;  %v18_v2 = vld [vmem:[%s126_s0 + $0x8] sm:$0xff]  ;;  %v19_v3 = vld [vmem:[%s126_s0 + $0x10] sm:$0xff] }
   0x2   :  { %16 = vst.msk [vmem:[%s128_s2] sm:$0x1] %vm14_vm0, %v68_v0  ;;  %v20_v4 = vld [vmem:[%s126_s0 + $0x18] sm:$0xff]  ;;  %v23_v5 = vsel %vm22_vm1, %v17_v1, 0.0  ;;  %v24_v6 = vsel %vm22_vm1, %v18_v2, 0.0  ;;  %v26_v7 = vsel %vm22_vm1, %v19_v3, 0.0  ;;  %v40_v8 = vmul.f32 %v17_v1, %v17_v1 }
   0x3   :  { %v25_v9 = vadd.f32 %v24_v6, %v23_v5  ;;  %v41_v10 = vmul.f32 %v18_v2, %v18_v2  ;;  %v42_v11 = vmul.f32 %v19_v3, %v19_v3  ;;  %v28_v12 = vsel %vm22_vm1, %v20_v4, 0.0 }
   0x4   :  { %v43_v13 = vmul.f32 %v20_v4, %v20_v4  ;;  %v44_v14 = vsel %vm22_vm1, %v40_v8, 0.0 }
   0x5   :  { %v27_v15 = vadd.f32 %v26_v7, %v25_v9  ;;  %v45_v16 = vsel %vm22_vm1, %v41_v10, 0.0  ;;  %v47_v17 = vsel %vm22_vm1, %v42_v11, 0.0 }
   0x6   :  { %v46_v18 = vadd.f32 %v45_v16, %v44_v14  ;;  %v49_v20 = vsel %vm22_vm1, %v43_v13, 0.0 }
   0x7   :  { %v29_v19 = vadd.f32 %v28_v12, %v27_v15 }
   0x8   :  { %v48_v21 = vadd.f32 %v47_v17, %v46_v18  ;;  %v21_v31 = vld [vmem:[%s127_s1] sm:$0x1] }
   0x9   :  { %v30_v22 = vrot.slane %v29_v19, 4  ;;  %v39_v36 = vld [vmem:[%s128_s2] sm:$0x1] }
   0xa   :  { %v50_v23 = vadd.f32 %v49_v20, %v48_v21 }
   0xb   :  { %v31_v24 = vadd.f32 %v30_v22, %v29_v19 }
   0xc   :  { %v51_v25 = vrot.slane %v50_v23, 4 }
   0xd   :  { %v32_v26 = vrot.slane %v31_v24, 2 }
   0xe   :  { %v52_v27 = vadd.f32 %v51_v25, %v50_v23 }
   0xf   :  { %v33_v28 = vadd.f32 %v32_v26, %v31_v24 }
  0x10   :  { %v53_v29 = vrot.slane %v52_v27, 2 }
  0x11   :  { %v34_v30 = vrot.slane %v33_v28, 1 }
  0x12   :  { %v54_v32 = vadd.f32 %v53_v29, %v52_v27 }
  0x13   :  { %v35_v33 = vadd.f32 %v34_v30, %v33_v28 }
  0x14   :  { %v55_v34 = vrot.slane %v54_v32, 1 }
  0x15   :  { %v36_v35 = vadd.f32 %v35_v33, %v21_v31 }
  0x16   :  { %v56_v37 = vadd.f32 %v55_v34, %v54_v32 }
  0x17   :  { %38 = vst.msk [vmem:[%s127_s1] sm:$0x1] %vm14_vm0, %v36_v35 }
  0x18   :  { %v57_v38 = vadd.f32 %v56_v37, %v39_v36 }
  0x1a   :  { %58 = vst.msk [vmem:[%s128_s2] sm:$0x1] %vm14_vm0, %v57_v38 }

// kernel: generator_forward.13
= control target key start
LH: loop header
LB: loop body
LE: loop exit
PB: predicated region body
PF: predicated region fallthrough
CT: control target
= control target key end

     0   :  { %s803_s9 = smov 0   ;;  %s805_s10 = smov 0   ;;  %s900_s0 = inlined_call_operand.vmem [shape: bf16[1,16,128], index: 0, kind: input, shape index: {}]   ;;  %s901_s1 = inlined_call_operand.vmem [shape: bf16[1,128,1024], index: 1, kind: input, shape index: {}]   ;;  %s902_s2 = inlined_call_operand.vmem [shape: f32[1,16,1024], index: 2, kind: output, shape index: {}]  }
   0x1   :  { %s807_s11 = smov 0   ;;  %s809_s12 = smov 0  }
   0x2   :  { %s811_s13 = smov 0  }
   0x3 LB: > { %s30_s14 = sadd.s32 1, %s781_s12  ;;  %s646_s15 = sadd.s32 4294967295, %s785_s13   ;;  %s785_s13 = sphi %s811_s13, %s12_s13   ;;  %s781_s12 = sphi %s809_s12, %s907_s12   ;;  %s777_s11 = sphi %s807_s11, %s906_s11   ;;  %s773_s10 = sphi %s805_s10, %s905_s10   ;;  %s769_s9 = sphi %s803_s9, %s904_s9  }
   0x4   : > { %p32_p0 = scmp.ge.s32.totalorder %s30_s14, 4  ;;  %p86_p1 = scmp.ne.s32.totalorder %s773_s10, %s769_s9 }
   0x5   : > { %p87_p2 = scmp.eq.s32.totalorder %s785_s13, 0  ;;  %p120_p4 = scmp.eq.s32.totalorder %s646_s15, 3 }
   0x6   : > { %s909_s14 = smov (%p32_p0, %s30_s14), 0  ;;  %s79_s17 = sadd.s32 1, %s773_s10 }
   0x7   : > { %p88_p3 = por %p87_p2, %p86_p1  ;;  %s75_s16 = ssub.s32 %s781_s12, %s909_s14 }
   0x8   : > { %p77_p5 = scmp.eq.s32.totalorder %s75_s16, 0  ;;  %p838_p6 = por %p120_p4, %p86_p1 }
   0x9   : > { %p650_p7 = scmp.ge.s32.totalorder %s785_s13, 4 }
   0xa   : > { %s843_s19 = scalar_select %p77_p5, %s773_s10, %s79_s17  }
   0xb   : > { %158 = sbr.rel (%p650_p7) target bundleno = 36 (0x24), region = 20 }
  0x10   : > { %161 = sbr.rel (!%p88_p3) target bundleno = 36 (0x24), region = 24  ;;  %s163_s20 = sand.u32 (%p88_p3), 1, %s773_s10  }
  0x11   : > { %s679_s21 = sshll.u32 (%p88_p3), %s781_s12, 3  ;;  %s651_s22 = sshll.u32 (%p88_p3), %s163_s20, 7 }
  0x12   : > { %s851_s25 = scalar_lea.vmem (%p88_p3), %s901_s1, %s679_s21  ;;  %s165_s26 = scalar_lea.vmem (%p88_p3), [#allocation3], %s651_s22 }
  0x13   : > { %v232_v0 = vld [vmem:[%s851_s25] sm:$0xff] (%p88_p3) }
  0x14   : > { %v234_v1 = vld [vmem:[%s851_s25 + $0x20] sm:$0xff] (%p88_p3)  ;;  %233 = vst [vmem:[%s165_s26] sm:$0xff] (%p88_p3), %v232_v0 }
  0x15   : > { %v236_v2 = vld [vmem:[%s851_s25 + $0x40] sm:$0xff]  ;;  %235 = vst [vmem:[%s165_s26 + $0x8] sm:$0xff] %v234_v1 }
  0x16   : > { %237 = vst [vmem:[%s165_s26 + $0x10] sm:$0xff] %v236_v2  ;;  %v238_v3 = vld [vmem:[%s851_s25 + $0x60] sm:$0xff] }
  0x17   : > { %v240_v4 = vld [vmem:[%s851_s25 + $0x80] sm:$0xff]  ;;  %239 = vst [vmem:[%s165_s26 + $0x18] sm:$0xff] %v238_v3 }
  0x18   : > { %v242_v5 = vld [vmem:[%s851_s25 + $0xa0] sm:$0xff]  ;;  %241 = vst [vmem:[%s165_s26 + $0x20] sm:$0xff] %v240_v4 }
  0x19   : > { %243 = vst [vmem:[%s165_s26 + $0x28] sm:$0xff] %v242_v5  ;;  %v244_v6 = vld [vmem:[%s851_s25 + $0xc0] sm:$0xff] }
  0x1a   : > { %v246_v7 = vld [vmem:[%s851_s25 + $0xe0] sm:$0xff]  ;;  %245 = vst [vmem:[%s165_s26 + $0x30] sm:$0xff] %v244_v6 }
  0x1b   : > { %v248_v8 = vld [vmem:[%s851_s25 + $0x100] sm:$0xff]  ;;  %247 = vst [vmem:[%s165_s26 + $0x38] sm:$0xff] %v246_v7 }
  0x1c   : > { %249 = vst [vmem:[%s165_s26 + $0x40] sm:$0xff] %v248_v8  ;;  %v250_v9 = vld [vmem:[%s851_s25 + $0x120] sm:$0xff] }
  0x1d   : > { %v252_v10 = vld [vmem:[%s851_s25 + $0x140] sm:$0xff]  ;;  %251 = vst [vmem:[%s165_s26 + $0x48] sm:$0xff] %v250_v9 }
  0x1e   : > { %v254_v11 = vld [vmem:[%s851_s25 + $0x160] sm:$0xff]  ;;  %253 = vst [vmem:[%s165_s26 + $0x50] sm:$0xff] %v252_v10 }
  0x1f   : > { %255 = vst [vmem:[%s165_s26 + $0x58] sm:$0xff] %v254_v11  ;;  %v256_v12 = vld [vmem:[%s851_s25 + $0x180] sm:$0xff] }
  0x20   : > { %v258_v13 = vld [vmem:[%s851_s25 + $0x1a0] sm:$0xff]  ;;  %257 = vst [vmem:[%s165_s26 + $0x60] sm:$0xff] %v256_v12 }
  0x21   : > { %v260_v14 = vld [vmem:[%s851_s25 + $0x1c0] sm:$0xff]  ;;  %259 = vst [vmem:[%s165_s26 + $0x68] sm:$0xff] %v258_v13 }
  0x22   : > { %261 = vst [vmem:[%s165_s26 + $0x70] sm:$0xff] %v260_v14  ;;  %v262_v15 = vld [vmem:[%s851_s25 + $0x1e0] sm:$0xff] }
  0x23   : > { %263 = vst [vmem:[%s165_s26 + $0x78] sm:$0xff] %v262_v15 }
  0x24 PF: > { %p654_p8 = scmp.ge.s32.totalorder %s785_s13, 1  ;;  %p268_p9 = scmp.lt.s32.totalorder %s785_s13, 5 }
  0x26   : > { %p269_p10 = pnand %p654_p8, %p268_p9 }
  0x27   : > { %s275_s27 = sand.u32 (!%p269_p10), 1, %s769_s9  }
  0x28   : > { %272 = sbr.rel (%p269_p10) target bundleno = 286 (0x11e), region = 62  ;;  %s655_s28 = sshll.u32 (!%p269_p10), %s275_s27, 7 }
  0x29   : > { %s277_s29 = scalar_lea.vmem (!%p269_p10), [#allocation3], %s655_s28  ;;  %s656_s4 = sshll.u32 (!%p269_p10), %s275_s27, 5 }
  0x2a   : > { %s306_s5 = scalar_lea.vmem (!%p269_p10), [#allocation4], %s656_s4 }
  0x2d   : > { %v787_v16 = vmov 0   ;;  %v722_v17 = vld [vmem:[%s277_s29 + $0x74] ss:$8 sps:$4 sm:$0xff]   ;;  %v724_v18 = vld [vmem:[%s277_s29 + $0x70] ss:$8 sps:$4 sm:$0xff]   ;;  %v746_v33 = vld [vmem:[%s900_s0] sm:$0xff]  }
  0x2e   : > { %473 = vmatprep.mubr.bf16.mxu0 %v787_v16  ;;  %441 = vmatprep.subr.bf16.mxu0 %v722_v17  ;;  %v725_v19 = vld [vmem:[%s277_s29 + $0x64] ss:$8 sps:$4 sm:$0xff]   ;;  %v727_v20 = vld [vmem:[%s277_s29 + $0x60] ss:$8 sps:$4 sm:$0xff]   ;;  %v728_v21 = vld [vmem:[%s277_s29 + $0x54] ss:$8 sps:$4 sm:$0xff]  }
  0x2f   : > { %442 = vmatpush1.bf16.msra.mxu0 %v724_v18  ;;  %v730_v22 = vld [vmem:[%s277_s29 + $0x50] ss:$8 sps:$4 sm:$0xff]   ;;  %v731_v23 = vld [vmem:[%s277_s29 + $0x44] ss:$8 sps:$4 sm:$0xff]   ;;  %v733_v24 = vld [vmem:[%s277_s29 + $0x40] ss:$8 sps:$4 sm:$0xff]  }
  0x30   : > { %443 = vmatprep.subr.bf16.mxu0 %v725_v19  ;;  %v734_v25 = vld [vmem:[%s277_s29 + $0x34] ss:$8 sps:$4 sm:$0xff]   ;;  %v736_v26 = vld [vmem:[%s277_s29 + $0x30] ss:$8 sps:$4 sm:$0xff]   ;;  %v737_v27 = vld [vmem:[%s277_s29 + $0x24] ss:$8 sps:$4 sm:$0xff]  }
  0x31   : > { %v739_v28 = vld [vmem:[%s277_s29 + $0x20] ss:$8 sps:$4 sm:$0xff]   ;;  %v740_v29 = vld [vmem:[%s277_s29 + $0x14] ss:$8 sps:$4 sm:$0xff]   ;;  %v742_v30 = vld [vmem:[%s277_s29 + $0x10] ss:$8 sps:$4 sm:$0xff]  }
  0x32   : > { %v743_v31 = vld [vmem:[%s277_s29 + $0x4] ss:$8 sps:$4 sm:$0xff]   ;;  %v745_v32 = vld [vmem:[%s277_s29] ss:$8 sps:$4 sm:$0xff]   ;;  %s680_s6 = sshll.u32 (%p838_p6), %s777_s11, 4 }
  0x33   : > { %444 = vmatpush1.bf16.msra.mxu0 %v727_v20  ;;  %s517_s9 = scalar_lea.vmem (%p838_p6), %s902_s2, %s680_s6 }
  0x34   : > { %445 = vmatprep.subr.bf16.mxu0 %v728_v21 }
  0x37   : > { %446 = vmatpush1.bf16.msra.mxu0 %v730_v22 }
  0x38   : > { %447 = vmatprep.subr.bf16.mxu0 %v731_v23 }
  0x3b   : > { %448 = vmatpush1.bf16.msra.mxu0 %v733_v24 }
  0x3c   : > { %449 = vmatprep.subr.bf16.mxu0 %v734_v25 }
  0x3f   : > { %450 = vmatpush1.bf16.msra.mxu0 %v736_v26 }
  0x40   : > { %451 = vmatprep.subr.bf16.mxu0 %v737_v27 }
  0x43   : > { %452 = vmatpush1.bf16.msra.mxu0 %v739_v28 }
  0x44   : > { %453 = vmatprep.subr.bf16.mxu0 %v740_v29 }
  0x47   : > { %454 = vmatpush1.bf16.msra.mxu0 %v742_v30 }
  0x48   : > { %455 = vmatprep.subr.bf16.mxu0 %v743_v31 }
  0x4b   : > { %456 = vmatpush1.bf16.msra.mxu0 %v745_v32 }
  0x4e   : > { %474 = vmatmul.mubr.bf16.vlgmr.msra.gmra.mxu0 %v746_v33 }
 0x10e   : > { %v475_v34 = vpop.f32.mrf.mxu0 }
 0x10f   : > { %499 = vst [vmem:[%s306_s5] sm:$0xff] %v475_v34 }
 0x110   : > { %v477_v35 = vpop.f32.mrf.mxu0 }
 0x111   : > { %500 = vst [vmem:[%s306_s5 + $0x8] sm:$0xff] %v477_v35  ;;  %509 = sbr.rel (!%p838_p6) target bundleno = 286 (0x11e), region = 78 }
 0x112   : > { %v479_v36 = vpop.f32.mrf.mxu0 }
 0x113   : > { %501 = vst [vmem:[%s306_s5 + $0x10] sm:$0xff] %v479_v36 }
 0x114   : > { %v481_v37 = vpop.f32.mrf.mxu0 }
 0x115   : > { %502 = vst [vmem:[%s306_s5 + $0x18] sm:$0xff] %v481_v37 }
 0x116   : > { %v530_v38 = vld [vmem:[%s306_s5] sm:$0xff] }
 0x117   : > { %531 = vst [vmem:[%s517_s9] sm:$0xff] %v530_v38 }
 0x118   : > { %v532_v39 = vld [vmem:[%s306_s5 + $0x8] sm:$0xff] }
 0x119   : > { %533 = vst [vmem:[%s517_s9 + $0x8] sm:$0xff] %v532_v39 }
 0x11a   : > { %v534_v40 = vld [vmem:[%s306_s5 + $0x10] sm:$0xff] }
 0x11b   : > { %535 = vst [vmem:[%s517_s9 + $0x40] sm:$0xff] %v534_v40 }
 0x11c   : > { %v536_v41 = vld [vmem:[%s306_s5 + $0x18] sm:$0xff] }
 0x11d   : > { %537 = vst [vmem:[%s517_s9 + $0x48] sm:$0xff] %v536_v41 }
 0x11e PF: > { %s12_s13 = sadd.s32 1, %s785_s13   ;;  %s904_s9 = smov %s773_s10 }
 0x11f   : > { %p9_p11 = scmp.ge.s32.totalorder %s12_s13, 6   ;;  %s905_s10 = smov %s843_s19 }
 0x120   : > { %s906_s11 = smov %s781_s12  ;;  %s907_s12 = smov %s909_s14 }
 0x121   :  { %11 = sbr.rel (!%p9_p11) target bundleno = 3 (0x3), region = 135 }

// kernel: generator_forward.17
= control target key start
LH: loop header
LB: loop body
LE: loop exit
PB: predicated region body
PF: predicated region fallthrough
CT: control target
= control target key end

     0   :  { %vm14_vm0 = vcmask 253952   ;;  %vm34_vm1 = vcmask 261120   ;;  %v140_v0 = vmov 0.0   ;;  %s258_s0 = inlined_call_operand.vmem [shape: f32[128,32], index: 0, kind: input, shape index: {}]   ;;  %s259_s1 = inlined_call_operand.vmem [shape: f32[1,32], index: 1, kind: output, shape index: {0}]   ;;  %s260_s2 = inlined_call_operand.vmem [shape: f32[1,32], index: 2, kind: output, shape index: {1}]  }
   0x1   :  { %15 = vst.msk [vmem:[%s259_s1] sm:$0x1] %vm14_vm0, %v140_v0  ;;  %v17_v1 = vld [vmem:[%s258_s0] sm:$0xff]  ;;  %v18_v2 = vld [vmem:[%s258_s0 + $0x8] sm:$0xff]  ;;  %v19_v3 = vld [vmem:[%s258_s0 + $0x10] sm:$0xff] }
   0x2   :  { %16 = vst.msk [vmem:[%s260_s2] sm:$0x1] %vm14_vm0, %v140_v0  ;;  %v35_v4 = vsel %vm34_vm1, %v17_v1, 0.0  ;;  %v36_v5 = vsel %vm34_vm1, %v18_v2, 0.0  ;;  %v38_v6 = vsel %vm34_vm1, %v19_v3, 0.0  ;;  %v20_v7 = vld [vmem:[%s258_s0 + $0x18] sm:$0xff]  ;;  %v76_v15 = vmul.f32 %v17_v1, %v17_v1 }
   0x3   :  { %v37_v8 = vadd.f32 %v36_v5, %v35_v4  ;;  %v40_v9 = vsel %vm34_vm1, %v20_v7, 0.0  ;;  %v21_v10 = vld [vmem:[%s258_s0 + $0x20] sm:$0xff]  ;;  %v22_v13 = vld [vmem:[%s258_s0 + $0x28] sm:$0xff]  ;;  %v77_v16 = vmul.f32 %v18_v2, %v18_v2  ;;  %v78_v17 = vmul.f32 %v19_v3, %v19_v3  ;;  %v23_v19 = vld [vmem:[%s258_s0 + $0x30] sm:$0xff] }
   0x4   :  { %v42_v12 = vsel %vm34_vm1, %v21_v10, 0.0  ;;  %v44_v18 = vsel %vm34_vm1, %v22_v13, 0.0  ;;  %v79_v21 = vmul.f32 %v20_v7, %v20_v7  ;;  %v46_v22 = vsel %vm34_vm1, %v23_v19, 0.0  ;;  %v24_v24 = vld [vmem:[%s258_s0 + $0x38] sm:$0xff]  ;;  %v25_v31 = vld [vmem:[%s258_s0 + $0x40] sm:$0xff]  ;;  %v26_v37 = vld [vmem:[%s258_s0 + $0x48] sm:$0xff] }
   0x5   :  { %v39_v11 = vadd.f32 %v38_v6, %v37_v8  ;;  %v80_v23 = vmul.f32 %v21_v10, %v21_v10  ;;  %v92_v26 = vsel %vm34_vm1, %v76_v15, 0.0  ;;  %v93_v27 = vsel %vm34_vm1, %v77_v16, 0.0  ;;  %v27_v43 = vld [vmem:[%s258_s0 + $0x50] sm:$0xff]  ;;  %v28_v49 = vld [vmem:[%s258_s0 + $0x58] sm:$0xff]  ;;  %v29_v55 = vld [vmem:[%s258_s0 + $0x60] sm:$0xff] }
   0x6   :  { %v95_v28 = vsel %vm34_vm1, %v78_v17, 0.0  ;;  %v48_v29 = vsel %vm34_vm1, %v24_v24, 0.0  ;;  %v94_v30 = vadd.f32 %v93_v27, %v92_v26  ;;  %v81_v33 = vmul.f32 %v22_v13, %v22_v13  ;;  %v30_v61 = vld [vmem:[%s258_s0 + $0x68] sm:$0xff]  ;;  %v31_v3 = vld [vmem:[%s258_s0 + $0x70] sm:$0xff] }
   0x7   :  { %v41_v14 = vadd.f32 %v40_v9, %v39_v11  ;;  %v97_v34 = vsel %vm34_vm1, %v79_v21, 0.0  ;;  %v50_v35 = vsel %vm34_vm1, %v25_v31, 0.0  ;;  %v82_v39 = vmul.f32 %v23_v19, %v23_v19  ;;  %v32_v9 = vld [vmem:[%s258_s0 + $0x78] sm:$0xff] }
   0x8   :  { %v96_v36 = vadd.f32 %v95_v28, %v94_v30  ;;  %v99_v40 = vsel %vm34_vm1, %v80_v23, 0.0  ;;  %v52_v41 = vsel %vm34_vm1, %v26_v37, 0.0  ;;  %v83_v45 = vmul.f32 %v24_v24, %v24_v24 }
   0x9   :  { %v43_v20 = vadd.f32 %v42_v12, %v41_v14  ;;  %v101_v46 = vsel %vm34_vm1, %v81_v33, 0.0  ;;  %v54_v47 = vsel %vm34_vm1, %v27_v43, 0.0  ;;  %v84_v51 = vmul.f32 %v25_v31, %v25_v31 }
   0xa   :  { %v98_v42 = vadd.f32 %v97_v34, %v96_v36  ;;  %v103_v52 = vsel %vm34_vm1, %v82_v39, 0.0  ;;  %v56_v53 = vsel %vm34_vm1, %v28_v49, 0.0  ;;  %v85_v57 = vmul.f32 %v26_v37, %v26_v37  ;;  %v33_v36 = vld [vmem:[%s259_s1] sm:$0x1] }
   0xb   :  { %v45_v25 = vadd.f32 %v44_v18, %v43_v20  ;;  %v105_v58 = vsel %vm34_vm1, %v83_v45, 0.0  ;;  %v58_v59 = vsel %vm34_vm1, %v29_v55, 0.0  ;;  %v86_v63 = vmul.f32 %v27_v43, %v27_v43 }
   0xc   :  { %v100_v48 = vadd.f32 %v99_v40, %v98_v42  ;;  %v107_v0 = vsel %vm34_vm1, %v84_v51, 0.0  ;;  %v60_v1 = vsel %vm34_vm1, %v30_v61, 0.0  ;;  %v87_v5 = vmul.f32 %v28_v49, %v28_v49 }
   0xd   :  { %v47_v32 = vadd.f32 %v46_v22, %v45_v25  ;;  %v109_v6 = vsel %vm34_vm1, %v85_v57, 0.0  ;;  %v62_v7 = vsel %vm34_vm1, %v31_v3, 0.0  ;;  %v88_v11 = vmul.f32 %v29_v55, %v29_v55 }
   0xe   :  { %v102_v54 = vadd.f32 %v101_v46, %v100_v48  ;;  %v111_v12 = vsel %vm34_vm1, %v86_v63, 0.0  ;;  %v64_v13 = vsel %vm34_vm1, %v32_v9, 0.0  ;;  %v89_v16 = vmul.f32 %v30_v61, %v30_v61 }
   0xf   :  { %v49_v38 = vadd.f32 %v48_v29, %v47_v32  ;;  %v113_v17 = vsel %vm34_vm1, %v87_v5, 0.0  ;;  %v90_v20 = vmul.f32 %v31_v3, %v31_v3  ;;  %v115_v21 = vsel %vm34_vm1, %v88_v11, 0.0 }
  0x10   :  { %v104_v60 = vadd.f32 %v103_v52, %v102_v54  ;;  %v91_v24 = vmul.f32 %v32_v9, %v32_v9  ;;  %v117_v25 = vsel %vm34_vm1, %v89_v16, 0.0 }
  0x11   :  { %v51_v44 = vadd.f32 %v50_v35, %v49_v38  ;;  %v119_v28 = vsel %vm34_vm1, %v90_v20, 0.0 }
  0x12   :  { %v106_v2 = vadd.f32 %v105_v58, %v104_v60  ;;  %v121_v31 = vsel %vm34_vm1, %v91_v24, 0.0 }
  0x13   :  { %v53_v50 = vadd.f32 %v52_v41, %v51_v44  ;;  %v75_v44 = vld [vmem:[%s260_s2] sm:$0x1] }
  0x14   :  { %v108_v8 = vadd.f32 %v107_v0, %v106_v2 }
  0x15   :  { %v55_v56 = vadd.f32 %v54_v47, %v53_v50 }
  0x16   :  { %v110_v14 = vadd.f32 %v109_v6, %v108_v8 }
  0x17   :  { %v57_v62 = vadd.f32 %v56_v53, %v55_v56 }
  0x18   :  { %v112_v18 = vadd.f32 %v111_v12, %v110_v14 }
  0x19   :  { %v59_v4 = vadd.f32 %v58_v59, %v57_v62 }
  0x1a   :  { %v114_v22 = vadd.f32 %v113_v17, %v112_v18 }
  0x1b   :  { %v61_v10 = vadd.f32 %v60_v1, %v59_v4 }
  0x1c   :  { %v116_v26 = vadd.f32 %v115_v21, %v114_v22 }
  0x1d   :  { %v63_v15 = vadd.f32 %v62_v7, %v61_v10 }
  0x1e   :  { %v118_v29 = vadd.f32 %v117_v25, %v116_v26 }
  0x1f   :  { %v65_v19 = vadd.f32 %v64_v13, %v63_v15 }
  0x20   :  { %v120_v32 = vadd.f32 %v119_v28, %v118_v29 }
  0x21   :  { %v66_v23 = vrot.slane %v65_v19, 4 }
  0x22   :  { %v122_v34 = vadd.f32 %v121_v31, %v120_v32 }
  0x23   :  { %v67_v27 = vadd.f32 %v66_v23, %v65_v19 }
  0x24   :  { %v123_v37 = vrot.slane %v122_v34, 4 }
  0x25   :  { %v68_v30 = vrot.slane %v67_v27, 2 }
  0x26   :  { %v124_v39 = vadd.f32 %v123_v37, %v122_v34 }
  0x27   :  { %v69_v33 = vadd.f32 %v68_v30, %v67_v27 }
  0x28   :  { %v125_v41 = vrot.slane %v124_v39, 2 }
  0x29   :  { %v70_v35 = vrot.slane %v69_v33, 1 }
  0x2a   :  { %v126_v42 = vadd.f32 %v125_v41, %v124_v39 }
  0x2b   :  { %v71_v38 = vadd.f32 %v70_v35, %v69_v33 }
  0x2c   :  { %v127_v43 = vrot.slane %v126_v42, 1 }
  0x2d   :  { %v72_v40 = vadd.f32 %v71_v38, %v33_v36 }
  0x2e   :  { %v128_v45 = vadd.f32 %v127_v43, %v126_v42 }
  0x2f   :  { %74 = vst.msk [vmem:[%s259_s1] sm:$0x1] %vm14_vm0, %v72_v40 }
  0x30   :  { %v129_v46 = vadd.f32 %v128_v45, %v75_v44 }
  0x32   :  { %130 = vst.msk [vmem:[%s260_s2] sm:$0x1] %vm14_vm0, %v129_v46 }

// kernel: generator_forward.16
= control target key start
LH: loop header
LB: loop body
LE: loop exit
PB: predicated region body
PF: predicated region fallthrough
CT: control target
= control target key end

     0   :  { %s799_s9 = smov 0   ;;  %s801_s10 = smov 0   ;;  %s861_s0 = inlined_call_operand.vmem [shape: bf16[4,32,256], index: 0, kind: input, shape index: {}]   ;;  %s862_s1 = inlined_call_operand.vmem [shape: bf16[4,256,128], index: 1, kind: input, shape index: {}]   ;;  %s863_s2 = inlined_call_operand.vmem [shape: f32[4,32,128], index: 2, kind: output, shape index: {}]  }
   0x1   :  { %s803_s11 = smov 0  }
   0x2 LB: > { %s38_s12 = sadd.s32 1, %s778_s10  ;;  %p638_p0 = scmp.ge.s32.totalorder %s782_s11, 1  ;;  %s782_s11 = sphi %s803_s11, %s12_s11   ;;  %s778_s10 = sphi %s801_s10, %s865_s10   ;;  %s774_s9 = sphi %s799_s9, %s864_s9  }
   0x3   : > { %p40_p1 = scmp.ge.s32.totalorder %s38_s12, 4  ;;  %p179_p2 = scmp.lt.s32.totalorder %s782_s11, 5 }
   0x5   : > { %s867_s12 = smov (%p40_p1, %s38_s12), 0  ;;  %p180_p3 = pnand %p638_p0, %p179_p2 }
   0x6   : > { %p231_p4 = scmp.lt.s32.totalorder (!%p180_p3), %s774_s9, 3 }
   0x7   : > { %183 = sbr.rel (%p180_p3) target bundleno = 250 (0xfa), region = 28 }
   0xc   : > { %s869_s9 = smov (!%p231_p4, %s774_s9), 3 }
   0xd   : > { %s668_s13 = sshll.u32 %s869_s9, 7  ;;  %s667_s17 = sshll.u32 %s869_s9, 5 }
   0xe   : > { %s823_s16 = scalar_lea.vmem %s862_s1, %s668_s13  ;;  %s242_s20 = scalar_lea.vmem %s861_s0, %s667_s17 }
   0xf   : > { %v738_v0 = vld [vmem:[%s823_s16 + $0x78] sm:$0xff]   ;;  %v740_v2 = vld [vmem:[%s823_s16 + $0x70] sm:$0xff]   ;;  %v742_v4 = vld [vmem:[%s823_s16 + $0x68] sm:$0xff]   ;;  %s269_s23 = scalar_lea.vmem %s863_s2, %s667_s17 }
  0x10   : > { %v739_v1 = vld [vmem:[%s823_s16 + $0x38] sm:$0xff]   ;;  %670 = vmatprep.subr.bf16.mxu0 %v738_v0  ;;  %698 = vmatprep.subr.bf16.mxu1 %v738_v0  ;;  %v741_v3 = vld [vmem:[%s823_s16 + $0x30] sm:$0xff]   ;;  %v743_v5 = vld [vmem:[%s823_s16 + $0x28] sm:$0xff]  }
  0x11   : > { %671 = vmatpush3.bf16.msra.mxu0 %v739_v1  ;;  %706 = vmatpush3.bf16.msra.mxu1 %v739_v1  ;;  %v744_v6 = vld [vmem:[%s823_s16 + $0x60] sm:$0xff]   ;;  %v746_v8 = vld [vmem:[%s823_s16 + $0x58] sm:$0xff]   ;;  %v748_v10 = vld [vmem:[%s823_s16 + $0x50] sm:$0xff]  }
  0x12   : > { %672 = vmatprep.subr.bf16.mxu0 %v740_v2  ;;  %699 = vmatprep.subr.bf16.mxu1 %v740_v2  ;;  %v745_v7 = vld [vmem:[%s823_s16 + $0x20] sm:$0xff]   ;;  %v747_v9 = vld [vmem:[%s823_s16 + $0x18] sm:$0xff]   ;;  %v749_v13 = vld [vmem:[%s823_s16 + $0x10] sm:$0xff]  }
  0x13   : > { %v756_v11 = vld [vmem:[%s242_s20 + $0x4] ss:$8 sps:$4 sm:$0xff]   ;;  %v759_v12 = vld [vmem:[%s242_s20 + $0x14] ss:$8 sps:$4 sm:$0xff]   ;;  %v754_v18 = vld [vmem:[%s242_s20] ss:$8 sps:$4 sm:$0xff]  }
  0x14   : > { %v750_v14 = vld [vmem:[%s823_s16 + $0x48] sm:$0xff]   ;;  %468 = vmatprep.mubr.bf16.mxu0 %v756_v11  ;;  %476 = vmatprep.mubr.bf16.mxu1 %v759_v12  ;;  %v752_v16 = vld [vmem:[%s823_s16 + $0x40] sm:$0xff]   ;;  %v757_v19 = vld [vmem:[%s242_s20 + $0x10] ss:$8 sps:$4 sm:$0xff]  }
  0x15   : > { %673 = vmatpush3.bf16.msra.mxu0 %v741_v3  ;;  %707 = vmatpush3.bf16.msra.mxu1 %v741_v3  ;;  %v751_v15 = vld [vmem:[%s823_s16 + $0x8] sm:$0xff]   ;;  %v753_v17 = vld [vmem:[%s823_s16] sm:$0xff]  }
  0x16   : > { %674 = vmatprep.subr.bf16.mxu0 %v742_v4  ;;  %700 = vmatprep.subr.bf16.mxu1 %v742_v4 }
  0x19   : > { %675 = vmatpush3.bf16.msra.mxu0 %v743_v5  ;;  %708 = vmatpush3.bf16.msra.mxu1 %v743_v5 }
  0x1a   : > { %676 = vmatprep.subr.bf16.mxu0 %v744_v6  ;;  %701 = vmatprep.subr.bf16.mxu1 %v744_v6 }
  0x1d   : > { %677 = vmatpush3.bf16.msra.mxu0 %v745_v7  ;;  %709 = vmatpush3.bf16.msra.mxu1 %v745_v7 }
  0x1e   : > { %678 = vmatprep.subr.bf16.mxu0 %v746_v8  ;;  %702 = vmatprep.subr.bf16.mxu1 %v746_v8 }
  0x21   : > { %679 = vmatpush3.bf16.msra.mxu0 %v747_v9  ;;  %710 = vmatpush3.bf16.msra.mxu1 %v747_v9 }
  0x22   : > { %680 = vmatprep.subr.bf16.mxu0 %v748_v10  ;;  %703 = vmatprep.subr.bf16.mxu1 %v748_v10 }
  0x25   : > { %681 = vmatpush3.bf16.msra.mxu0 %v749_v13  ;;  %711 = vmatpush3.bf16.msra.mxu1 %v749_v13 }
  0x26   : > { %682 = vmatprep.subr.bf16.mxu0 %v750_v14  ;;  %704 = vmatprep.subr.bf16.mxu1 %v750_v14 }
  0x29   : > { %683 = vmatpush3.bf16.msra.mxu0 %v751_v15  ;;  %712 = vmatpush3.bf16.msra.mxu1 %v751_v15 }
  0x2a   : > { %684 = vmatprep.subr.bf16.mxu0 %v752_v16  ;;  %705 = vmatprep.subr.bf16.mxu1 %v752_v16 }
  0x2d   : > { %685 = vmatpush3.bf16.msra.mxu0 %v753_v17  ;;  %713 = vmatpush3.bf16.msra.mxu1 %v753_v17 }
  0x30   : > { %469 = vmatmul.mubr.bf16.vlgmr.msra.gmra.mxu0 %v754_v18  ;;  %477 = vmatmul.mubr.bf16.vlgmr.msra.gmra.mxu1 %v757_v19 }
  0xf0   : > { %v686_v20 = vpop.f32.mrf.mxu0  ;;  %v692_v21 = vpop.f32.mrf.mxu1 }
  0xf2   : > { %v687_v22 = vpop.f32.mrf.mxu0  ;;  %v693_v23 = vpop.f32.mrf.mxu1 }
  0xf3   : > { %v688_v24 = vadd.f32 %v687_v22, %v686_v20  ;;  %v694_v25 = vadd.f32 %v693_v23, %v692_v21 }
  0xf4   : > { %v689_v26 = vpop.f32.mrf.mxu0  ;;  %v695_v27 = vpop.f32.mrf.mxu1 }
  0xf5   : > { %500 = vst [vmem:[%s269_s23] sm:$0xff] %v688_v24  ;;  %502 = vst [vmem:[%s269_s23 + $0x10] sm:$0xff] %v694_v25 }
  0xf6   : > { %v690_v28 = vpop.f32.mrf.mxu0  ;;  %v696_v29 = vpop.f32.mrf.mxu1 }
  0xf7   : > { %v691_v30 = vadd.f32 %v690_v28, %v689_v26  ;;  %v697_v31 = vadd.f32 %v696_v29, %v695_v27 }
  0xf9   : > { %501 = vst [vmem:[%s269_s23 + $0x8] sm:$0xff] %v691_v30  ;;  %503 = vst [vmem:[%s269_s23 + $0x18] sm:$0xff] %v697_v31 }
  0xfa PF: > { %s12_s11 = sadd.s32 1, %s782_s11   ;;  %s864_s9 = smov %s778_s10 }
  0xfb   : > { %p9_p5 = scmp.ge.s32.totalorder %s12_s11, 6   ;;  %s865_s10 = smov %s867_s12 }
  0xfd   :  { %11 = sbr.rel (!%p9_p5) target bundleno = 2 (0x2), region = 69 }

// kernel: generator_forward.18
= control target key start
LH: loop header
LB: loop body
LE: loop exit
PB: predicated region body
PF: predicated region fallthrough
CT: control target
= control target key end

     0   :  { %vm156_vm0 = vcmask 257024   ;;  %s385_s0 = inlined_call_operand.vmem [shape: f32[128,32], index: 0, kind: input, shape index: {}]   ;;  %s386_s1 = inlined_call_operand.vmem [shape: f32[1,32], index: 1, kind: input, shape index: {}]   ;;  %s387_s2 = inlined_call_operand.vmem [shape: f32[1,32], index: 2, kind: input, shape index: {}]   ;;  %s388_s3 = inlined_call_operand.vmem [shape: bf16[128,32], index: 3, kind: output, shape index: {}]  }
   0x1   :  { %v14_v0 = vld [vmem:[%s385_s0] sm:$0xff]  ;;  %v15_v4 = vld [vmem:[%s385_s0 + $0x8] sm:$0xff]  ;;  %v16_v5 = vld [vmem:[%s385_s0 + $0x10] sm:$0xff] }
   0x2   :  { %v237_v1 = vld [vmem:[%s386_s1] ss:$0 sm:$0xff]  ;;  %v17_v6 = vld [vmem:[%s385_s0 + $0x18] sm:$0xff]  ;;  %v19_v11 = vld [vmem:[%s385_s0 + $0x28] sm:$0xff] }
   0x3   :  { %v242_v2 = vld [vmem:[%s387_s2] ss:$0 sm:$0xff]  ;;  %v37_v3 = vmul.f32 %v237_v1, %v14_v0  ;;  %v38_v7 = vmul.f32 %v237_v1, %v15_v4  ;;  %v39_v8 = vmul.f32 %v237_v1, %v16_v5  ;;  %v40_v9 = vmul.f32 %v237_v1, %v17_v6  ;;  %v20_v12 = vld [vmem:[%s385_s0 + $0x30] sm:$0xff]  ;;  %v21_v17 = vld [vmem:[%s385_s0 + $0x38] sm:$0xff] }
   0x4   :  { %v18_v10 = vld [vmem:[%s385_s0 + $0x20] sm:$0xff]  ;;  %v42_v15 = vmul.f32 %v237_v1, %v19_v11  ;;  %v43_v16 = vmul.f32 %v237_v1, %v20_v12  ;;  %v44_v21 = vmul.f32 %v237_v1, %v21_v17  ;;  %v23_v35 = vld [vmem:[%s385_s0 + $0x48] sm:$0xff]  ;;  %v24_v36 = vld [vmem:[%s385_s0 + $0x50] sm:$0xff] }
   0x5   :  { %v60_v13 = vadd.f32 %v242_v2, %v37_v3  ;;  %v41_v14 = vmul.f32 %v237_v1, %v18_v10  ;;  %v61_v18 = vadd.f32 %v242_v2, %v38_v7  ;;  %v62_v19 = vadd.f32 %v242_v2, %v39_v8  ;;  %v22_v30 = vld [vmem:[%s385_s0 + $0x40] sm:$0xff]  ;;  %v25_v37 = vld [vmem:[%s385_s0 + $0x58] sm:$0xff]  ;;  %v27_v43 = vld [vmem:[%s385_s0 + $0x68] sm:$0xff] }
   0x6   :  { %v63_v20 = vadd.f32 %v242_v2, %v40_v9  ;;  %v65_v24 = vadd.f32 %v242_v2, %v42_v15  ;;  %v66_v25 = vadd.f32 %v242_v2, %v43_v16  ;;  %v67_v29 = vadd.f32 %v242_v2, %v44_v21  ;;  %v26_v42 = vld [vmem:[%s385_s0 + $0x60] sm:$0xff]  ;;  %v28_v44 = vld [vmem:[%s385_s0 + $0x70] sm:$0xff]  ;;  %v29_v49 = vld [vmem:[%s385_s0 + $0x78] sm:$0xff] }
   0x7   :  { %v76_v22 = vmax.f32 %v60_v13, 0.0  ;;  %v64_v23 = vadd.f32 %v242_v2, %v41_v14  ;;  %v77_v26 = vmax.f32 %v61_v18, 0.0  ;;  %v78_v27 = vmax.f32 %v62_v19, 0.0 }
   0x8   :  { %v79_v28 = vmax.f32 %v63_v20, 0.0  ;;  %v81_v33 = vmax.f32 %v65_v24, 0.0  ;;  %v82_v34 = vmax.f32 %v66_v25, 0.0  ;;  %v83_v41 = vmax.f32 %v67_v29, 0.0 }
   0x9   :  { %v195_v31 = vpack.c.bf16 %v76_v22, %v76_v22  ;;  %v80_v32 = vmax.f32 %v64_v23, 0.0  ;;  %v196_v38 = vpack.c.bf16 %v77_v26, %v77_v26  ;;  %v197_v39 = vpack.c.bf16 %v78_v27, %v78_v27 }
   0xa   :  { %v198_v40 = vpack.c.bf16 %v79_v28, %v79_v28  ;;  %v200_v46 = vpack.c.bf16 %v81_v33, %v81_v33  ;;  %v201_v47 = vpack.c.bf16 %v82_v34, %v82_v34  ;;  %v45_v48 = vmul.f32 %v237_v1, %v22_v30 }
   0xb   :  { %157 = vst.msk [vmem:[%s388_s3] sm:$0xf] %vm156_vm0, %v195_v31  ;;  %v199_v45 = vpack.c.bf16 %v80_v32, %v80_v32  ;;  %158 = vst.msk [vmem:[%s388_s3 + $0x4] sm:$0xf] %vm156_vm0, %v196_v38  ;;  %v202_v50 = vpack.c.bf16 %v83_v41, %v83_v41  ;;  %v46_v51 = vmul.f32 %v237_v1, %v23_v35 }
   0xc   :  { %159 = vst.msk [vmem:[%s388_s3 + $0x8] sm:$0xf] %vm156_vm0, %v197_v39  ;;  %160 = vst.msk [vmem:[%s388_s3 + $0xc] sm:$0xf] %vm156_vm0, %v198_v40  ;;  %v47_v52 = vmul.f32 %v237_v1, %v24_v36  ;;  %v48_v53 = vmul.f32 %v237_v1, %v25_v37  ;;  %v68_v54 = vadd.f32 %v242_v2, %v45_v48 }
   0xd   :  { %161 = vst.msk [vmem:[%s388_s3 + $0x10] sm:$0xf] %vm156_vm0, %v199_v45  ;;  %162 = vst.msk [vmem:[%s388_s3 + $0x14] sm:$0xf] %vm156_vm0, %v200_v46  ;;  %v49_v55 = vmul.f32 %v237_v1, %v26_v42  ;;  %v50_v56 = vmul.f32 %v237_v1, %v27_v43  ;;  %v51_v57 = vmul.f32 %v237_v1, %v28_v44 }
   0xe   :  { %163 = vst.msk [vmem:[%s388_s3 + $0x18] sm:$0xf] %vm156_vm0, %v201_v47  ;;  %164 = vst.msk [vmem:[%s388_s3 + $0x1c] sm:$0xf] %vm156_vm0, %v202_v50  ;;  %v69_v58 = vadd.f32 %v242_v2, %v46_v51  ;;  %v70_v59 = vadd.f32 %v242_v2, %v47_v52  ;;  %v71_v60 = vadd.f32 %v242_v2, %v48_v53  ;;  %v84_v62 = vmax.f32 %v68_v54, 0.0 }
   0xf   :  { %v52_v61 = vmul.f32 %v237_v1, %v29_v49  ;;  %v72_v63 = vadd.f32 %v242_v2, %v49_v55  ;;  %v73_v0 = vadd.f32 %v242_v2, %v50_v56  ;;  %v74_v3 = vadd.f32 %v242_v2, %v51_v57 }
  0x10   :  { %v85_v4 = vmax.f32 %v69_v58, 0.0  ;;  %v86_v5 = vmax.f32 %v70_v59, 0.0  ;;  %v87_v6 = vmax.f32 %v71_v60, 0.0  ;;  %v203_v8 = vpack.c.bf16 %v84_v62, %v84_v62 }
  0x11   :  { %v75_v7 = vadd.f32 %v242_v2, %v52_v61  ;;  %v88_v9 = vmax.f32 %v72_v63, 0.0  ;;  %v89_v10 = vmax.f32 %v73_v0, 0.0  ;;  %v90_v11 = vmax.f32 %v74_v3, 0.0 }
  0x12   :  { %v204_v12 = vpack.c.bf16 %v85_v4, %v85_v4  ;;  %v205_v13 = vpack.c.bf16 %v86_v5, %v86_v5  ;;  %v206_v14 = vpack.c.bf16 %v87_v6, %v87_v6  ;;  %165 = vst.msk [vmem:[%s388_s3 + $0x20] sm:$0xf] %vm156_vm0, %v203_v8 }
  0x13   :  { %v91_v1 = vmax.f32 %v75_v7, 0.0  ;;  %v207_v15 = vpack.c.bf16 %v88_v9, %v88_v9  ;;  %v208_v16 = vpack.c.bf16 %v89_v10, %v89_v10  ;;  %v209_v17 = vpack.c.bf16 %v90_v11, %v90_v11 }
  0x14   :  { %166 = vst.msk [vmem:[%s388_s3 + $0x24] sm:$0xf] %vm156_vm0, %v204_v12  ;;  %167 = vst.msk [vmem:[%s388_s3 + $0x28] sm:$0xf] %vm156_vm0, %v205_v13 }
  0x15   :  { %168 = vst.msk [vmem:[%s388_s3 + $0x2c] sm:$0xf] %vm156_vm0, %v206_v14  ;;  %v210_v2 = vpack.c.bf16 %v91_v1, %v91_v1  ;;  %169 = vst.msk [vmem:[%s388_s3 + $0x30] sm:$0xf] %vm156_vm0, %v207_v15 }
  0x16   :  { %170 = vst.msk [vmem:[%s388_s3 + $0x34] sm:$0xf] %vm156_vm0, %v208_v16  ;;  %171 = vst.msk [vmem:[%s388_s3 + $0x38] sm:$0xf] %vm156_vm0, %v209_v17 }
  0x17   :  { %172 = vst.msk [vmem:[%s388_s3 + $0x3c] sm:$0xf] %vm156_vm0, %v210_v2 }

// kernel: generator_forward.19
= control target key start
LH: loop header
LB: loop body
LE: loop exit
PB: predicated region body
PF: predicated region fallthrough
CT: control target
= control target key end

     0   :  { %s894_s9 = smov 0   ;;  %s896_s10 = smov 0   ;;  %s972_s0 = inlined_call_operand.vmem [shape: bf16[4,128,128], index: 0, kind: input, shape index: {}]   ;;  %s973_s1 = inlined_call_operand.vmem [shape: bf16[4,128,128], index: 1, kind: input, shape index: {}]   ;;  %s974_s2 = inlined_call_operand.vmem [shape: f32[4,128,128], index: 2, kind: output, shape index: {}]  }
   0x1   :  { %s898_s11 = smov 0  }
   0x2 LB: > { %s38_s12 = sadd.s32 1, %s873_s10  ;;  %p723_p0 = scmp.ge.s32.totalorder %s877_s11, 1  ;;  %s877_s11 = sphi %s898_s11, %s12_s11   ;;  %s873_s10 = sphi %s896_s10, %s976_s10   ;;  %s869_s9 = sphi %s894_s9, %s975_s9  }
   0x3   : > { %p40_p1 = scmp.ge.s32.totalorder %s38_s12, 4  ;;  %p176_p2 = scmp.lt.s32.totalorder %s877_s11, 5 }
   0x5   : > { %s978_s12 = smov (%p40_p1, %s38_s12), 0  ;;  %p177_p3 = pnand %p723_p0, %p176_p2 }
   0x6   : > { %p225_p4 = scmp.lt.s32.totalorder (!%p177_p3), %s869_s9, 3 }
   0x7   : > { %180 = sbr.rel (%p177_p3) target bundleno = 256 (0x100), region = 28 }
   0xc   : > { %s980_s9 = smov (!%p225_p4, %s869_s9), 3 }
   0xd   : > { %s748_s13 = sshll.u32 %s980_s9, 6  ;;  %s750_s20 = sshll.u32 %s980_s9, 7 }
   0xe   : > { %s918_s16 = scalar_lea.vmem %s973_s1, %s748_s13  ;;  %s926_s19 = scalar_lea.vmem %s972_s0, %s748_s13 }
   0xf   : > { %v839_v0 = vld [vmem:[%s918_s16 + $0x38] sm:$0xff]   ;;  %v840_v1 = vld [vmem:[%s918_s16 + $0x30] sm:$0xff]   ;;  %v841_v2 = vld [vmem:[%s918_s16 + $0x28] sm:$0xff]   ;;  %s945_s23 = scalar_lea.vmem %s974_s2, %s750_s20 }
  0x10   : > { %767 = vmatprep.subr.bf16.mxu0 %v839_v0  ;;  %799 = vmatprep.subr.bf16.mxu1 %v839_v0  ;;  %v842_v3 = vld [vmem:[%s918_s16 + $0x20] sm:$0xff]   ;;  %v843_v6 = vld [vmem:[%s918_s16 + $0x18] sm:$0xff]   ;;  %v844_v7 = vld [vmem:[%s918_s16 + $0x10] sm:$0xff]  }
  0x11   : > { %768 = vmatpush3.bf16.msra.mxu0 %v839_v0  ;;  %807 = vmatpush3.bf16.msra.mxu1 %v839_v0  ;;  %v847_v4 = vld [vmem:[%s926_s19] sm:$0xff]   ;;  %v845_v8 = vld [vmem:[%s918_s16 + $0x8] sm:$0xff]   ;;  %v851_v12 = vld [vmem:[%s926_s19 + $0x10] sm:$0xff]  }
  0x12   : > { %769 = vmatprep.subr.bf16.mxu0 %v840_v1  ;;  %800 = vmatprep.subr.bf16.mxu1 %v840_v1  ;;  %v848_v5 = vld [vmem:[%s926_s19 + $0x20] sm:$0xff]   ;;  %v849_v10 = vld [vmem:[%s926_s19 + $0x8] sm:$0xff]   ;;  %v852_v13 = vld [vmem:[%s926_s19 + $0x30] sm:$0xff]  }
  0x13   : > { %783 = vmatprep.mubr.bf16.mxu0 %v847_v4  ;;  %791 = vmatprep.mubr.bf16.mxu1 %v848_v5  ;;  %v846_v9 = vld [vmem:[%s918_s16] sm:$0xff]   ;;  %v850_v11 = vld [vmem:[%s926_s19 + $0x28] sm:$0xff]   ;;  %v853_v14 = vld [vmem:[%s926_s19 + $0x18] sm:$0xff]  }
  0x14   : > { %v854_v15 = vld [vmem:[%s926_s19 + $0x38] sm:$0xff]  }
  0x15   : > { %770 = vmatpush3.bf16.msra.mxu0 %v840_v1  ;;  %808 = vmatpush3.bf16.msra.mxu1 %v840_v1 }
  0x16   : > { %771 = vmatprep.subr.bf16.mxu0 %v841_v2  ;;  %801 = vmatprep.subr.bf16.mxu1 %v841_v2 }
  0x19   : > { %772 = vmatpush3.bf16.msra.mxu0 %v841_v2  ;;  %809 = vmatpush3.bf16.msra.mxu1 %v841_v2 }
  0x1a   : > { %773 = vmatprep.subr.bf16.mxu0 %v842_v3  ;;  %802 = vmatprep.subr.bf16.mxu1 %v842_v3 }
  0x1d   : > { %774 = vmatpush3.bf16.msra.mxu0 %v842_v3  ;;  %810 = vmatpush3.bf16.msra.mxu1 %v842_v3 }
  0x1e   : > { %775 = vmatprep.subr.bf16.mxu0 %v843_v6  ;;  %803 = vmatprep.subr.bf16.mxu1 %v843_v6 }
  0x21   : > { %776 = vmatpush3.bf16.msra.mxu0 %v843_v6  ;;  %811 = vmatpush3.bf16.msra.mxu1 %v843_v6 }
  0x22   : > { %777 = vmatprep.subr.bf16.mxu0 %v844_v7  ;;  %804 = vmatprep.subr.bf16.mxu1 %v844_v7 }
  0x25   : > { %778 = vmatpush3.bf16.msra.mxu0 %v844_v7  ;;  %812 = vmatpush3.bf16.msra.mxu1 %v844_v7 }
  0x26   : > { %779 = vmatprep.subr.bf16.mxu0 %v845_v8  ;;  %805 = vmatprep.subr.bf16.mxu1 %v845_v8 }
  0x29   : > { %780 = vmatpush3.bf16.msra.mxu0 %v845_v8  ;;  %813 = vmatpush3.bf16.msra.mxu1 %v845_v8 }
  0x2a   : > { %781 = vmatprep.subr.bf16.mxu0 %v846_v9  ;;  %806 = vmatprep.subr.bf16.mxu1 %v846_v9 }
  0x2d   : > { %782 = vmatpush3.bf16.msra.mxu0 %v846_v9  ;;  %814 = vmatpush3.bf16.msra.mxu1 %v846_v9 }
  0x30   : > { %784 = vmatmul.mubr.bf16.vlgmr.msra.gmra.mxu0 %v849_v10  ;;  %792 = vmatmul.mubr.bf16.vlgmr.msra.gmra.mxu1 %v850_v11 }
  0x31   : > { %787 = vmatprep.mubr.bf16.mxu0 %v851_v12  ;;  %795 = vmatprep.mubr.bf16.mxu1 %v852_v13 }
  0x38   : > { %788 = vmatmul.mubr.bf16.gmra.mxu0 %v853_v14  ;;  %796 = vmatmul.mubr.bf16.gmra.mxu1 %v854_v15 }
  0xf0   : > { %v785_v16 = vpop.f32.mrf.mxu0  ;;  %v793_v17 = vpop.f32.mrf.mxu1 }
  0xf1   : > { %578 = vst [vmem:[%s945_s23 + $0x10] sm:$0xff] %v785_v16  ;;  %586 = vst [vmem:[%s945_s23 + $0x50] sm:$0xff] %v793_v17 }
  0xf2   : > { %v462_v18 = vpop.f32.mrf.mxu0  ;;  %v494_v19 = vpop.f32.mrf.mxu1 }
  0xf3   : > { %576 = vst [vmem:[%s945_s23] sm:$0xff] %v462_v18  ;;  %584 = vst [vmem:[%s945_s23 + $0x40] sm:$0xff] %v494_v19 }
  0xf4   : > { %v786_v20 = vpop.f32.mrf.mxu0  ;;  %v794_v21 = vpop.f32.mrf.mxu1 }
  0xf5   : > { %579 = vst [vmem:[%s945_s23 + $0x18] sm:$0xff] %v786_v20  ;;  %587 = vst [vmem:[%s945_s23 + $0x58] sm:$0xff] %v794_v21 }
  0xf6   : > { %v465_v22 = vpop.f32.mrf.mxu0  ;;  %v497_v23 = vpop.f32.mrf.mxu1 }
  0xf7   : > { %577 = vst [vmem:[%s945_s23 + $0x8] sm:$0xff] %v465_v22  ;;  %585 = vst [vmem:[%s945_s23 + $0x48] sm:$0xff] %v497_v23 }
  0xf8   : > { %v789_v24 = vpop.f32.mrf.mxu0  ;;  %v797_v25 = vpop.f32.mrf.mxu1 }
  0xf9   : > { %582 = vst [vmem:[%s945_s23 + $0x30] sm:$0xff] %v789_v24  ;;  %590 = vst [vmem:[%s945_s23 + $0x70] sm:$0xff] %v797_v25 }
  0xfa   : > { %v478_v26 = vpop.f32.mrf.mxu0  ;;  %v510_v27 = vpop.f32.mrf.mxu1 }
  0xfb   : > { %580 = vst [vmem:[%s945_s23 + $0x20] sm:$0xff] %v478_v26  ;;  %588 = vst [vmem:[%s945_s23 + $0x60] sm:$0xff] %v510_v27 }
  0xfc   : > { %v790_v28 = vpop.f32.mrf.mxu0  ;;  %v798_v29 = vpop.f32.mrf.mxu1 }
  0xfd   : > { %583 = vst [vmem:[%s945_s23 + $0x38] sm:$0xff] %v790_v28  ;;  %591 = vst [vmem:[%s945_s23 + $0x78] sm:$0xff] %v798_v29 }
  0xfe   : > { %v481_v30 = vpop.f32.mrf.mxu0  ;;  %v513_v31 = vpop.f32.mrf.mxu1 }
  0xff   : > { %581 = vst [vmem:[%s945_s23 + $0x28] sm:$0xff] %v481_v30  ;;  %589 = vst [vmem:[%s945_s23 + $0x68] sm:$0xff] %v513_v31 }
 0x100 PF: > { %s12_s11 = sadd.s32 1, %s877_s11   ;;  %s975_s9 = smov %s873_s10 }
 0x101   : > { %p9_p5 = scmp.ge.s32.totalorder %s12_s11, 6   ;;  %s976_s10 = smov %s978_s12 }
 0x103   :  { %11 = sbr.rel (!%p9_p5) target bundleno = 2 (0x2), region = 69 }

// kernel: generator_forward.20
= control target key start
LH: loop header
LB: loop body
LE: loop exit
PB: predicated region body
PF: predicated region fallthrough
CT: control target
= control target key end

     0   :  { %vm14_vm0 = vcmask 122880   ;;  %vm82_vm1 = vcmask 130048   ;;  %v428_v0 = vmov 0.0   ;;  %s1318_s0 = inlined_call_operand.vmem [shape: f32[512,16], index: 0, kind: input, shape index: {}]   ;;  %s1319_s1 = inlined_call_operand.vmem [shape: f32[1,16], index: 1, kind: output, shape index: {0}]   ;;  %s1320_s2 = inlined_call_operand.vmem [shape: f32[1,16], index: 2, kind: output, shape index: {1}]  }
   0x1   :  { %15 = vst.msk [vmem:[%s1319_s1] sm:$0x1] %vm14_vm0, %v428_v0  ;;  %16 = vst.msk [vmem:[%s1320_s2] sm:$0x1] %vm14_vm0, %v428_v0  ;;  %v455_v1 = vld [vmem:[%s1318_s0] sm:$0xff]  ;;  %v460_v2 = vld [vmem:[%s1318_s0 + $0x8] sm:$0xff] }
   0x2   :  { %v465_v3 = vld [vmem:[%s1318_s0 + $0x10] sm:$0xff]  ;;  %v83_v4 = vsel %vm82_vm1, %v455_v1, 0.0  ;;  %v84_v5 = vsel %vm82_vm1, %v460_v2, 0.0  ;;  %v476_v7 = vld [vmem:[%s1318_s0 + $0x18] sm:$0xff]  ;;  %v483_v10 = vld [vmem:[%s1318_s0 + $0x20] sm:$0xff] }
   0x3   :  { %v86_v6 = vsel %vm82_vm1, %v465_v3, 0.0  ;;  %v85_v8 = vadd.f32 %v84_v5, %v83_v4  ;;  %v88_v9 = vsel %vm82_vm1, %v476_v7, 0.0  ;;  %v90_v12 = vsel %vm82_vm1, %v483_v10, 0.0  ;;  %v490_v13 = vld [vmem:[%s1318_s0 + $0x28] sm:$0xff]  ;;  %v497_v16 = vld [vmem:[%s1318_s0 + $0x30] sm:$0xff]  ;;  %v502_v18 = vld [vmem:[%s1318_s0 + $0x38] sm:$0xff] }
   0x4   :  { %v92_v15 = vsel %vm82_vm1, %v490_v13, 0.0  ;;  %v507_v19 = vld [vmem:[%s1318_s0 + $0x40] sm:$0xff]  ;;  %v94_v20 = vsel %vm82_vm1, %v497_v16, 0.0  ;;  %v514_v21 = vld [vmem:[%s1318_s0 + $0x48] sm:$0xff]  ;;  %v519_v22 = vld [vmem:[%s1318_s0 + $0x50] sm:$0xff]  ;;  %v96_v25 = vsel %vm82_vm1, %v502_v18, 0.0 }
   0x5   :  { %v87_v11 = vadd.f32 %v86_v6, %v85_v8  ;;  %v524_v23 = vld [vmem:[%s1318_s0 + $0x58] sm:$0xff]  ;;  %v98_v26 = vsel %vm82_vm1, %v507_v19, 0.0  ;;  %v533_v27 = vld [vmem:[%s1318_s0 + $0x108] sm:$0xff]  ;;  %v538_v28 = vld [vmem:[%s1318_s0 + $0x110] sm:$0xff]  ;;  %v100_v30 = vsel %vm82_vm1, %v514_v21, 0.0  ;;  %v102_v31 = vsel %vm82_vm1, %v519_v22, 0.0 }
   0x6   :  { %v543_v29 = vld [vmem:[%s1318_s0 + $0x118] sm:$0xff]  ;;  %v551_v32 = vsel %vm82_vm1, %v524_v23, 0.0  ;;  %v556_v33 = vld [vmem:[%s1318_s0 + $0x120] sm:$0xff]  ;;  %v561_v34 = vld [vmem:[%s1318_s0 + $0x128] sm:$0xff]  ;;  %v570_v37 = vsel %vm82_vm1, %v533_v27, 0.0  ;;  %v574_v38 = vsel %vm82_vm1, %v538_v28, 0.0 }
   0x7   :  { %v89_v14 = vadd.f32 %v88_v9, %v87_v11  ;;  %v566_v35 = vld [vmem:[%s1318_s0 + $0x130] sm:$0xff]  ;;  %1339 = vst [vmem:[#allocation2_spill] sm:$0xff] %v570_v37  ;;  %1340 = vst [vmem:[#allocation3_spill] sm:$0xff] %v574_v38  ;;  %v578_v39 = vsel %vm82_vm1, %v543_v29, 0.0  ;;  %v583_v40 = vld [vmem:[%s1318_s0 + $0x138] sm:$0xff]  ;;  %v597_v43 = vsel %vm82_vm1, %v556_v33, 0.0  ;;  %v222_v37 = vmul.f32 %v465_v3, %v465_v3 }
   0x8   :  { %1341 = vst [vmem:[#allocation4_spill] sm:$0xff] %v578_v39  ;;  %v588_v41 = vld [vmem:[%s1318_s0 + $0x140] sm:$0xff]  ;;  %v593_v42 = vld [vmem:[%s1318_s0 + $0x148] sm:$0xff]  ;;  %1342 = vst [vmem:[#allocation5_spill] sm:$0xff] %v597_v43  ;;  %v601_v44 = vsel %vm82_vm1, %v561_v34, 0.0  ;;  %v605_v45 = vsel %vm82_vm1, %v566_v35, 0.0 }
   0x9   :  { %v91_v17 = vadd.f32 %v90_v12, %v89_v14  ;;  %1343 = vst [vmem:[#allocation6_spill] sm:$0xff] %v601_v44  ;;  %1344 = vst [vmem:[#allocation7_spill] sm:$0xff] %v605_v45  ;;  %v610_v46 = vld [vmem:[%s1318_s0 + $0x150] sm:$0xff]  ;;  %v615_v47 = vld [vmem:[%s1318_s0 + $0x158] sm:$0xff]  ;;  %v624_v50 = vsel %vm82_vm1, %v583_v40, 0.0  ;;  %v628_v51 = vsel %vm82_vm1, %v588_v41, 0.0 }
   0xa   :  { %v620_v48 = vld [vmem:[%s1318_s0 + $0x160] sm:$0xff]  ;;  %1345 = vst [vmem:[#allocation8_spill] sm:$0xff] %v624_v50  ;;  %1346 = vst [vmem:[#allocation9_spill] sm:$0xff] %v628_v51  ;;  %v632_v52 = vsel %vm82_vm1, %v593_v42, 0.0  ;;  %v637_v53 = vld [vmem:[%s1318_s0 + $0x168] sm:$0xff]  ;;  %v651_v56 = vsel %vm82_vm1, %v610_v46, 0.0 }
   0xb   :  { %v93_v24 = vadd.f32 %v92_v15, %v91_v17  ;;  %1347 = vst [vmem:[#allocation10_spill] sm:$0xff] %v632_v52  ;;  %v642_v54 = vld [vmem:[%s1318_s0 + $0x170] sm:$0xff]  ;;  %v647_v55 = vld [vmem:[%s1318_s0 + $0x178] sm:$0xff]  ;;  %1348 = vst [vmem:[#allocation11_spill] sm:$0xff] %v651_v56  ;;  %v655_v57 = vsel %vm82_vm1, %v615_v47, 0.0  ;;  %v659_v58 = vsel %vm82_vm1, %v620_v48, 0.0 }
   0xc   :  { %1349 = vst [vmem:[#allocation12_spill] sm:$0xff] %v655_v57  ;;  %1350 = vst [vmem:[#allocation13_spill] sm:$0xff] %v659_v58  ;;  %v664_v59 = vld [vmem:[%s1318_s0 + $0x180] sm:$0xff]  ;;  %v669_v60 = vld [vmem:[%s1318_s0 + $0x188] sm:$0xff]  ;;  %v678_v63 = vsel %vm82_vm1, %v637_v53, 0.0  ;;  %v682_v0 = vsel %vm82_vm1, %v642_v54, 0.0 }
   0xd   :  { %v95_v36 = vadd.f32 %v94_v20, %v93_v24  ;;  %v674_v61 = vld [vmem:[%s1318_s0 + $0x190] sm:$0xff]  ;;  %1351 = vst [vmem:[#allocation14_spill] sm:$0xff] %v678_v63  ;;  %1352 = vst [vmem:[#allocation15_spill] sm:$0xff] %v682_v0  ;;  %v686_v4 = vsel %vm82_vm1, %v647_v55, 0.0  ;;  %v691_v5 = vld [vmem:[%s1318_s0 + $0x198] sm:$0xff]  ;;  %v705_v9 = vsel %vm82_vm1, %v664_v59, 0.0 }
   0xe   :  { %1353 = vst [vmem:[#allocation16_spill] sm:$0xff] %v686_v4  ;;  %v696_v6 = vld [vmem:[%s1318_s0 + $0x1a0] sm:$0xff]  ;;  %v701_v8 = vld [vmem:[%s1318_s0 + $0x1a8] sm:$0xff]  ;;  %1354 = vst [vmem:[#allocation17_spill] sm:$0xff] %v705_v9  ;;  %v709_v11 = vsel %vm82_vm1, %v669_v60, 0.0  ;;  %v713_v12 = vsel %vm82_vm1, %v674_v61, 0.0 }
   0xf   :  { %v97_v49 = vadd.f32 %v96_v25, %v95_v36  ;;  %1355 = vst [vmem:[#allocation18_spill] sm:$0xff] %v709_v11  ;;  %1356 = vst [vmem:[#allocation19_spill] sm:$0xff] %v713_v12  ;;  %v718_v14 = vld [vmem:[%s1318_s0 + $0x60] sm:$0xff]  ;;  %v723_v15 = vld [vmem:[%s1318_s0 + $0x1b0] sm:$0xff]  ;;  %v737_v25 = vsel %vm82_vm1, %v691_v5, 0.0  ;;  %v745_v36 = vsel %vm82_vm1, %v701_v8, 0.0 }
  0x10   :  { %v728_v17 = vld [vmem:[%s1318_s0 + $0x1b8] sm:$0xff]  ;;  %v733_v20 = vld [vmem:[%s1318_s0 + $0x1c0] sm:$0xff]  ;;  %1357 = vst [vmem:[#allocation20_spill] sm:$0xff] %v737_v25  ;;  %1359 = vst [vmem:[#allocation22_spill] sm:$0xff] %v745_v36 }
  0x11   :  { %v99_v62 = vadd.f32 %v98_v26, %v97_v49  ;;  %v741_v26 = vsel %vm82_vm1, %v696_v6, 0.0  ;;  %v750_v49 = vld [vmem:[%s1318_s0 + $0x1c8] sm:$0xff]  ;;  %v768_v36 = vsel %vm82_vm1, %v728_v17, 0.0  ;;  %v772_v25 = vsel %vm82_vm1, %v733_v20, 0.0  ;;  %v777_v12 = vld [vmem:[%s1318_s0 + $0x1e0] sm:$0xff]  ;;  %v804_v0 = vld [vmem:[%s1318_s0 + $0x1f8] sm:$0xff] }
  0x12   :  { %1358 = vst [vmem:[#allocation21_spill] sm:$0xff] %v741_v26  ;;  %v764_v26 = vsel %vm82_vm1, %v723_v15, 0.0  ;;  %1361 = vst [vmem:[#allocation24_spill] sm:$0xff] %v768_v36  ;;  %v782_v11 = vld [vmem:[%s1318_s0 + $0x1e8] sm:$0xff]  ;;  %v791_v9 = vsel %vm82_vm1, %v750_v49, 0.0  ;;  %v826_v58 = vsel %vm82_vm1, %v804_v0, 0.0 }
  0x13   :  { %v101_v24 = vadd.f32 %v100_v30, %v99_v62  ;;  %v755_v30 = vld [vmem:[%s1318_s0 + $0x1d0] sm:$0xff]  ;;  %v760_v62 = vld [vmem:[%s1318_s0 + $0x1d8] sm:$0xff]  ;;  %1360 = vst [vmem:[#allocation23_spill] sm:$0xff] %v764_v26  ;;  %1362 = vst [vmem:[#allocation25_spill] sm:$0xff] %v772_v25 }
  0x14   :  { %v787_v26 = vld [vmem:[%s1318_s0 + $0x1f0] sm:$0xff]  ;;  %1364 = vst [vmem:[#allocation27_spill] sm:$0xff] %v791_v9  ;;  %v795_v25 = vsel %vm82_vm1, %v755_v30, 0.0  ;;  %v799_v4 = vsel %vm82_vm1, %v760_v62, 0.0  ;;  %1367 = vst [vmem:[#allocation30_spill] sm:$0xff] %v804_v0  ;;  %v814_v9 = vsel %vm82_vm1, %v782_v11, 0.0 }
  0x15   :  { %1363 = vst [vmem:[#allocation26_spill] sm:$0xff] %v787_v26  ;;  %v103_v36 = vadd.f32 %v102_v31, %v101_v24  ;;  %1365 = vst [vmem:[#allocation28_spill] sm:$0xff] %v795_v25  ;;  %v106_v31 = vsel %vm82_vm1, %v718_v14, 0.0  ;;  %v810_v24 = vsel %vm82_vm1, %v777_v12, 0.0  ;;  %v818_v25 = vsel %vm82_vm1, %v787_v26, 0.0  ;;  %v855_v56 = vld [vmem:[%s1318_s0 + $0x90] sm:$0xff] }
  0x16   :  { %1366 = vst [vmem:[#allocation29_spill] sm:$0xff] %v799_v4  ;;  %1368 = vst [vmem:[#allocation31_spill] sm:$0xff] %v810_v24  ;;  %v30_v4 = vld [vmem:[%s1318_s0 + $0x68] sm:$0xff]  ;;  %v860_v52 = vld [vmem:[%s1318_s0 + $0x98] sm:$0xff] }
  0x17   :  { %1369 = vst [vmem:[#allocation32_spill] sm:$0xff] %v814_v9  ;;  %1370 = vst [vmem:[#allocation33_spill] sm:$0xff] %v818_v25  ;;  %v105_v63 = vadd.f32 %v551_v32, %v103_v36  ;;  %v108_v24 = vsel %vm82_vm1, %v30_v4, 0.0  ;;  %v31_v9 = vld [vmem:[%s1318_s0 + $0x70] sm:$0xff]  ;;  %v835_v25 = vld [vmem:[%s1318_s0 + $0x78] sm:$0xff]  ;;  %v120_v39 = vsel %vm82_vm1, %v860_v52, 0.0 }
  0x18   :  { %1371 = vst [vmem:[#allocation34_spill] sm:$0xff] %v826_v58  ;;  %1372 = vst [vmem:[#allocation35_spill] sm:$0xff] %v835_v25  ;;  %v840_v32 = vld [vmem:[%s1318_s0 + $0x80] sm:$0xff]  ;;  %v845_v36 = vld [vmem:[%s1318_s0 + $0x88] sm:$0xff]  ;;  %v110_v58 = vsel %vm82_vm1, %v31_v9, 0.0 }
  0x19   :  { %v107_v57 = vadd.f32 %v106_v31, %v105_v63  ;;  %1373 = vst [vmem:[#allocation36_spill] sm:$0xff] %v840_v32  ;;  %1374 = vst [vmem:[#allocation37_spill] sm:$0xff] %v845_v36  ;;  %v220_v63 = vmul.f32 %v455_v1, %v455_v1  ;;  %v221_v31 = vmul.f32 %v460_v2, %v460_v2  ;;  %v865_v51 = vld [vmem:[%s1318_s0 + $0xa0] sm:$0xff]  ;;  %v112_v1 = vsel %vm82_vm1, %v835_v25, 0.0  ;;  %v876_v44 = vld [vmem:[%s1318_s0 + $0xa8] sm:$0xff] }
  0x1a   :  { %1375 = vst [vmem:[#allocation38_spill] sm:$0xff] %v855_v56  ;;  %1376 = vst [vmem:[#allocation39_spill] sm:$0xff] %v860_v52  ;;  %v114_v2 = vsel %vm82_vm1, %v840_v32, 0.0  ;;  %v116_v45 = vsel %vm82_vm1, %v845_v36, 0.0  ;;  %v881_v43 = vld [vmem:[%s1318_s0 + $0xb0] sm:$0xff]  ;;  %v122_v38 = vsel %vm82_vm1, %v865_v51, 0.0  ;;  %v223_v25 = vmul.f32 %v476_v7, %v476_v7 }
  0x1b   :  { %1377 = vst [vmem:[#allocation40_spill] sm:$0xff] %v865_v51  ;;  %v109_v50 = vadd.f32 %v108_v24, %v107_v57  ;;  %1378 = vst [vmem:[#allocation41_spill] sm:$0xff] %v876_v44  ;;  %v886_v57 = vld [vmem:[%s1318_s0 + $0xb8] sm:$0xff]  ;;  %v118_v24 = vsel %vm82_vm1, %v855_v56, 0.0  ;;  %v899_v36 = vld [vmem:[%s1318_s0 + $0xc0] sm:$0xff]  ;;  %v124_v51 = vsel %vm82_vm1, %v876_v44, 0.0 }
  0x1c   :  { %1379 = vst [vmem:[#allocation42_spill] sm:$0xff] %v881_v43  ;;  %1380 = vst [vmem:[#allocation43_spill] sm:$0xff] %v886_v57  ;;  %v904_v32 = vld [vmem:[%s1318_s0 + $0xc8] sm:$0xff]  ;;  %v909_v52 = vld [vmem:[%s1318_s0 + $0xd0] sm:$0xff]  ;;  %v915_v3 = vsel %vm82_vm1, %v881_v43, 0.0 }
  0x1d   :  { %1381 = vst [vmem:[#allocation44_spill] sm:$0xff] %v899_v36  ;;  %1382 = vst [vmem:[#allocation45_spill] sm:$0xff] %v904_v32  ;;  %v111_v56 = vadd.f32 %v110_v58, %v109_v50  ;;  %v922_v0 = vld [vmem:[%s1318_s0 + $0xd8] sm:$0xff]  ;;  %v927_v26 = vld [vmem:[%s1318_s0 + $0xe0] sm:$0xff]  ;;  %v931_v50 = vsel %vm82_vm1, %v886_v57, 0.0  ;;  %v935_v58 = vsel %vm82_vm1, %v899_v36, 0.0 }
  0x1e   :  { %1383 = vst [vmem:[#allocation46_spill] sm:$0xff] %v909_v52  ;;  %1384 = vst [vmem:[#allocation47_spill] sm:$0xff] %v922_v0  ;;  %v939_v7 = vsel %vm82_vm1, %v904_v32, 0.0  ;;  %v943_v43 = vsel %vm82_vm1, %v909_v52, 0.0  ;;  %v948_v44 = vld [vmem:[%s1318_s0 + $0xe8] sm:$0xff]  ;;  %v953_v57 = vld [vmem:[%s1318_s0 + $0xf0] sm:$0xff]  ;;  %v224_v52 = vmul.f32 %v483_v10, %v483_v10  ;;  %v228_v10 = vmul.f32 %v507_v19, %v507_v19 }
  0x1f   :  { %1385 = vst [vmem:[#allocation48_spill] sm:$0xff] %v927_v26  ;;  %1386 = vst [vmem:[#allocation49_spill] sm:$0xff] %v935_v58  ;;  %v113_v36 = vadd.f32 %v112_v1, %v111_v56  ;;  %v957_v58 = vsel %vm82_vm1, %v922_v0, 0.0  ;;  %v961_v32 = vsel %vm82_vm1, %v927_v26, 0.0  ;;  %v225_v56 = vmul.f32 %v490_v13, %v490_v13 }
  0x20   :  { %1387 = vst [vmem:[#allocation50_spill] sm:$0xff] %v939_v7  ;;  %1388 = vst [vmem:[#allocation51_spill] sm:$0xff] %v943_v43  ;;  %v967_v43 = vsel %vm82_vm1, %v948_v44, 0.0  ;;  %v971_v7 = vsel %vm82_vm1, %v953_v57, 0.0  ;;  %v226_v1 = vmul.f32 %v497_v16, %v497_v16  ;;  %v227_v26 = vmul.f32 %v502_v18, %v502_v18 }
  0x21   :  { %1389 = vst [vmem:[#allocation52_spill] sm:$0xff] %v948_v44  ;;  %1390 = vst [vmem:[#allocation53_spill] sm:$0xff] %v953_v57  ;;  %v115_v0 = vadd.f32 %v114_v2, %v113_v36  ;;  %v229_v44 = vmul.f32 %v514_v21, %v514_v21  ;;  %v230_v57 = vmul.f32 %v519_v22, %v519_v22 }
  0x22   :  { %1391 = vst [vmem:[#allocation54_spill] sm:$0xff] %v971_v7  ;;  %v231_v7 = vmul.f32 %v524_v23, %v524_v23  ;;  %v232_v13 = vmul.f32 %v718_v14, %v718_v14  ;;  %v989_v16 = vmul.f32 %v30_v4, %v30_v4  ;;  %v991_v2 = vmul.f32 %v31_v9, %v31_v9 }
  0x23   :  { %v117_v36 = vadd.f32 %v116_v45, %v115_v0  ;;  %v253_v18 = vmul.f32 %v533_v27, %v533_v27  ;;  %v254_v19 = vmul.f32 %v538_v28, %v538_v28  ;;  %v255_v21 = vmul.f32 %v543_v29, %v543_v29 }
  0x24   :  { %v256_v22 = vmul.f32 %v556_v33, %v556_v33  ;;  %v257_v23 = vmul.f32 %v561_v34, %v561_v34  ;;  %v258_v45 = vmul.f32 %v566_v35, %v566_v35  ;;  %v259_v4 = vmul.f32 %v583_v40, %v583_v40 }
  0x25   :  { %v119_v0 = vadd.f32 %v118_v24, %v117_v36  ;;  %v260_v27 = vmul.f32 %v588_v41, %v588_v41  ;;  %v261_v28 = vmul.f32 %v593_v42, %v593_v42  ;;  %v262_v29 = vmul.f32 %v610_v46, %v610_v46 }
  0x26   :  { %v263_v33 = vmul.f32 %v615_v47, %v615_v47  ;;  %v284_v34 = vsel %vm82_vm1, %v220_v63, 0.0  ;;  %v285_v35 = vsel %vm82_vm1, %v221_v31, 0.0  ;;  %v264_v40 = vmul.f32 %v620_v48, %v620_v48 }
  0x27   :  { %v121_v9 = vadd.f32 %v120_v39, %v119_v0  ;;  %v286_v14 = vadd.f32 %v285_v35, %v284_v34  ;;  %v287_v41 = vsel %vm82_vm1, %v222_v37, 0.0  ;;  %v265_v42 = vmul.f32 %v637_v53, %v637_v53  ;;  %v1392_v0 = vld [vmem:[#allocation26_spill] sm:$0xff] }
  0x28   :  { %v266_v46 = vmul.f32 %v642_v54, %v642_v54  ;;  %v267_v47 = vmul.f32 %v647_v55, %v647_v55  ;;  %v289_v63 = vsel %vm82_vm1, %v223_v25, 0.0  ;;  %v268_v39 = vmul.f32 %v664_v59, %v664_v59  ;;  %v1393_v34 = vld [vmem:[#allocation30_spill] sm:$0xff] }
  0x29   :  { %v123_v24 = vadd.f32 %v122_v38, %v121_v9  ;;  %v269_v48 = vmul.f32 %v669_v60, %v669_v60  ;;  %v288_v31 = vadd.f32 %v287_v41, %v286_v14  ;;  %v270_v37 = vmul.f32 %v674_v61, %v674_v61  ;;  %v1394_v41 = vld [vmem:[#allocation49_spill] sm:$0xff] }
  0x2a   :  { %v271_v53 = vmul.f32 %v691_v5, %v691_v5  ;;  %v272_v54 = vmul.f32 %v696_v6, %v696_v6  ;;  %v291_v55 = vsel %vm82_vm1, %v224_v52, 0.0  ;;  %v273_v38 = vmul.f32 %v701_v8, %v701_v8 }
  0x2b   :  { %v125_v25 = vadd.f32 %v124_v51, %v123_v24  ;;  %v274_v59 = vmul.f32 %v723_v15, %v723_v15  ;;  %v290_v60 = vadd.f32 %v289_v63, %v288_v31  ;;  %v275_v36 = vmul.f32 %v728_v17, %v728_v17 }
  0x2c   :  { %v276_v61 = vmul.f32 %v733_v20, %v733_v20  ;;  %v277_v5 = vmul.f32 %v750_v49, %v750_v49  ;;  %v293_v6 = vsel %vm82_vm1, %v225_v56, 0.0  ;;  %v278_v52 = vmul.f32 %v755_v30, %v755_v30 }
  0x2d   :  { %v127_v51 = vadd.f32 %v915_v3, %v125_v25  ;;  %v279_v8 = vmul.f32 %v760_v62, %v760_v62  ;;  %v292_v15 = vadd.f32 %v291_v55, %v290_v60  ;;  %v280_v17 = vmul.f32 %v777_v12, %v777_v12  ;;  %v1396_v25 = vld [vmem:[#allocation51_spill] sm:$0xff] }
  0x2e   :  { %v281_v20 = vmul.f32 %v782_v11, %v782_v11  ;;  %v282_v49 = vmul.f32 %v1392_v0, %v1392_v0  ;;  %v295_v56 = vsel %vm82_vm1, %v226_v1, 0.0  ;;  %v283_v30 = vmul.f32 %v1393_v34, %v1393_v34  ;;  %v1398_v34 = vld [vmem:[#allocation54_spill] sm:$0xff] }
  0x2f   :  { %v129_v3 = vadd.f32 %v931_v50, %v127_v51  ;;  %v294_v35 = vadd.f32 %v293_v6, %v292_v15  ;;  %v297_v62 = vsel %vm82_vm1, %v227_v26, 0.0  ;;  %v299_v9 = vsel %vm82_vm1, %v228_v10, 0.0 }
  0x30   :  { %v301_v12 = vsel %vm82_vm1, %v229_v44, 0.0  ;;  %v303_v14 = vsel %vm82_vm1, %v230_v57, 0.0  ;;  %v305_v11 = vsel %vm82_vm1, %v231_v7, 0.0  ;;  %v307_v1 = vsel %vm82_vm1, %v232_v13, 0.0  ;;  %v1395_v7 = vld [vmem:[#allocation50_spill] sm:$0xff] }
  0x31   :  { %v131_v63 = vadd.f32 %v1394_v41, %v129_v3  ;;  %v296_v24 = vadd.f32 %v295_v56, %v294_v35  ;;  %v1072_v50 = vsel %vm82_vm1, %v253_v18, 0.0  ;;  %v1075_v31 = vsel %vm82_vm1, %v254_v19, 0.0  ;;  %v1397_v56 = vld [vmem:[#allocation35_spill] sm:$0xff] }
  0x32   :  { %v1078_v26 = vsel %vm82_vm1, %v255_v21, 0.0  ;;  %v1081_v44 = vsel %vm82_vm1, %v256_v22, 0.0  ;;  %v1084_v57 = vsel %vm82_vm1, %v257_v23, 0.0  ;;  %v1088_v13 = vsel %vm82_vm1, %v258_v45, 0.0 }
  0x33   :  { %v133_v10 = vadd.f32 %v1395_v7, %v131_v63  ;;  %v298_v55 = vadd.f32 %v297_v62, %v296_v24  ;;  %v1091_v18 = vsel %vm82_vm1, %v259_v4, 0.0  ;;  %v1094_v19 = vsel %vm82_vm1, %v260_v27, 0.0  ;;  %v1399_v62 = vld [vmem:[#allocation36_spill] sm:$0xff] }
  0x34   :  { %v1097_v21 = vsel %vm82_vm1, %v261_v28, 0.0  ;;  %v1100_v22 = vsel %vm82_vm1, %v262_v29, 0.0  ;;  %v1103_v23 = vsel %vm82_vm1, %v263_v33, 0.0  ;;  %v1107_v45 = vsel %vm82_vm1, %v264_v40, 0.0 }
  0x35   :  { %v135_v60 = vadd.f32 %v1396_v25, %v133_v10  ;;  %v300_v6 = vadd.f32 %v299_v9, %v298_v55  ;;  %v1110_v4 = vsel %vm82_vm1, %v265_v42, 0.0  ;;  %v1113_v27 = vsel %vm82_vm1, %v266_v46, 0.0  ;;  %v1401_v10 = vld [vmem:[#allocation38_spill] sm:$0xff] }
  0x36   :  { %v1116_v28 = vsel %vm82_vm1, %v267_v47, 0.0  ;;  %v1119_v29 = vsel %vm82_vm1, %v268_v39, 0.0  ;;  %v1122_v33 = vsel %vm82_vm1, %v269_v48, 0.0  ;;  %v1126_v40 = vsel %vm82_vm1, %v270_v37, 0.0  ;;  %v1402_v25 = vld [vmem:[#allocation2_spill] sm:$0xff] }
  0x37   :  { %v137_v51 = vadd.f32 %v957_v58, %v135_v60  ;;  %v302_v15 = vadd.f32 %v301_v12, %v300_v6  ;;  %v1129_v42 = vsel %vm82_vm1, %v271_v53, 0.0  ;;  %v1132_v46 = vsel %vm82_vm1, %v272_v54, 0.0 }
  0x38   :  { %v1135_v47 = vsel %vm82_vm1, %v273_v38, 0.0  ;;  %v1138_v39 = vsel %vm82_vm1, %v274_v59, 0.0  ;;  %v1141_v48 = vsel %vm82_vm1, %v275_v36, 0.0  ;;  %v1145_v37 = vsel %vm82_vm1, %v276_v61, 0.0 }
  0x39   :  { %v139_v58 = vadd.f32 %v961_v32, %v137_v51  ;;  %v304_v0 = vadd.f32 %v303_v14, %v302_v15  ;;  %v1148_v53 = vsel %vm82_vm1, %v277_v5, 0.0  ;;  %v1151_v54 = vsel %vm82_vm1, %v278_v52, 0.0  ;;  %v1165_v32 = vld [vmem:[%s1318_s0 + $0xf8] sm:$0xff]  ;;  %v1403_v51 = vld [vmem:[#allocation39_spill] sm:$0xff] }
  0x3a   :  { %v1154_v38 = vsel %vm82_vm1, %v279_v8, 0.0  ;;  %v1157_v59 = vsel %vm82_vm1, %v280_v17, 0.0  ;;  %v1160_v36 = vsel %vm82_vm1, %v281_v20, 0.0  ;;  %v1169_v52 = vsel %vm82_vm1, %v282_v49, 0.0 }
  0x3b   :  { %v141_v61 = vadd.f32 %v967_v43, %v139_v58  ;;  %v306_v5 = vadd.f32 %v305_v11, %v304_v0  ;;  %v1172_v8 = vsel %vm82_vm1, %v283_v30, 0.0  ;;  %v144_v17 = vsel %vm82_vm1, %v1165_v32, 0.0  ;;  %v1183_v43 = vld [vmem:[%s1318_s0 + $0x100] sm:$0xff]  ;;  %v1404_v58 = vld [vmem:[#allocation3_spill] sm:$0xff] }
  0x3c   :  { %v235_v20 = vmul.f32 %v1397_v56, %v1397_v56  ;;  %v309_v3 = vsel %vm82_vm1, %v989_v16, 0.0  ;;  %v146_v30 = vsel %vm82_vm1, %v1183_v43, 0.0  ;;  %v236_v9 = vmul.f32 %v1399_v62, %v1399_v62  ;;  %v1400_v16 = vld [vmem:[#allocation37_spill] sm:$0xff] }
  0x3d   :  { %v143_v49 = vadd.f32 %v1398_v34, %v141_v61  ;;  %v308_v35 = vadd.f32 %v307_v1, %v306_v5  ;;  %v311_v12 = vsel %vm82_vm1, %v991_v2, 0.0  ;;  %v237_v41 = vmul.f32 %v1400_v16, %v1400_v16  ;;  %v1405_v5 = vld [vmem:[#allocation40_spill] sm:$0xff]  ;;  %v1408_v62 = vld [vmem:[#allocation5_spill] sm:$0xff] }
  0x3e   :  { %v313_v63 = vsel %vm82_vm1, %v235_v20, 0.0  ;;  %v238_v1 = vmul.f32 %v1401_v10, %v1401_v10  ;;  %v315_v55 = vsel %vm82_vm1, %v236_v9, 0.0  ;;  %v239_v2 = vmul.f32 %v1403_v51, %v1403_v51  ;;  %v1406_v20 = vld [vmem:[#allocation4_spill] sm:$0xff] }
  0x3f   :  { %v145_v14 = vadd.f32 %v144_v17, %v143_v49  ;;  %v310_v11 = vadd.f32 %v309_v3, %v308_v35  ;;  %v317_v15 = vsel %vm82_vm1, %v237_v41, 0.0  ;;  %v240_v17 = vmul.f32 %v1405_v5, %v1405_v5  ;;  %v1407_v49 = vld [vmem:[#allocation41_spill] sm:$0xff]  ;;  %v1410_v41 = vld [vmem:[#allocation6_spill] sm:$0xff] }
  0x40   :  { %v319_v56 = vsel %vm82_vm1, %v238_v1, 0.0  ;;  %v241_v35 = vmul.f32 %v1407_v49, %v1407_v49 }
  0x41   :  { %v147_v24 = vadd.f32 %v146_v30, %v145_v14  ;;  %v312_v7 = vadd.f32 %v311_v12, %v310_v11  ;;  %v321_v30 = vsel %vm82_vm1, %v239_v2, 0.0  ;;  %v1409_v14 = vld [vmem:[#allocation42_spill] sm:$0xff]  ;;  %v323_v16 = vsel %vm82_vm1, %v240_v17, 0.0 }
  0x42   :  { %v242_v11 = vmul.f32 %v1409_v14, %v1409_v14  ;;  %v325_v1 = vsel %vm82_vm1, %v241_v35, 0.0 }
  0x43   :  { %v149_v60 = vadd.f32 %v1402_v25, %v147_v24  ;;  %v314_v6 = vadd.f32 %v313_v63, %v312_v7  ;;  %v1411_v7 = vld [vmem:[#allocation43_spill] sm:$0xff] }
  0x44   :  { %v243_v10 = vmul.f32 %v1411_v7, %v1411_v7  ;;  %v327_v2 = vsel %vm82_vm1, %v242_v11, 0.0 }
  0x45   :  { %v151_v0 = vadd.f32 %v1404_v58, %v149_v60  ;;  %v316_v61 = vadd.f32 %v315_v55, %v314_v6  ;;  %v1412_v55 = vld [vmem:[#allocation7_spill] sm:$0xff]  ;;  %v1413_v6 = vld [vmem:[#allocation44_spill] sm:$0xff] }
  0x46   :  { %v244_v51 = vmul.f32 %v1413_v6, %v1413_v6  ;;  %v329_v17 = vsel %vm82_vm1, %v243_v10, 0.0 }
  0x47   :  { %v153_v3 = vadd.f32 %v1406_v20, %v151_v0  ;;  %v318_v34 = vadd.f32 %v317_v15, %v316_v61  ;;  %v1414_v15 = vld [vmem:[#allocation8_spill] sm:$0xff]  ;;  %v1415_v61 = vld [vmem:[#allocation45_spill] sm:$0xff] }
  0x48   :  { %v245_v5 = vmul.f32 %v1415_v61, %v1415_v61  ;;  %v331_v35 = vsel %vm82_vm1, %v244_v51, 0.0 }
  0x49   :  { %v155_v9 = vadd.f32 %v1408_v62, %v153_v3  ;;  %v320_v12 = vadd.f32 %v319_v56, %v318_v34  ;;  %v1416_v56 = vld [vmem:[#allocation9_spill] sm:$0xff]  ;;  %v1417_v34 = vld [vmem:[#allocation46_spill] sm:$0xff] }
  0x4a   :  { %v246_v49 = vmul.f32 %v1417_v34, %v1417_v34  ;;  %v333_v11 = vsel %vm82_vm1, %v245_v5, 0.0 }
  0x4b   :  { %v157_v63 = vadd.f32 %v1410_v41, %v155_v9  ;;  %v322_v24 = vadd.f32 %v321_v30, %v320_v12  ;;  %v1418_v30 = vld [vmem:[#allocation10_spill] sm:$0xff]  ;;  %v1419_v12 = vld [vmem:[#allocation47_spill] sm:$0xff] }
  0x4c   :  { %v247_v14 = vmul.f32 %v1419_v12, %v1419_v12  ;;  %v335_v10 = vsel %vm82_vm1, %v246_v49, 0.0  ;;  %v1427_v49 = vld [vmem:[#allocation15_spill] sm:$0xff]  ;;  %v1428_v12 = vld [vmem:[#allocation16_spill] sm:$0xff] }
  0x4d   :  { %v159_v25 = vadd.f32 %v1412_v55, %v157_v63  ;;  %v324_v60 = vadd.f32 %v323_v16, %v322_v24  ;;  %v1420_v16 = vld [vmem:[#allocation11_spill] sm:$0xff]  ;;  %v1421_v24 = vld [vmem:[#allocation48_spill] sm:$0xff] }
  0x4e   :  { %v248_v7 = vmul.f32 %v1421_v24, %v1421_v24  ;;  %v337_v51 = vsel %vm82_vm1, %v247_v14, 0.0 }
  0x4f   :  { %v161_v58 = vadd.f32 %v1414_v15, %v159_v25  ;;  %v326_v0 = vadd.f32 %v325_v1, %v324_v60  ;;  %v1422_v1 = vld [vmem:[#allocation12_spill] sm:$0xff] }
  0x50   :  { %v1423_v60 = vld [vmem:[#allocation52_spill] sm:$0xff]  ;;  %v339_v5 = vsel %vm82_vm1, %v248_v7, 0.0  ;;  %v1430_v7 = vld [vmem:[#allocation18_spill] sm:$0xff] }
  0x51   :  { %v163_v20 = vadd.f32 %v1416_v56, %v161_v58  ;;  %v328_v3 = vadd.f32 %v327_v2, %v326_v0  ;;  %v249_v6 = vmul.f32 %v1423_v60, %v1423_v60  ;;  %v1424_v2 = vld [vmem:[#allocation13_spill] sm:$0xff] }
  0x52   :  { %v1425_v0 = vld [vmem:[#allocation53_spill] sm:$0xff] }
  0x53   :  { %v165_v62 = vadd.f32 %v1418_v30, %v163_v20  ;;  %v330_v9 = vadd.f32 %v329_v17, %v328_v3  ;;  %v250_v61 = vmul.f32 %v1425_v0, %v1425_v0  ;;  %v1426_v17 = vld [vmem:[#allocation14_spill] sm:$0xff]  ;;  %v251_v3 = vmul.f32 %v1165_v32, %v1165_v32 }
  0x54   :  { %v341_v34 = vsel %vm82_vm1, %v249_v6, 0.0  ;;  %v1432_v6 = vld [vmem:[#allocation20_spill] sm:$0xff]  ;;  %v1434_v0 = vld [vmem:[#allocation22_spill] sm:$0xff] }
  0x55   :  { %v167_v41 = vadd.f32 %v1420_v16, %v165_v62  ;;  %v332_v63 = vadd.f32 %v331_v35, %v330_v9  ;;  %v252_v62 = vmul.f32 %v1183_v43, %v1183_v43  ;;  %v343_v9 = vsel %vm82_vm1, %v250_v61, 0.0 }
  0x56   :  { %v345_v16 = vsel %vm82_vm1, %v251_v3, 0.0  ;;  %v1436_v3 = vld [vmem:[#allocation24_spill] sm:$0xff] }
  0x57   :  { %v169_v55 = vadd.f32 %v1422_v1, %v167_v41  ;;  %v334_v25 = vadd.f32 %v333_v11, %v332_v63  ;;  %v1429_v41 = vld [vmem:[#allocation17_spill] sm:$0xff]  ;;  %v347_v32 = vsel %vm82_vm1, %v252_v62, 0.0  ;;  %v1438_v62 = vld [vmem:[#allocation27_spill] sm:$0xff] }
  0x59   :  { %v171_v15 = vadd.f32 %v1424_v2, %v169_v55  ;;  %v336_v58 = vadd.f32 %v335_v10, %v334_v25  ;;  %v1431_v55 = vld [vmem:[#allocation19_spill] sm:$0xff]  ;;  %v1433_v2 = vld [vmem:[#allocation21_spill] sm:$0xff] }
  0x5b   :  { %v173_v56 = vadd.f32 %v1426_v17, %v171_v15  ;;  %v338_v20 = vadd.f32 %v337_v51, %v336_v58  ;;  %v1435_v17 = vld [vmem:[#allocation23_spill] sm:$0xff] }
  0x5d   :  { %v175_v35 = vadd.f32 %v1427_v49, %v173_v56  ;;  %v340_v30 = vadd.f32 %v339_v5, %v338_v20 }
  0x5f   :  { %v177_v14 = vadd.f32 %v1428_v12, %v175_v35  ;;  %v342_v11 = vadd.f32 %v341_v34, %v340_v30  ;;  %v1437_v35 = vld [vmem:[#allocation25_spill] sm:$0xff]  ;;  %v1439_v12 = vld [vmem:[#allocation28_spill] sm:$0xff] }
  0x61   :  { %v179_v63 = vadd.f32 %v1429_v41, %v177_v14  ;;  %v344_v24 = vadd.f32 %v343_v9, %v342_v11  ;;  %v1440_v11 = vld [vmem:[#allocation29_spill] sm:$0xff]  ;;  %v1441_v41 = vld [vmem:[#allocation31_spill] sm:$0xff] }
  0x63   :  { %v181_v10 = vadd.f32 %v1430_v7, %v179_v63  ;;  %v346_v1 = vadd.f32 %v345_v16, %v344_v24  ;;  %v1442_v24 = vld [vmem:[#allocation32_spill] sm:$0xff]  ;;  %v1443_v7 = vld [vmem:[#allocation33_spill] sm:$0xff] }
  0x65   :  { %v183_v25 = vadd.f32 %v1431_v55, %v181_v10  ;;  %v348_v60 = vadd.f32 %v347_v32, %v346_v1  ;;  %v1444_v1 = vld [vmem:[#allocation34_spill] sm:$0xff] }
  0x67   :  { %v185_v43 = vadd.f32 %v1432_v6, %v183_v25  ;;  %v350_v51 = vadd.f32 %v1072_v50, %v348_v60 }
  0x69   :  { %v187_v15 = vadd.f32 %v1433_v2, %v185_v43  ;;  %v352_v58 = vadd.f32 %v1075_v31, %v350_v51 }
  0x6b   :  { %v189_v61 = vadd.f32 %v1434_v0, %v187_v15  ;;  %v354_v5 = vadd.f32 %v1078_v26, %v352_v58 }
  0x6d   :  { %v191_v56 = vadd.f32 %v1435_v17, %v189_v61  ;;  %v356_v20 = vadd.f32 %v1081_v44, %v354_v5 }
  0x6f   :  { %v193_v34 = vadd.f32 %v1436_v3, %v191_v56  ;;  %v358_v49 = vadd.f32 %v1084_v57, %v356_v20 }
  0x71   :  { %v195_v30 = vadd.f32 %v1437_v35, %v193_v34  ;;  %v360_v50 = vadd.f32 %v1088_v13, %v358_v49 }
  0x73   :  { %v197_v9 = vadd.f32 %v1438_v62, %v195_v30  ;;  %v362_v31 = vadd.f32 %v1091_v18, %v360_v50 }
  0x75   :  { %v199_v14 = vadd.f32 %v1439_v12, %v197_v9  ;;  %v364_v26 = vadd.f32 %v1094_v19, %v362_v31 }
  0x77   :  { %v201_v16 = vadd.f32 %v1440_v11, %v199_v14  ;;  %v366_v44 = vadd.f32 %v1097_v21, %v364_v26 }
  0x79   :  { %v203_v63 = vadd.f32 %v1441_v41, %v201_v16  ;;  %v368_v57 = vadd.f32 %v1100_v22, %v366_v44 }
  0x7b   :  { %v205_v32 = vadd.f32 %v1442_v24, %v203_v63  ;;  %v370_v13 = vadd.f32 %v1103_v23, %v368_v57 }
  0x7d   :  { %v207_v10 = vadd.f32 %v1443_v7, %v205_v32  ;;  %v372_v18 = vadd.f32 %v1107_v45, %v370_v13  ;;  %v81_v45 = vld [vmem:[%s1319_s1] sm:$0x1] }
  0x7f   :  { %v209_v55 = vadd.f32 %v1444_v1, %v207_v10  ;;  %v374_v19 = vadd.f32 %v1110_v4, %v372_v18 }
  0x81   :  { %v210_v25 = vrot.slane %v209_v55, 4  ;;  %v376_v60 = vadd.f32 %v1113_v27, %v374_v19 }
  0x83   :  { %v211_v21 = vadd.f32 %v210_v25, %v209_v55  ;;  %v378_v6 = vadd.f32 %v1116_v28, %v376_v60 }
  0x85   :  { %v212_v43 = vrot.slane %v211_v21, 2  ;;  %v380_v22 = vadd.f32 %v1119_v29, %v378_v6 }
  0x87   :  { %v213_v51 = vadd.f32 %v212_v43, %v211_v21  ;;  %v382_v23 = vadd.f32 %v1122_v33, %v380_v22 }
  0x89   :  { %v214_v2 = vrot.slane %v213_v51, 1  ;;  %v384_v15 = vadd.f32 %v1126_v40, %v382_v23 }
  0x8b   :  { %v215_v4 = vadd.f32 %v214_v2, %v213_v51  ;;  %v386_v58 = vadd.f32 %v1129_v42, %v384_v15 }
  0x8d   :  { %v216_v27 = vadd.f32 %v215_v4, %v81_v45  ;;  %v388_v0 = vadd.f32 %v1132_v46, %v386_v58 }
  0x8f   :  { %218 = vst.msk [vmem:[%s1319_s1] sm:$0x1] %vm14_vm0, %v216_v27  ;;  %v390_v28 = vadd.f32 %v1135_v47, %v388_v0 }
  0x91   :  { %v392_v29 = vadd.f32 %v1138_v39, %v390_v28 }
  0x93   :  { %v394_v33 = vadd.f32 %v1141_v48, %v392_v29 }
  0x95   :  { %v396_v40 = vadd.f32 %v1145_v37, %v394_v33  ;;  %v219_v37 = vld [vmem:[%s1320_s2] sm:$0x1] }
  0x97   :  { %v398_v61 = vadd.f32 %v1148_v53, %v396_v40 }
  0x99   :  { %v400_v42 = vadd.f32 %v1151_v54, %v398_v61 }
  0x9b   :  { %v402_v5 = vadd.f32 %v1154_v38, %v400_v42 }
  0x9d   :  { %v404_v46 = vadd.f32 %v1157_v59, %v402_v5 }
  0x9f   :  { %v406_v17 = vadd.f32 %v1160_v36, %v404_v46 }
  0xa1   :  { %v408_v56 = vadd.f32 %v1169_v52, %v406_v17 }
  0xa3   :  { %v410_v47 = vadd.f32 %v1172_v8, %v408_v56 }
  0xa5   :  { %v411_v20 = vrot.slane %v410_v47, 4 }
  0xa7   :  { %v412_v39 = vadd.f32 %v411_v20, %v410_v47 }
  0xa9   :  { %v413_v3 = vrot.slane %v412_v39, 2 }
  0xab   :  { %v414_v48 = vadd.f32 %v413_v3, %v412_v39 }
  0xad   :  { %v415_v34 = vrot.slane %v414_v48, 1 }
  0xaf   :  { %v416_v53 = vadd.f32 %v415_v34, %v414_v48 }
  0xb1   :  { %v417_v54 = vadd.f32 %v416_v53, %v219_v37 }
  0xb3   :  { %418 = vst.msk [vmem:[%s1320_s2] sm:$0x1] %vm14_vm0, %v417_v54 }

// kernel: generator_forward.21
= control target key start
LH: loop header
LB: loop body
LE: loop exit
PB: predicated region body
PF: predicated region fallthrough
CT: control target
= control target key end

     0   :  { %vm540_vm0 = vcmask 125952   ;;  %s1345_s0 = inlined_call_operand.vmem [shape: f32[512,16], index: 0, kind: input, shape index: {}]   ;;  %s1346_s1 = inlined_call_operand.vmem [shape: f32[1,16], index: 1, kind: input, shape index: {}]   ;;  %s1347_s2 = inlined_call_operand.vmem [shape: f32[1,16], index: 2, kind: input, shape index: {}]   ;;  %s1348_s3 = inlined_call_operand.vmem [shape: bf16[512,16], index: 3, kind: output, shape index: {}]  }
   0x1   :  { %v14_v0 = vld [vmem:[%s1345_s0] sm:$0xff]  ;;  %v15_v4 = vld [vmem:[%s1345_s0 + $0x8] sm:$0xff]  ;;  %v16_v5 = vld [vmem:[%s1345_s0 + $0x10] sm:$0xff] }
   0x2   :  { %v765_v1 = vld [vmem:[%s1346_s1] ss:$0 sm:$0xff]  ;;  %v17_v6 = vld [vmem:[%s1345_s0 + $0x18] sm:$0xff]  ;;  %v19_v11 = vld [vmem:[%s1345_s0 + $0x28] sm:$0xff] }
   0x3   :  { %v770_v2 = vld [vmem:[%s1347_s2] ss:$0 sm:$0xff]  ;;  %v85_v3 = vmul.f32 %v765_v1, %v14_v0  ;;  %v86_v7 = vmul.f32 %v765_v1, %v15_v4  ;;  %v87_v8 = vmul.f32 %v765_v1, %v16_v5  ;;  %v88_v9 = vmul.f32 %v765_v1, %v17_v6  ;;  %v20_v12 = vld [vmem:[%s1345_s0 + $0x30] sm:$0xff]  ;;  %v21_v17 = vld [vmem:[%s1345_s0 + $0x38] sm:$0xff] }
   0x4   :  { %v18_v10 = vld [vmem:[%s1345_s0 + $0x20] sm:$0xff]  ;;  %v90_v15 = vmul.f32 %v765_v1, %v19_v11  ;;  %v91_v16 = vmul.f32 %v765_v1, %v20_v12  ;;  %v92_v21 = vmul.f32 %v765_v1, %v21_v17  ;;  %v23_v35 = vld [vmem:[%s1345_s0 + $0x48] sm:$0xff]  ;;  %v24_v36 = vld [vmem:[%s1345_s0 + $0x50] sm:$0xff] }
   0x5   :  { %v156_v13 = vadd.f32 %v770_v2, %v85_v3  ;;  %v89_v14 = vmul.f32 %v765_v1, %v18_v10  ;;  %v157_v18 = vadd.f32 %v770_v2, %v86_v7  ;;  %v158_v19 = vadd.f32 %v770_v2, %v87_v8  ;;  %v22_v30 = vld [vmem:[%s1345_s0 + $0x40] sm:$0xff]  ;;  %v25_v37 = vld [vmem:[%s1345_s0 + $0x58] sm:$0xff]  ;;  %v27_v43 = vld [vmem:[%s1345_s0 + $0x68] sm:$0xff] }
   0x6   :  { %v159_v20 = vadd.f32 %v770_v2, %v88_v9  ;;  %v161_v24 = vadd.f32 %v770_v2, %v90_v15  ;;  %v162_v25 = vadd.f32 %v770_v2, %v91_v16  ;;  %v163_v29 = vadd.f32 %v770_v2, %v92_v21  ;;  %v26_v42 = vld [vmem:[%s1345_s0 + $0x60] sm:$0xff]  ;;  %v28_v44 = vld [vmem:[%s1345_s0 + $0x70] sm:$0xff]  ;;  %v29_v49 = vld [vmem:[%s1345_s0 + $0x78] sm:$0xff] }
   0x7   :  { %v220_v22 = vmax.f32 %v156_v13, 0.0  ;;  %v160_v23 = vadd.f32 %v770_v2, %v89_v14  ;;  %v221_v26 = vmax.f32 %v157_v18, 0.0  ;;  %v222_v27 = vmax.f32 %v158_v19, 0.0  ;;  %v30_v8 = vld [vmem:[%s1345_s0 + $0x80] sm:$0xff]  ;;  %v31_v13 = vld [vmem:[%s1345_s0 + $0x88] sm:$0xff]  ;;  %v32_v14 = vld [vmem:[%s1345_s0 + $0x90] sm:$0xff] }
   0x8   :  { %v223_v28 = vmax.f32 %v159_v20, 0.0  ;;  %v225_v33 = vmax.f32 %v161_v24, 0.0  ;;  %v226_v34 = vmax.f32 %v162_v25, 0.0  ;;  %v227_v41 = vmax.f32 %v163_v29, 0.0  ;;  %v33_v15 = vld [vmem:[%s1345_s0 + $0x98] sm:$0xff]  ;;  %v34_v20 = vld [vmem:[%s1345_s0 + $0xa0] sm:$0xff] }
   0x9   :  { %v675_v31 = vpack.c.bf16 %v220_v22, %v220_v22  ;;  %v224_v32 = vmax.f32 %v160_v23, 0.0  ;;  %v676_v38 = vpack.c.bf16 %v221_v26, %v221_v26  ;;  %v677_v39 = vpack.c.bf16 %v222_v27, %v222_v27  ;;  %v35_v21 = vld [vmem:[%s1345_s0 + $0xa8] sm:$0xff]  ;;  %v36_v22 = vld [vmem:[%s1345_s0 + $0xb0] sm:$0xff]  ;;  %v37_v27 = vld [vmem:[%s1345_s0 + $0xb8] sm:$0xff] }
   0xa   :  { %v678_v40 = vpack.c.bf16 %v223_v28, %v223_v28  ;;  %v680_v46 = vpack.c.bf16 %v225_v33, %v225_v33  ;;  %v681_v47 = vpack.c.bf16 %v226_v34, %v226_v34  ;;  %v93_v48 = vmul.f32 %v765_v1, %v22_v30 }
   0xb   :  { %541 = vst.msk [vmem:[%s1348_s3] sm:$0xf] %vm540_vm0, %v675_v31  ;;  %v679_v45 = vpack.c.bf16 %v224_v32, %v224_v32  ;;  %542 = vst.msk [vmem:[%s1348_s3 + $0x4] sm:$0xf] %vm540_vm0, %v676_v38  ;;  %v682_v50 = vpack.c.bf16 %v227_v41, %v227_v41  ;;  %v94_v51 = vmul.f32 %v765_v1, %v23_v35 }
   0xc   :  { %543 = vst.msk [vmem:[%s1348_s3 + $0x8] sm:$0xf] %vm540_vm0, %v677_v39  ;;  %544 = vst.msk [vmem:[%s1348_s3 + $0xc] sm:$0xf] %vm540_vm0, %v678_v40  ;;  %v95_v52 = vmul.f32 %v765_v1, %v24_v36  ;;  %v96_v53 = vmul.f32 %v765_v1, %v25_v37  ;;  %v164_v54 = vadd.f32 %v770_v2, %v93_v48  ;;  %v38_v48 = vld [vmem:[%s1345_s0 + $0xc0] sm:$0xff] }
   0xd   :  { %545 = vst.msk [vmem:[%s1348_s3 + $0x10] sm:$0xf] %vm540_vm0, %v679_v45  ;;  %546 = vst.msk [vmem:[%s1348_s3 + $0x14] sm:$0xf] %vm540_vm0, %v680_v46  ;;  %v97_v55 = vmul.f32 %v765_v1, %v26_v42  ;;  %v98_v56 = vmul.f32 %v765_v1, %v27_v43  ;;  %v99_v57 = vmul.f32 %v765_v1, %v28_v44 }
   0xe   :  { %547 = vst.msk [vmem:[%s1348_s3 + $0x18] sm:$0xf] %vm540_vm0, %v681_v47  ;;  %548 = vst.msk [vmem:[%s1348_s3 + $0x1c] sm:$0xf] %vm540_vm0, %v682_v50  ;;  %v165_v58 = vadd.f32 %v770_v2, %v94_v51  ;;  %v166_v59 = vadd.f32 %v770_v2, %v95_v52  ;;  %v167_v60 = vadd.f32 %v770_v2, %v96_v53  ;;  %v228_v62 = vmax.f32 %v164_v54, 0.0  ;;  %v39_v53 = vld [vmem:[%s1345_s0 + $0xc8] sm:$0xff] }
   0xf   :  { %v100_v61 = vmul.f32 %v765_v1, %v29_v49  ;;  %v168_v63 = vadd.f32 %v770_v2, %v97_v55  ;;  %v169_v0 = vadd.f32 %v770_v2, %v98_v56  ;;  %v170_v3 = vadd.f32 %v770_v2, %v99_v57  ;;  %v40_v54 = vld [vmem:[%s1345_s0 + $0xd0] sm:$0xff]  ;;  %v41_v55 = vld [vmem:[%s1345_s0 + $0xd8] sm:$0xff] }
  0x10   :  { %v229_v4 = vmax.f32 %v165_v58, 0.0  ;;  %v230_v5 = vmax.f32 %v166_v59, 0.0  ;;  %v231_v6 = vmax.f32 %v167_v60, 0.0  ;;  %v683_v9 = vpack.c.bf16 %v228_v62, %v228_v62  ;;  %v42_v60 = vld [vmem:[%s1345_s0 + $0xe0] sm:$0xff]  ;;  %v44_v62 = vld [vmem:[%s1345_s0 + $0xf0] sm:$0xff] }
  0x11   :  { %v171_v7 = vadd.f32 %v770_v2, %v100_v61  ;;  %v232_v10 = vmax.f32 %v168_v63, 0.0  ;;  %v233_v11 = vmax.f32 %v169_v0, 0.0  ;;  %v234_v12 = vmax.f32 %v170_v3, 0.0  ;;  %v43_v61 = vld [vmem:[%s1345_s0 + $0xe8] sm:$0xff] }
  0x12   :  { %v684_v16 = vpack.c.bf16 %v229_v4, %v229_v4  ;;  %v685_v17 = vpack.c.bf16 %v230_v5, %v230_v5  ;;  %v686_v18 = vpack.c.bf16 %v231_v6, %v231_v6  ;;  %549 = vst.msk [vmem:[%s1348_s3 + $0x20] sm:$0xf] %vm540_vm0, %v683_v9  ;;  %v101_v26 = vmul.f32 %v765_v1, %v30_v8  ;;  %v45_v5 = vld [vmem:[%s1345_s0 + $0xf8] sm:$0xff] }
  0x13   :  { %v235_v19 = vmax.f32 %v171_v7, 0.0  ;;  %v687_v23 = vpack.c.bf16 %v232_v10, %v232_v10  ;;  %v688_v24 = vpack.c.bf16 %v233_v11, %v233_v11  ;;  %v689_v25 = vpack.c.bf16 %v234_v12, %v234_v12 }
  0x14   :  { %550 = vst.msk [vmem:[%s1348_s3 + $0x24] sm:$0xf] %vm540_vm0, %v684_v16  ;;  %551 = vst.msk [vmem:[%s1348_s3 + $0x28] sm:$0xf] %vm540_vm0, %v685_v17  ;;  %v102_v29 = vmul.f32 %v765_v1, %v31_v13  ;;  %v103_v30 = vmul.f32 %v765_v1, %v32_v14  ;;  %v104_v31 = vmul.f32 %v765_v1, %v33_v15 }
  0x15   :  { %552 = vst.msk [vmem:[%s1348_s3 + $0x2c] sm:$0xf] %vm540_vm0, %v686_v18  ;;  %v690_v28 = vpack.c.bf16 %v235_v19, %v235_v19  ;;  %553 = vst.msk [vmem:[%s1348_s3 + $0x30] sm:$0xf] %vm540_vm0, %v687_v23  ;;  %v172_v32 = vadd.f32 %v770_v2, %v101_v26  ;;  %v105_v33 = vmul.f32 %v765_v1, %v34_v20  ;;  %v46_v26 = vld [vmem:[%s1345_s0 + $0x100] sm:$0xff] }
  0x16   :  { %554 = vst.msk [vmem:[%s1348_s3 + $0x34] sm:$0xf] %vm540_vm0, %v688_v24  ;;  %555 = vst.msk [vmem:[%s1348_s3 + $0x38] sm:$0xf] %vm540_vm0, %v689_v25  ;;  %v106_v34 = vmul.f32 %v765_v1, %v35_v21  ;;  %v107_v35 = vmul.f32 %v765_v1, %v36_v22  ;;  %v173_v36 = vadd.f32 %v770_v2, %v102_v29 }
  0x17   :  { %556 = vst.msk [vmem:[%s1348_s3 + $0x3c] sm:$0xf] %vm540_vm0, %v690_v28  ;;  %v174_v37 = vadd.f32 %v770_v2, %v103_v30  ;;  %v175_v38 = vadd.f32 %v770_v2, %v104_v31  ;;  %v108_v39 = vmul.f32 %v765_v1, %v37_v27  ;;  %v236_v40 = vmax.f32 %v172_v32, 0.0  ;;  %v47_v31 = vld [vmem:[%s1345_s0 + $0x108] sm:$0xff]  ;;  %v48_v32 = vld [vmem:[%s1345_s0 + $0x110] sm:$0xff] }
  0x18   :  { %v176_v41 = vadd.f32 %v770_v2, %v105_v33  ;;  %v177_v42 = vadd.f32 %v770_v2, %v106_v34  ;;  %v178_v43 = vadd.f32 %v770_v2, %v107_v35  ;;  %v237_v44 = vmax.f32 %v173_v36, 0.0  ;;  %v49_v33 = vld [vmem:[%s1345_s0 + $0x118] sm:$0xff] }
  0x19   :  { %v238_v45 = vmax.f32 %v174_v37, 0.0  ;;  %v239_v46 = vmax.f32 %v175_v38, 0.0  ;;  %v179_v47 = vadd.f32 %v770_v2, %v108_v39  ;;  %v691_v49 = vpack.c.bf16 %v236_v40, %v236_v40  ;;  %v50_v38 = vld [vmem:[%s1345_s0 + $0x120] sm:$0xff]  ;;  %v51_v39 = vld [vmem:[%s1345_s0 + $0x128] sm:$0xff]  ;;  %v52_v40 = vld [vmem:[%s1345_s0 + $0x130] sm:$0xff] }
  0x1a   :  { %v240_v50 = vmax.f32 %v176_v41, 0.0  ;;  %v241_v51 = vmax.f32 %v177_v42, 0.0  ;;  %v242_v52 = vmax.f32 %v178_v43, 0.0  ;;  %v692_v56 = vpack.c.bf16 %v237_v44, %v237_v44 }
  0x1b   :  { %v693_v57 = vpack.c.bf16 %v238_v45, %v238_v45  ;;  %v694_v58 = vpack.c.bf16 %v239_v46, %v239_v46  ;;  %v243_v59 = vmax.f32 %v179_v47, 0.0  ;;  %557 = vst.msk [vmem:[%s1348_s3 + $0x40] sm:$0xf] %vm540_vm0, %v691_v49  ;;  %v109_v4 = vmul.f32 %v765_v1, %v38_v48  ;;  %v53_v45 = vld [vmem:[%s1345_s0 + $0x138] sm:$0xff] }
  0x1c   :  { %v695_v63 = vpack.c.bf16 %v240_v50, %v240_v50  ;;  %v696_v0 = vpack.c.bf16 %v241_v51, %v241_v51  ;;  %v697_v3 = vpack.c.bf16 %v242_v52, %v242_v52  ;;  %558 = vst.msk [vmem:[%s1348_s3 + $0x44] sm:$0xf] %vm540_vm0, %v692_v56  ;;  %v110_v7 = vmul.f32 %v765_v1, %v39_v53 }
  0x1d   :  { %559 = vst.msk [vmem:[%s1348_s3 + $0x48] sm:$0xf] %vm540_vm0, %v693_v57  ;;  %560 = vst.msk [vmem:[%s1348_s3 + $0x4c] sm:$0xf] %vm540_vm0, %v694_v58  ;;  %v698_v6 = vpack.c.bf16 %v243_v59, %v243_v59  ;;  %v111_v8 = vmul.f32 %v765_v1, %v40_v54  ;;  %v112_v9 = vmul.f32 %v765_v1, %v41_v55 }
  0x1e   :  { %561 = vst.msk [vmem:[%s1348_s3 + $0x50] sm:$0xf] %vm540_vm0, %v695_v63  ;;  %562 = vst.msk [vmem:[%s1348_s3 + $0x54] sm:$0xf] %vm540_vm0, %v696_v0  ;;  %v180_v10 = vadd.f32 %v770_v2, %v109_v4  ;;  %v113_v11 = vmul.f32 %v765_v1, %v42_v60  ;;  %v114_v12 = vmul.f32 %v765_v1, %v43_v61  ;;  %v54_v4 = vld [vmem:[%s1345_s0 + $0x140] sm:$0xff] }
  0x1f   :  { %563 = vst.msk [vmem:[%s1348_s3 + $0x58] sm:$0xf] %vm540_vm0, %v697_v3  ;;  %v115_v13 = vmul.f32 %v765_v1, %v44_v62  ;;  %564 = vst.msk [vmem:[%s1348_s3 + $0x5c] sm:$0xf] %vm540_vm0, %v698_v6  ;;  %v181_v14 = vadd.f32 %v770_v2, %v110_v7  ;;  %v182_v15 = vadd.f32 %v770_v2, %v111_v8 }
  0x20   :  { %v183_v16 = vadd.f32 %v770_v2, %v112_v9  ;;  %v116_v17 = vmul.f32 %v765_v1, %v45_v5  ;;  %v244_v18 = vmax.f32 %v180_v10, 0.0  ;;  %v184_v19 = vadd.f32 %v770_v2, %v113_v11  ;;  %v55_v9 = vld [vmem:[%s1345_s0 + $0x148] sm:$0xff]  ;;  %v56_v10 = vld [vmem:[%s1345_s0 + $0x150] sm:$0xff]  ;;  %v57_v11 = vld [vmem:[%s1345_s0 + $0x158] sm:$0xff] }
  0x21   :  { %v185_v20 = vadd.f32 %v770_v2, %v114_v12  ;;  %v186_v21 = vadd.f32 %v770_v2, %v115_v13  ;;  %v245_v22 = vmax.f32 %v181_v14, 0.0  ;;  %v246_v23 = vmax.f32 %v182_v15, 0.0 }
  0x22   :  { %v247_v24 = vmax.f32 %v183_v16, 0.0  ;;  %v187_v25 = vadd.f32 %v770_v2, %v116_v17  ;;  %v699_v27 = vpack.c.bf16 %v244_v18, %v244_v18  ;;  %v248_v28 = vmax.f32 %v184_v19, 0.0  ;;  %v58_v16 = vld [vmem:[%s1345_s0 + $0x160] sm:$0xff]  ;;  %v59_v17 = vld [vmem:[%s1345_s0 + $0x168] sm:$0xff]  ;;  %v60_v18 = vld [vmem:[%s1345_s0 + $0x170] sm:$0xff] }
  0x23   :  { %v249_v29 = vmax.f32 %v185_v20, 0.0  ;;  %v250_v30 = vmax.f32 %v186_v21, 0.0  ;;  %v700_v34 = vpack.c.bf16 %v245_v22, %v245_v22  ;;  %v701_v35 = vpack.c.bf16 %v246_v23, %v246_v23  ;;  %v61_v23 = vld [vmem:[%s1345_s0 + $0x178] sm:$0xff] }
  0x24   :  { %v702_v36 = vpack.c.bf16 %v247_v24, %v247_v24  ;;  %v251_v37 = vmax.f32 %v187_v25, 0.0  ;;  %565 = vst.msk [vmem:[%s1348_s3 + $0x60] sm:$0xf] %vm540_vm0, %v699_v27  ;;  %v703_v41 = vpack.c.bf16 %v248_v28, %v248_v28  ;;  %v117_v44 = vmul.f32 %v765_v1, %v46_v26 }
  0x25   :  { %v704_v42 = vpack.c.bf16 %v249_v29, %v249_v29  ;;  %v705_v43 = vpack.c.bf16 %v250_v30, %v250_v30  ;;  %566 = vst.msk [vmem:[%s1348_s3 + $0x64] sm:$0xf] %vm540_vm0, %v700_v34  ;;  %567 = vst.msk [vmem:[%s1348_s3 + $0x68] sm:$0xf] %vm540_vm0, %v701_v35  ;;  %v118_v47 = vmul.f32 %v765_v1, %v47_v31 }
  0x26   :  { %568 = vst.msk [vmem:[%s1348_s3 + $0x6c] sm:$0xf] %vm540_vm0, %v702_v36  ;;  %v706_v46 = vpack.c.bf16 %v251_v37, %v251_v37  ;;  %v119_v48 = vmul.f32 %v765_v1, %v48_v32  ;;  %v120_v49 = vmul.f32 %v765_v1, %v49_v33  ;;  %569 = vst.msk [vmem:[%s1348_s3 + $0x70] sm:$0xf] %vm540_vm0, %v703_v41 }
  0x27   :  { %570 = vst.msk [vmem:[%s1348_s3 + $0x74] sm:$0xf] %vm540_vm0, %v704_v42  ;;  %571 = vst.msk [vmem:[%s1348_s3 + $0x78] sm:$0xf] %vm540_vm0, %v705_v43  ;;  %v188_v50 = vadd.f32 %v770_v2, %v117_v44  ;;  %v121_v51 = vmul.f32 %v765_v1, %v50_v38  ;;  %v122_v52 = vmul.f32 %v765_v1, %v51_v39  ;;  %v62_v44 = vld [vmem:[%s1345_s0 + $0x180] sm:$0xff] }
  0x28   :  { %v123_v53 = vmul.f32 %v765_v1, %v52_v40  ;;  %572 = vst.msk [vmem:[%s1348_s3 + $0x7c] sm:$0xf] %vm540_vm0, %v706_v46  ;;  %v189_v54 = vadd.f32 %v770_v2, %v118_v47  ;;  %v190_v55 = vadd.f32 %v770_v2, %v119_v48  ;;  %v191_v56 = vadd.f32 %v770_v2, %v120_v49  ;;  %v63_v49 = vld [vmem:[%s1345_s0 + $0x188] sm:$0xff] }
  0x29   :  { %v124_v57 = vmul.f32 %v765_v1, %v53_v45  ;;  %v252_v58 = vmax.f32 %v188_v50, 0.0  ;;  %v192_v59 = vadd.f32 %v770_v2, %v121_v51  ;;  %v193_v60 = vadd.f32 %v770_v2, %v122_v52  ;;  %v64_v50 = vld [vmem:[%s1345_s0 + $0x190] sm:$0xff]  ;;  %v65_v51 = vld [vmem:[%s1345_s0 + $0x198] sm:$0xff] }
  0x2a   :  { %v194_v61 = vadd.f32 %v770_v2, %v123_v53  ;;  %v253_v62 = vmax.f32 %v189_v54, 0.0  ;;  %v254_v63 = vmax.f32 %v190_v55, 0.0  ;;  %v255_v0 = vmax.f32 %v191_v56, 0.0  ;;  %v66_v56 = vld [vmem:[%s1345_s0 + $0x1a0] sm:$0xff] }
  0x2b   :  { %v195_v3 = vadd.f32 %v770_v2, %v124_v57  ;;  %v707_v5 = vpack.c.bf16 %v252_v58, %v252_v58  ;;  %v256_v6 = vmax.f32 %v192_v59, 0.0  ;;  %v257_v7 = vmax.f32 %v193_v60, 0.0  ;;  %v67_v57 = vld [vmem:[%s1345_s0 + $0x1a8] sm:$0xff]  ;;  %v68_v58 = vld [vmem:[%s1345_s0 + $0x1b0] sm:$0xff] }
  0x2c   :  { %v258_v8 = vmax.f32 %v194_v61, 0.0  ;;  %v708_v12 = vpack.c.bf16 %v253_v62, %v253_v62  ;;  %v709_v13 = vpack.c.bf16 %v254_v63, %v254_v63  ;;  %v710_v14 = vpack.c.bf16 %v255_v0, %v255_v0  ;;  %v69_v63 = vld [vmem:[%s1345_s0 + $0x1b8] sm:$0xff] }
  0x2d   :  { %v259_v15 = vmax.f32 %v195_v3, 0.0  ;;  %573 = vst.msk [vmem:[%s1348_s3 + $0x80] sm:$0xf] %vm540_vm0, %v707_v5  ;;  %v711_v19 = vpack.c.bf16 %v256_v6, %v256_v6  ;;  %v712_v20 = vpack.c.bf16 %v257_v7, %v257_v7  ;;  %v125_v22 = vmul.f32 %v765_v1, %v54_v4 }
  0x2e   :  { %v713_v21 = vpack.c.bf16 %v258_v8, %v258_v8  ;;  %574 = vst.msk [vmem:[%s1348_s3 + $0x84] sm:$0xf] %vm540_vm0, %v708_v12  ;;  %575 = vst.msk [vmem:[%s1348_s3 + $0x88] sm:$0xf] %vm540_vm0, %v709_v13  ;;  %v126_v25 = vmul.f32 %v765_v1, %v55_v9  ;;  %v127_v26 = vmul.f32 %v765_v1, %v56_v10 }
  0x2f   :  { %576 = vst.msk [vmem:[%s1348_s3 + $0x8c] sm:$0xf] %vm540_vm0, %v710_v14  ;;  %v714_v24 = vpack.c.bf16 %v259_v15, %v259_v15  ;;  %v128_v27 = vmul.f32 %v765_v1, %v57_v11  ;;  %577 = vst.msk [vmem:[%s1348_s3 + $0x90] sm:$0xf] %vm540_vm0, %v711_v19  ;;  %v196_v28 = vadd.f32 %v770_v2, %v125_v22  ;;  %v70_v22 = vld [vmem:[%s1345_s0 + $0x1c0] sm:$0xff] }
  0x30   :  { %578 = vst.msk [vmem:[%s1348_s3 + $0x94] sm:$0xf] %vm540_vm0, %v712_v20  ;;  %579 = vst.msk [vmem:[%s1348_s3 + $0x98] sm:$0xf] %vm540_vm0, %v713_v21  ;;  %v129_v29 = vmul.f32 %v765_v1, %v58_v16  ;;  %v130_v30 = vmul.f32 %v765_v1, %v59_v17  ;;  %v131_v31 = vmul.f32 %v765_v1, %v60_v18 }
  0x31   :  { %580 = vst.msk [vmem:[%s1348_s3 + $0x9c] sm:$0xf] %vm540_vm0, %v714_v24  ;;  %v197_v32 = vadd.f32 %v770_v2, %v126_v25  ;;  %v198_v33 = vadd.f32 %v770_v2, %v127_v26  ;;  %v199_v34 = vadd.f32 %v770_v2, %v128_v27  ;;  %v132_v35 = vmul.f32 %v765_v1, %v61_v23  ;;  %v71_v27 = vld [vmem:[%s1345_s0 + $0x1c8] sm:$0xff] }
  0x32   :  { %v260_v36 = vmax.f32 %v196_v28, 0.0  ;;  %v200_v37 = vadd.f32 %v770_v2, %v129_v29  ;;  %v201_v38 = vadd.f32 %v770_v2, %v130_v30  ;;  %v202_v39 = vadd.f32 %v770_v2, %v131_v31  ;;  %v72_v28 = vld [vmem:[%s1345_s0 + $0x1d0] sm:$0xff]  ;;  %v73_v29 = vld [vmem:[%s1345_s0 + $0x1d8] sm:$0xff] }
  0x33   :  { %v261_v40 = vmax.f32 %v197_v32, 0.0  ;;  %v262_v41 = vmax.f32 %v198_v33, 0.0  ;;  %v263_v42 = vmax.f32 %v199_v34, 0.0  ;;  %v203_v43 = vadd.f32 %v770_v2, %v132_v35  ;;  %v74_v34 = vld [vmem:[%s1345_s0 + $0x1e0] sm:$0xff]  ;;  %v75_v35 = vld [vmem:[%s1345_s0 + $0x1e8] sm:$0xff] }
  0x34   :  { %v715_v45 = vpack.c.bf16 %v260_v36, %v260_v36  ;;  %v264_v46 = vmax.f32 %v200_v37, 0.0  ;;  %v265_v47 = vmax.f32 %v201_v38, 0.0  ;;  %v266_v48 = vmax.f32 %v202_v39, 0.0  ;;  %v76_v36 = vld [vmem:[%s1345_s0 + $0x1f0] sm:$0xff] }
  0x35   :  { %v716_v52 = vpack.c.bf16 %v261_v40, %v261_v40  ;;  %v717_v53 = vpack.c.bf16 %v262_v41, %v262_v41  ;;  %v718_v54 = vpack.c.bf16 %v263_v42, %v263_v42  ;;  %v267_v55 = vmax.f32 %v203_v43, 0.0  ;;  %v77_v41 = vld [vmem:[%s1345_s0 + $0x1f8] sm:$0xff] }
  0x36   :  { %581 = vst.msk [vmem:[%s1348_s3 + $0xa0] sm:$0xf] %vm540_vm0, %v715_v45  ;;  %v719_v59 = vpack.c.bf16 %v264_v46, %v264_v46  ;;  %v720_v60 = vpack.c.bf16 %v265_v47, %v265_v47  ;;  %v721_v61 = vpack.c.bf16 %v266_v48, %v266_v48  ;;  %v133_v62 = vmul.f32 %v765_v1, %v62_v44 }
  0x37   :  { %582 = vst.msk [vmem:[%s1348_s3 + $0xa4] sm:$0xf] %vm540_vm0, %v716_v52  ;;  %583 = vst.msk [vmem:[%s1348_s3 + $0xa8] sm:$0xf] %vm540_vm0, %v717_v53  ;;  %v722_v0 = vpack.c.bf16 %v267_v55, %v267_v55  ;;  %v134_v3 = vmul.f32 %v765_v1, %v63_v49  ;;  %v135_v4 = vmul.f32 %v765_v1, %v64_v50 }
  0x38   :  { %584 = vst.msk [vmem:[%s1348_s3 + $0xac] sm:$0xf] %vm540_vm0, %v718_v54  ;;  %v136_v5 = vmul.f32 %v765_v1, %v65_v51  ;;  %585 = vst.msk [vmem:[%s1348_s3 + $0xb0] sm:$0xf] %vm540_vm0, %v719_v59  ;;  %v204_v6 = vadd.f32 %v770_v2, %v133_v62  ;;  %v137_v7 = vmul.f32 %v765_v1, %v66_v56 }
  0x39   :  { %586 = vst.msk [vmem:[%s1348_s3 + $0xb4] sm:$0xf] %vm540_vm0, %v720_v60  ;;  %587 = vst.msk [vmem:[%s1348_s3 + $0xb8] sm:$0xf] %vm540_vm0, %v721_v61  ;;  %v138_v8 = vmul.f32 %v765_v1, %v67_v57  ;;  %v139_v9 = vmul.f32 %v765_v1, %v68_v58  ;;  %v205_v10 = vadd.f32 %v770_v2, %v134_v3 }
  0x3a   :  { %588 = vst.msk [vmem:[%s1348_s3 + $0xbc] sm:$0xf] %vm540_vm0, %v722_v0  ;;  %v206_v11 = vadd.f32 %v770_v2, %v135_v4  ;;  %v207_v12 = vadd.f32 %v770_v2, %v136_v5  ;;  %v140_v13 = vmul.f32 %v765_v1, %v69_v63  ;;  %v268_v14 = vmax.f32 %v204_v6, 0.0 }
  0x3b   :  { %v208_v15 = vadd.f32 %v770_v2, %v137_v7  ;;  %v209_v16 = vadd.f32 %v770_v2, %v138_v8  ;;  %v210_v17 = vadd.f32 %v770_v2, %v139_v9  ;;  %v269_v18 = vmax.f32 %v205_v10, 0.0 }
  0x3c   :  { %v270_v19 = vmax.f32 %v206_v11, 0.0  ;;  %v271_v20 = vmax.f32 %v207_v12, 0.0  ;;  %v211_v21 = vadd.f32 %v770_v2, %v140_v13  ;;  %v723_v23 = vpack.c.bf16 %v268_v14, %v268_v14 }
  0x3d   :  { %v272_v24 = vmax.f32 %v208_v15, 0.0  ;;  %v273_v25 = vmax.f32 %v209_v16, 0.0  ;;  %v274_v26 = vmax.f32 %v210_v17, 0.0  ;;  %v724_v30 = vpack.c.bf16 %v269_v18, %v269_v18 }
  0x3e   :  { %v725_v31 = vpack.c.bf16 %v270_v19, %v270_v19  ;;  %v726_v32 = vpack.c.bf16 %v271_v20, %v271_v20  ;;  %v275_v33 = vmax.f32 %v211_v21, 0.0  ;;  %589 = vst.msk [vmem:[%s1348_s3 + $0xc0] sm:$0xf] %vm540_vm0, %v723_v23  ;;  %v141_v40 = vmul.f32 %v765_v1, %v70_v22 }
  0x3f   :  { %v727_v37 = vpack.c.bf16 %v272_v24, %v272_v24  ;;  %v728_v38 = vpack.c.bf16 %v273_v25, %v273_v25  ;;  %v729_v39 = vpack.c.bf16 %v274_v26, %v274_v26  ;;  %590 = vst.msk [vmem:[%s1348_s3 + $0xc4] sm:$0xf] %vm540_vm0, %v724_v30  ;;  %v142_v43 = vmul.f32 %v765_v1, %v71_v27 }
  0x40   :  { %591 = vst.msk [vmem:[%s1348_s3 + $0xc8] sm:$0xf] %vm540_vm0, %v725_v31  ;;  %592 = vst.msk [vmem:[%s1348_s3 + $0xcc] sm:$0xf] %vm540_vm0, %v726_v32  ;;  %v730_v42 = vpack.c.bf16 %v275_v33, %v275_v33  ;;  %v143_v44 = vmul.f32 %v765_v1, %v72_v28  ;;  %v144_v45 = vmul.f32 %v765_v1, %v73_v29 }
  0x41   :  { %593 = vst.msk [vmem:[%s1348_s3 + $0xd0] sm:$0xf] %vm540_vm0, %v727_v37  ;;  %594 = vst.msk [vmem:[%s1348_s3 + $0xd4] sm:$0xf] %vm540_vm0, %v728_v38  ;;  %v212_v46 = vadd.f32 %v770_v2, %v141_v40  ;;  %v145_v47 = vmul.f32 %v765_v1, %v74_v34  ;;  %v146_v48 = vmul.f32 %v765_v1, %v75_v35 }
  0x42   :  { %595 = vst.msk [vmem:[%s1348_s3 + $0xd8] sm:$0xf] %vm540_vm0, %v729_v39  ;;  %v147_v49 = vmul.f32 %v765_v1, %v76_v36  ;;  %596 = vst.msk [vmem:[%s1348_s3 + $0xdc] sm:$0xf] %vm540_vm0, %v730_v42  ;;  %v213_v50 = vadd.f32 %v770_v2, %v142_v43  ;;  %v214_v51 = vadd.f32 %v770_v2, %v143_v44 }
  0x43   :  { %v215_v52 = vadd.f32 %v770_v2, %v144_v45  ;;  %v148_v53 = vmul.f32 %v765_v1, %v77_v41  ;;  %v276_v54 = vmax.f32 %v212_v46, 0.0  ;;  %v216_v55 = vadd.f32 %v770_v2, %v145_v47 }
  0x44   :  { %v217_v56 = vadd.f32 %v770_v2, %v146_v48  ;;  %v218_v57 = vadd.f32 %v770_v2, %v147_v49  ;;  %v277_v58 = vmax.f32 %v213_v50, 0.0  ;;  %v278_v59 = vmax.f32 %v214_v51, 0.0 }
  0x45   :  { %v279_v60 = vmax.f32 %v215_v52, 0.0  ;;  %v219_v61 = vadd.f32 %v770_v2, %v148_v53  ;;  %v731_v62 = vpack.c.bf16 %v276_v54, %v276_v54  ;;  %v280_v63 = vmax.f32 %v216_v55, 0.0 }
  0x46   :  { %v281_v0 = vmax.f32 %v217_v56, 0.0  ;;  %v282_v3 = vmax.f32 %v218_v57, 0.0  ;;  %v732_v4 = vpack.c.bf16 %v277_v58, %v277_v58  ;;  %v733_v5 = vpack.c.bf16 %v278_v59, %v278_v59 }
  0x47   :  { %v734_v6 = vpack.c.bf16 %v279_v60, %v279_v60  ;;  %v283_v1 = vmax.f32 %v219_v61, 0.0  ;;  %597 = vst.msk [vmem:[%s1348_s3 + $0xe0] sm:$0xf] %vm540_vm0, %v731_v62  ;;  %v735_v7 = vpack.c.bf16 %v280_v63, %v280_v63 }
  0x48   :  { %v736_v8 = vpack.c.bf16 %v281_v0, %v281_v0  ;;  %v737_v9 = vpack.c.bf16 %v282_v3, %v282_v3  ;;  %598 = vst.msk [vmem:[%s1348_s3 + $0xe4] sm:$0xf] %vm540_vm0, %v732_v4  ;;  %599 = vst.msk [vmem:[%s1348_s3 + $0xe8] sm:$0xf] %vm540_vm0, %v733_v5 }
  0x49   :  { %600 = vst.msk [vmem:[%s1348_s3 + $0xec] sm:$0xf] %vm540_vm0, %v734_v6  ;;  %v738_v2 = vpack.c.bf16 %v283_v1, %v283_v1  ;;  %601 = vst.msk [vmem:[%s1348_s3 + $0xf0] sm:$0xf] %vm540_vm0, %v735_v7 }
  0x4a   :  { %602 = vst.msk [vmem:[%s1348_s3 + $0xf4] sm:$0xf] %vm540_vm0, %v736_v8  ;;  %603 = vst.msk [vmem:[%s1348_s3 + $0xf8] sm:$0xf] %vm540_vm0, %v737_v9 }
  0x4b   :  { %604 = vst.msk [vmem:[%s1348_s3 + $0xfc] sm:$0xf] %vm540_vm0, %v738_v2 }

// kernel: generator_forward.23
= control target key start
LH: loop header
LB: loop body
LE: loop exit
PB: predicated region body
PF: predicated region fallthrough
CT: control target
= control target key end

     0   :  { %s614_s9 = smov 0   ;;  %s1132_s0 = inlined_call_operand.vmem [shape: f32[2048,8], index: 0, kind: input, shape index: {}]   ;;  %s1133_s1 = inlined_call_operand.vmem [shape: f32[1,8], index: 1, kind: output, shape index: {0}]   ;;  %s1134_s2 = inlined_call_operand.vmem [shape: f32[1,8], index: 2, kind: output, shape index: {1}]  }
   0x1 LB: > { %s572_s10 = sadd.s32 4294967295, %s596_s9   ;;  %p575_p0 = scmp.ge.s32.totalorder %s596_s9, 1  ;;  %s596_s9 = sphi %s614_s9, %s13_s9  }
   0x2   : > { %p106_p1 = scmp.lt.s32.totalorder %s596_s9, 5 }
   0x4   : > { %p107_p2 = pnand %p575_p0, %p106_p1 }
   0x5   : > { %s576_s11 = sshll.u32 (!%p107_p2), %s572_s10, 6  ;;  %p578_p4 = scmp.ne.s32.totalorder (!%p107_p2), %s572_s10, 0 }
   0x6   : > { %110 = sbr.rel (%p107_p2) target bundleno = 182 (0xb6), region = 24  ;;  %p124_p3 = scmp.lt.s32.totalorder (!%p107_p2), %s576_s11, 255 }
   0xb   : > { %s1136_s11 = smov (!%p124_p3, %s576_s11), 255  ;;  %132 = sbr.rel (%p578_p4) target bundleno = 18 (0x12), region = 28 }
   0xc   : > { %s577_s12 = sshll.u32 %s1136_s11, 3 }
   0xd   : > { %s625_s15 = scalar_lea.vmem %s1132_s0, %s577_s12 }
  0x10   : > { %vm133_vm0 = vcmask 57344   ;;  %v598_v0 = vmov 0.0  }
  0x11   : > { %134 = vst.msk [vmem:[%s1133_s1] sm:$0x1] %vm133_vm0, %v598_v0  ;;  %135 = vst.msk [vmem:[%s1134_s2] sm:$0x1] %vm133_vm0, %v598_v0 }
  0x12 PF: > { %v136_v1 = vld [vmem:[%s625_s15] sm:$0xff]  ;;  %v137_v2 = vld [vmem:[%s625_s15 + $0x8] sm:$0xff]  ;;  %v138_v3 = vld [vmem:[%s625_s15 + $0x10] sm:$0xff]  ;;  %vm201_vm1 = vcmask 64512   ;;  %vm336_vm2 = vcmask 57344  }
  0x13   : > { %v202_v4 = vsel %vm201_vm1, %v136_v1, 0.0  ;;  %v203_v5 = vsel %vm201_vm1, %v137_v2, 0.0  ;;  %v205_v6 = vsel %vm201_vm1, %v138_v3, 0.0  ;;  %v139_v7 = vld [vmem:[%s625_s15 + $0x18] sm:$0xff]  ;;  %v140_v10 = vld [vmem:[%s625_s15 + $0x20] sm:$0xff]  ;;  %v141_v13 = vld [vmem:[%s625_s15 + $0x28] sm:$0xff]  ;;  %v339_v55 = vmul.f32 %v136_v1, %v136_v1 }
  0x14   : > { %v204_v8 = vadd.f32 %v203_v5, %v202_v4  ;;  %v207_v9 = vsel %vm201_vm1, %v139_v7, 0.0  ;;  %v209_v12 = vsel %vm201_vm1, %v140_v10, 0.0  ;;  %v211_v15 = vsel %vm201_vm1, %v141_v13, 0.0  ;;  %v646_v16 = vld [vmem:[%s625_s15 + $0x30] sm:$0xff]  ;;  %v651_v19 = vld [vmem:[%s625_s15 + $0x38] sm:$0xff]  ;;  %v656_v22 = vld [vmem:[%s625_s15 + $0x40] sm:$0xff] }
  0x15   : > { %v213_v18 = vsel %vm201_vm1, %v646_v16, 0.0  ;;  %v215_v21 = vsel %vm201_vm1, %v651_v19, 0.0  ;;  %v217_v24 = vsel %vm201_vm1, %v656_v22, 0.0  ;;  %v661_v25 = vld [vmem:[%s625_s15 + $0x48] sm:$0xff]  ;;  %v666_v28 = vld [vmem:[%s625_s15 + $0x50] sm:$0xff]  ;;  %v671_v31 = vld [vmem:[%s625_s15 + $0x58] sm:$0xff]  ;;  %v340_v58 = vmul.f32 %v137_v2, %v137_v2 }
  0x16   : > { %v206_v11 = vadd.f32 %v205_v6, %v204_v8  ;;  %v219_v27 = vsel %vm201_vm1, %v661_v25, 0.0  ;;  %v221_v30 = vsel %vm201_vm1, %v666_v28, 0.0  ;;  %v223_v33 = vsel %vm201_vm1, %v671_v31, 0.0  ;;  %v676_v34 = vld [vmem:[%s625_s15 + $0x60] sm:$0xff]  ;;  %v681_v37 = vld [vmem:[%s625_s15 + $0x68] sm:$0xff]  ;;  %v686_v40 = vld [vmem:[%s625_s15 + $0x70] sm:$0xff] }
  0x17   : > { %v225_v36 = vsel %vm201_vm1, %v676_v34, 0.0  ;;  %v227_v39 = vsel %vm201_vm1, %v681_v37, 0.0  ;;  %v229_v42 = vsel %vm201_vm1, %v686_v40, 0.0  ;;  %v691_v43 = vld [vmem:[%s625_s15 + $0x78] sm:$0xff]  ;;  %v696_v46 = vld [vmem:[%s625_s15 + $0x80] sm:$0xff]  ;;  %v701_v49 = vld [vmem:[%s625_s15 + $0x88] sm:$0xff]  ;;  %v341_v59 = vmul.f32 %v138_v3, %v138_v3 }
  0x18   : > { %v208_v14 = vadd.f32 %v207_v9, %v206_v11  ;;  %v231_v45 = vsel %vm201_vm1, %v691_v43, 0.0  ;;  %v233_v48 = vsel %vm201_vm1, %v696_v46, 0.0  ;;  %v235_v51 = vsel %vm201_vm1, %v701_v49, 0.0  ;;  %v706_v52 = vld [vmem:[%s625_s15 + $0x90] sm:$0xff]  ;;  %v711_v56 = vld [vmem:[%s625_s15 + $0x98] sm:$0xff]  ;;  %v716_v61 = vld [vmem:[%s625_s15 + $0xa0] sm:$0xff] }
  0x19   : > { %v237_v54 = vsel %vm201_vm1, %v706_v52, 0.0  ;;  %v239_v60 = vsel %vm201_vm1, %v711_v56, 0.0  ;;  %v342_v63 = vmul.f32 %v139_v7, %v139_v7  ;;  %v241_v0 = vsel %vm201_vm1, %v716_v61, 0.0  ;;  %v722_v1 = vld [vmem:[%s625_s15 + $0xa8] sm:$0xff]  ;;  %v729_v7 = vld [vmem:[%s625_s15 + $0xb0] sm:$0xff] }
  0x1a   : > { %v210_v17 = vadd.f32 %v209_v12, %v208_v14  ;;  %v403_v4 = vsel %vm201_vm1, %v339_v55, 0.0  ;;  %v343_v6 = vmul.f32 %v140_v10, %v140_v10  ;;  %v404_v2 = vsel %vm201_vm1, %v340_v58, 0.0 }
  0x1b   : > { %v406_v3 = vsel %vm201_vm1, %v341_v59, 0.0  ;;  %v243_v8 = vsel %vm201_vm1, %v722_v1, 0.0  ;;  %v405_v9 = vadd.f32 %v404_v2, %v403_v4  ;;  %v344_v12 = vmul.f32 %v141_v13, %v141_v13 }
  0x1c   : > { %v212_v20 = vadd.f32 %v211_v15, %v210_v17  ;;  %v408_v14 = vsel %vm201_vm1, %v342_v63, 0.0  ;;  %v245_v15 = vsel %vm201_vm1, %v729_v7, 0.0  ;;  %v735_v17 = vld [vmem:[%s625_s15 + $0xb8] sm:$0xff]  ;;  %v351_v63 = vmul.f32 %v676_v34, %v676_v34 }
  0x1d   : > { %v407_v10 = vadd.f32 %v406_v3, %v405_v9  ;;  %v352_v2 = vmul.f32 %v681_v37, %v681_v37  ;;  %v799_v9 = vld [vmem:[%s625_s15 + $0xf8] sm:$0xff] }
  0x1e   : > { %v214_v23 = vadd.f32 %v213_v18, %v212_v20  ;;  %v345_v20 = vmul.f32 %v646_v16, %v646_v16 }
  0x1f   : > { %v409_v13 = vadd.f32 %v408_v14, %v407_v10  ;;  %v426_v14 = vsel %vm201_vm1, %v351_v63, 0.0  ;;  %v807_v10 = vld [vmem:[%s625_s15 + $0x100] sm:$0xff]  ;;  %v360_v63 = vmul.f32 %v722_v1, %v722_v1 }
  0x20   : > { %v216_v26 = vadd.f32 %v215_v21, %v214_v23  ;;  %v410_v21 = vsel %vm201_vm1, %v343_v6, 0.0  ;;  %v247_v23 = vsel %vm201_vm1, %v735_v17, 0.0 }
  0x21   : > { %v411_v16 = vadd.f32 %v410_v21, %v409_v13  ;;  %v428_v21 = vsel %vm201_vm1, %v352_v2, 0.0  ;;  %v815_v13 = vld [vmem:[%s625_s15 + $0x108] sm:$0xff]  ;;  %v361_v2 = vmul.f32 %v729_v7, %v729_v7 }
  0x22   : > { %v218_v29 = vadd.f32 %v217_v24, %v216_v26  ;;  %v743_v24 = vld [vmem:[%s625_s15 + $0xc0] sm:$0xff] }
  0x24   : > { %v220_v32 = vadd.f32 %v219_v27, %v218_v29  ;;  %v346_v27 = vmul.f32 %v651_v19, %v651_v19  ;;  %v412_v29 = vsel %vm201_vm1, %v344_v12, 0.0  ;;  %v353_v12 = vmul.f32 %v686_v40, %v686_v40 }
  0x25   : > { %v413_v19 = vadd.f32 %v412_v29, %v411_v16  ;;  %v823_v16 = vld [vmem:[%s625_s15 + $0x110] sm:$0xff] }
  0x26   : > { %v222_v35 = vadd.f32 %v221_v30, %v220_v32  ;;  %v249_v30 = vsel %vm201_vm1, %v743_v24, 0.0  ;;  %v751_v32 = vld [vmem:[%s625_s15 + $0xc8] sm:$0xff]  ;;  %v430_v29 = vsel %vm201_vm1, %v353_v12, 0.0  ;;  %v362_v12 = vmul.f32 %v735_v17, %v735_v17 }
  0x28   : > { %v224_v38 = vadd.f32 %v223_v33, %v222_v35  ;;  %v347_v35 = vmul.f32 %v656_v22, %v656_v22 }
  0x2a   : > { %v226_v41 = vadd.f32 %v225_v36, %v224_v38  ;;  %v414_v36 = vsel %vm201_vm1, %v345_v20, 0.0  ;;  %v251_v38 = vsel %vm201_vm1, %v751_v32, 0.0  ;;  %v354_v20 = vmul.f32 %v691_v43, %v691_v43 }
  0x2b   : > { %v415_v22 = vadd.f32 %v414_v36, %v413_v19  ;;  %v831_v19 = vld [vmem:[%s625_s15 + $0x118] sm:$0xff] }
  0x2c   : > { %v228_v44 = vadd.f32 %v227_v39, %v226_v41  ;;  %v759_v39 = vld [vmem:[%s625_s15 + $0xd0] sm:$0xff]  ;;  %v432_v36 = vsel %vm201_vm1, %v354_v20, 0.0  ;;  %v363_v20 = vmul.f32 %v743_v24, %v743_v24 }
  0x2e   : > { %v230_v47 = vadd.f32 %v229_v42, %v228_v44  ;;  %v348_v42 = vmul.f32 %v661_v25, %v661_v25  ;;  %v416_v44 = vsel %vm201_vm1, %v346_v27, 0.0  ;;  %v355_v27 = vmul.f32 %v696_v46, %v696_v46 }
  0x2f   : > { %v417_v25 = vadd.f32 %v416_v44, %v415_v22  ;;  %v839_v22 = vld [vmem:[%s625_s15 + $0x120] sm:$0xff] }
  0x30   : > { %v232_v50 = vadd.f32 %v231_v45, %v230_v47  ;;  %v253_v45 = vsel %vm201_vm1, %v759_v39, 0.0  ;;  %v767_v47 = vld [vmem:[%s625_s15 + $0xd8] sm:$0xff]  ;;  %v420_v58 = vsel %vm201_vm1, %v348_v42, 0.0  ;;  %v357_v42 = vmul.f32 %v706_v52, %v706_v52 }
  0x31   : > { %v434_v44 = vsel %vm201_vm1, %v355_v27, 0.0  ;;  %v364_v27 = vmul.f32 %v751_v32, %v751_v32 }
  0x32   : > { %v234_v53 = vadd.f32 %v233_v48, %v232_v50  ;;  %v349_v50 = vmul.f32 %v666_v28, %v666_v28 }
  0x34   : > { %v236_v57 = vadd.f32 %v235_v51, %v234_v53  ;;  %v418_v51 = vsel %vm201_vm1, %v347_v35, 0.0  ;;  %v255_v53 = vsel %vm201_vm1, %v767_v47, 0.0  ;;  %v356_v35 = vmul.f32 %v701_v49, %v701_v49 }
  0x35   : > { %v419_v28 = vadd.f32 %v418_v51, %v417_v25  ;;  %v847_v25 = vld [vmem:[%s625_s15 + $0x128] sm:$0xff] }
  0x36   : > { %v238_v62 = vadd.f32 %v237_v54, %v236_v57  ;;  %v775_v54 = vld [vmem:[%s625_s15 + $0xe0] sm:$0xff]  ;;  %v350_v57 = vmul.f32 %v671_v31, %v671_v31  ;;  %v436_v51 = vsel %vm201_vm1, %v356_v35, 0.0  ;;  %v365_v35 = vmul.f32 %v759_v39, %v759_v39 }
  0x37   : > { %v257_v59 = vsel %vm201_vm1, %v775_v54, 0.0  ;;  %v421_v31 = vadd.f32 %v420_v58, %v419_v28  ;;  %v438_v58 = vsel %vm201_vm1, %v357_v42, 0.0  ;;  %v855_v28 = vld [vmem:[%s625_s15 + $0x130] sm:$0xff]  ;;  %v366_v42 = vmul.f32 %v767_v47, %v767_v47 }
  0x38   : > { %v240_v5 = vadd.f32 %v239_v60, %v238_v62  ;;  %v783_v60 = vld [vmem:[%s625_s15 + $0xe8] sm:$0xff]  ;;  %v424_v3 = vsel %vm201_vm1, %v350_v57, 0.0  ;;  %v359_v57 = vmul.f32 %v716_v61, %v716_v61 }
  0x39   : > { %v259_v4 = vsel %vm201_vm1, %v783_v60, 0.0 }
  0x3a   : > { %v242_v11 = vadd.f32 %v241_v0, %v240_v5  ;;  %v422_v0 = vsel %vm201_vm1, %v349_v50, 0.0  ;;  %v791_v5 = vld [vmem:[%s625_s15 + $0xf0] sm:$0xff]  ;;  %v358_v50 = vmul.f32 %v711_v56, %v711_v56 }
  0x3b   : > { %v423_v34 = vadd.f32 %v422_v0, %v421_v31  ;;  %v863_v31 = vld [vmem:[%s625_s15 + $0x138] sm:$0xff] }
  0x3c   : > { %v244_v18 = vadd.f32 %v243_v8, %v242_v11  ;;  %v261_v8 = vsel %vm201_vm1, %v791_v5, 0.0  ;;  %v440_v0 = vsel %vm201_vm1, %v358_v50, 0.0  ;;  %v367_v50 = vmul.f32 %v775_v54, %v775_v54 }
  0x3d   : > { %v425_v37 = vadd.f32 %v424_v3, %v423_v34  ;;  %v442_v3 = vsel %vm201_vm1, %v359_v57, 0.0  ;;  %v871_v34 = vld [vmem:[%s625_s15 + $0x140] sm:$0xff]  ;;  %v368_v57 = vmul.f32 %v783_v60, %v783_v60 }
  0x3e   : > { %v246_v26 = vadd.f32 %v245_v15, %v244_v18  ;;  %v263_v15 = vsel %vm201_vm1, %v799_v9, 0.0 }
  0x3f   : > { %v427_v40 = vadd.f32 %v426_v14, %v425_v37  ;;  %v444_v14 = vsel %vm201_vm1, %v360_v63, 0.0  ;;  %v879_v37 = vld [vmem:[%s625_s15 + $0x148] sm:$0xff]  ;;  %v369_v63 = vmul.f32 %v791_v5, %v791_v5 }
  0x40   : > { %v248_v33 = vadd.f32 %v247_v23, %v246_v26  ;;  %v265_v23 = vsel %vm201_vm1, %v807_v10, 0.0 }
  0x41   : > { %v429_v43 = vadd.f32 %v428_v21, %v427_v40  ;;  %v446_v21 = vsel %vm201_vm1, %v361_v2, 0.0  ;;  %v887_v40 = vld [vmem:[%s625_s15 + $0x150] sm:$0xff]  ;;  %v370_v2 = vmul.f32 %v799_v9, %v799_v9 }
  0x42   : > { %v250_v41 = vadd.f32 %v249_v30, %v248_v33  ;;  %v267_v30 = vsel %vm201_vm1, %v815_v13, 0.0 }
  0x43   : > { %v431_v46 = vadd.f32 %v430_v29, %v429_v43  ;;  %v448_v29 = vsel %vm201_vm1, %v362_v12, 0.0  ;;  %v895_v43 = vld [vmem:[%s625_s15 + $0x158] sm:$0xff]  ;;  %v371_v12 = vmul.f32 %v807_v10, %v807_v10 }
  0x44   : > { %v252_v48 = vadd.f32 %v251_v38, %v250_v41  ;;  %v269_v38 = vsel %vm201_vm1, %v823_v16, 0.0 }
  0x45   : > { %v433_v49 = vadd.f32 %v432_v36, %v431_v46  ;;  %v450_v36 = vsel %vm201_vm1, %v363_v20, 0.0  ;;  %v903_v46 = vld [vmem:[%s625_s15 + $0x160] sm:$0xff]  ;;  %v372_v20 = vmul.f32 %v815_v13, %v815_v13 }
  0x46   : > { %v254_v55 = vadd.f32 %v253_v45, %v252_v48  ;;  %v271_v45 = vsel %vm201_vm1, %v831_v19, 0.0 }
  0x47   : > { %v435_v52 = vadd.f32 %v434_v44, %v433_v49  ;;  %v452_v44 = vsel %vm201_vm1, %v364_v27, 0.0  ;;  %v911_v49 = vld [vmem:[%s625_s15 + $0x168] sm:$0xff]  ;;  %v373_v27 = vmul.f32 %v823_v16, %v823_v16 }
  0x48   : > { %v256_v62 = vadd.f32 %v255_v53, %v254_v55  ;;  %v273_v53 = vsel %vm201_vm1, %v839_v22, 0.0 }
  0x49   : > { %v437_v56 = vadd.f32 %v436_v51, %v435_v52  ;;  %v454_v51 = vsel %vm201_vm1, %v365_v35, 0.0  ;;  %v919_v52 = vld [vmem:[%s625_s15 + $0x170] sm:$0xff]  ;;  %v374_v35 = vmul.f32 %v831_v19, %v831_v19 }
  0x4a   : > { %v258_v6 = vadd.f32 %v257_v59, %v256_v62  ;;  %v275_v59 = vsel %vm201_vm1, %v847_v25, 0.0 }
  0x4b   : > { %v439_v61 = vadd.f32 %v438_v58, %v437_v56  ;;  %v456_v58 = vsel %vm201_vm1, %v366_v42, 0.0  ;;  %v927_v56 = vld [vmem:[%s625_s15 + $0x178] sm:$0xff]  ;;  %v375_v42 = vmul.f32 %v839_v22, %v839_v22 }
  0x4c   : > { %v260_v11 = vadd.f32 %v259_v4, %v258_v6  ;;  %v277_v4 = vsel %vm201_vm1, %v855_v28, 0.0 }
  0x4d   : > { %v441_v1 = vadd.f32 %v440_v0, %v439_v61  ;;  %v458_v0 = vsel %vm201_vm1, %v367_v50, 0.0  ;;  %v935_v61 = vld [vmem:[%s625_s15 + $0x180] sm:$0xff]  ;;  %v376_v50 = vmul.f32 %v847_v25, %v847_v25 }
  0x4e   : > { %v262_v18 = vadd.f32 %v261_v8, %v260_v11  ;;  %v279_v8 = vsel %vm201_vm1, %v863_v31, 0.0 }
  0x4f   : > { %v443_v7 = vadd.f32 %v442_v3, %v441_v1  ;;  %v460_v3 = vsel %vm201_vm1, %v368_v57, 0.0  ;;  %v943_v1 = vld [vmem:[%s625_s15 + $0x188] sm:$0xff]  ;;  %v377_v57 = vmul.f32 %v855_v28, %v855_v28 }
  0x50   : > { %v264_v26 = vadd.f32 %v263_v15, %v262_v18  ;;  %v281_v15 = vsel %vm201_vm1, %v871_v34, 0.0 }
  0x51   : > { %v445_v17 = vadd.f32 %v444_v14, %v443_v7  ;;  %v462_v14 = vsel %vm201_vm1, %v369_v63, 0.0  ;;  %v951_v7 = vld [vmem:[%s625_s15 + $0x190] sm:$0xff]  ;;  %v378_v63 = vmul.f32 %v863_v31, %v863_v31 }
  0x52   : > { %v266_v33 = vadd.f32 %v265_v23, %v264_v26  ;;  %v283_v23 = vsel %vm201_vm1, %v879_v37, 0.0 }
  0x53   : > { %v447_v24 = vadd.f32 %v446_v21, %v445_v17  ;;  %v464_v21 = vsel %vm201_vm1, %v370_v2, 0.0  ;;  %v959_v17 = vld [vmem:[%s625_s15 + $0x198] sm:$0xff]  ;;  %v379_v2 = vmul.f32 %v871_v34, %v871_v34 }
  0x54   : > { %v268_v41 = vadd.f32 %v267_v30, %v266_v33  ;;  %v285_v30 = vsel %vm201_vm1, %v887_v40, 0.0 }
  0x55   : > { %v449_v32 = vadd.f32 %v448_v29, %v447_v24  ;;  %v466_v29 = vsel %vm201_vm1, %v371_v12, 0.0  ;;  %v967_v24 = vld [vmem:[%s625_s15 + $0x1a0] sm:$0xff]  ;;  %v380_v12 = vmul.f32 %v879_v37, %v879_v37 }
  0x56   : > { %v270_v48 = vadd.f32 %v269_v38, %v268_v41  ;;  %v287_v38 = vsel %vm201_vm1, %v895_v43, 0.0 }
  0x57   : > { %v451_v39 = vadd.f32 %v450_v36, %v449_v32  ;;  %v468_v36 = vsel %vm201_vm1, %v372_v20, 0.0  ;;  %v975_v32 = vld [vmem:[%s625_s15 + $0x1a8] sm:$0xff]  ;;  %v381_v20 = vmul.f32 %v887_v40, %v887_v40 }
  0x58   : > { %v272_v55 = vadd.f32 %v271_v45, %v270_v48  ;;  %v289_v45 = vsel %vm201_vm1, %v903_v46, 0.0 }
  0x59   : > { %v453_v47 = vadd.f32 %v452_v44, %v451_v39  ;;  %v470_v44 = vsel %vm201_vm1, %v373_v27, 0.0  ;;  %v983_v39 = vld [vmem:[%s625_s15 + $0x1b0] sm:$0xff]  ;;  %v382_v27 = vmul.f32 %v895_v43, %v895_v43 }
  0x5a   : > { %v274_v62 = vadd.f32 %v273_v53, %v272_v55  ;;  %v291_v53 = vsel %vm201_vm1, %v911_v49, 0.0  ;;  %v1047_v43 = vld [vmem:[%s625_s15 + $0x1f0] sm:$0xff] }
  0x5b   : > { %v455_v54 = vadd.f32 %v454_v51, %v453_v47  ;;  %v472_v51 = vsel %vm201_vm1, %v374_v35, 0.0  ;;  %v991_v47 = vld [vmem:[%s625_s15 + $0x1b8] sm:$0xff]  ;;  %v383_v35 = vmul.f32 %v903_v46, %v903_v46 }
  0x5c   : > { %v276_v6 = vadd.f32 %v275_v59, %v274_v62  ;;  %v293_v59 = vsel %vm201_vm1, %v919_v52, 0.0 }
  0x5d   : > { %v457_v60 = vadd.f32 %v456_v58, %v455_v54  ;;  %v474_v58 = vsel %vm201_vm1, %v375_v42, 0.0  ;;  %v999_v54 = vld [vmem:[%s625_s15 + $0x1c0] sm:$0xff]  ;;  %v384_v42 = vmul.f32 %v911_v49, %v911_v49  ;;  %v386_v49 = vmul.f32 %v927_v56, %v927_v56 }
  0x5e   : > { %v278_v11 = vadd.f32 %v277_v4, %v276_v6  ;;  %v295_v4 = vsel %vm201_vm1, %v927_v56, 0.0  ;;  %v389_v56 = vmul.f32 %v951_v7, %v951_v7 }
  0x5f   : > { %v459_v5 = vadd.f32 %v458_v0, %v457_v60  ;;  %v476_v0 = vsel %vm201_vm1, %v376_v50, 0.0  ;;  %v1007_v60 = vld [vmem:[%s625_s15 + $0x1c8] sm:$0xff]  ;;  %v385_v50 = vmul.f32 %v919_v52, %v919_v52 }
  0x60   : > { %v280_v18 = vadd.f32 %v279_v8, %v278_v11  ;;  %v297_v8 = vsel %vm201_vm1, %v935_v61, 0.0 }
  0x61   : > { %v461_v9 = vadd.f32 %v460_v3, %v459_v5  ;;  %v478_v3 = vsel %vm201_vm1, %v377_v57, 0.0  ;;  %v1015_v5 = vld [vmem:[%s625_s15 + $0x1d0] sm:$0xff]  ;;  %v492_v57 = vsel %vm201_vm1, %v384_v42, 0.0 }
  0x62   : > { %v282_v26 = vadd.f32 %v281_v15, %v280_v18  ;;  %v299_v15 = vsel %vm201_vm1, %v943_v1, 0.0 }
  0x63   : > { %v463_v10 = vadd.f32 %v462_v14, %v461_v9  ;;  %v480_v14 = vsel %vm201_vm1, %v378_v63, 0.0  ;;  %v1023_v9 = vld [vmem:[%s625_s15 + $0x1d8] sm:$0xff] }
  0x64   : > { %v284_v33 = vadd.f32 %v283_v23, %v282_v26  ;;  %v301_v23 = vsel %vm201_vm1, %v951_v7, 0.0  ;;  %v392_v7 = vmul.f32 %v975_v32, %v975_v32 }
  0x65   : > { %v465_v13 = vadd.f32 %v464_v21, %v463_v10  ;;  %v482_v21 = vsel %vm201_vm1, %v379_v2, 0.0  ;;  %v1031_v10 = vld [vmem:[%s625_s15 + $0x1e0] sm:$0xff] }
  0x66   : > { %v286_v41 = vadd.f32 %v285_v30, %v284_v33  ;;  %v303_v30 = vsel %vm201_vm1, %v959_v17, 0.0 }
  0x67   : > { %v467_v16 = vadd.f32 %v466_v29, %v465_v13  ;;  %v484_v29 = vsel %vm201_vm1, %v380_v12, 0.0  ;;  %v1039_v13 = vld [vmem:[%s625_s15 + $0x1e8] sm:$0xff] }
  0x68   : > { %v288_v48 = vadd.f32 %v287_v38, %v286_v41  ;;  %v305_v38 = vsel %vm201_vm1, %v967_v24, 0.0 }
  0x69   : > { %v469_v19 = vadd.f32 %v468_v36, %v467_v16  ;;  %v486_v36 = vsel %vm201_vm1, %v381_v20, 0.0 }
  0x6a   : > { %v290_v55 = vadd.f32 %v289_v45, %v288_v48  ;;  %v307_v45 = vsel %vm201_vm1, %v975_v32, 0.0  ;;  %v508_v32 = vsel %vm201_vm1, %v392_v7, 0.0 }
  0x6b   : > { %v471_v22 = vadd.f32 %v470_v44, %v469_v19  ;;  %v488_v44 = vsel %vm201_vm1, %v382_v27, 0.0  ;;  %v394_v27 = vmul.f32 %v991_v47, %v991_v47 }
  0x6c   : > { %v292_v62 = vadd.f32 %v291_v53, %v290_v55  ;;  %v309_v53 = vsel %vm201_vm1, %v983_v39, 0.0 }
  0x6d   : > { %v473_v25 = vadd.f32 %v472_v51, %v471_v22  ;;  %v490_v51 = vsel %vm201_vm1, %v383_v35, 0.0  ;;  %v512_v35 = vsel %vm201_vm1, %v394_v27, 0.0 }
  0x6e   : > { %v294_v6 = vadd.f32 %v293_v59, %v292_v62  ;;  %v311_v59 = vsel %vm201_vm1, %v991_v47, 0.0 }
  0x6f   : > { %v475_v28 = vadd.f32 %v474_v58, %v473_v25  ;;  %v387_v25 = vmul.f32 %v935_v61, %v935_v61  ;;  %v390_v61 = vmul.f32 %v959_v17, %v959_v17  ;;  %v200_v17 = vld [vmem:[%s1133_s1] sm:$0x1] }
  0x70   : > { %v296_v11 = vadd.f32 %v295_v4, %v294_v6  ;;  %v313_v4 = vsel %vm201_vm1, %v999_v54, 0.0 }
  0x71   : > { %v477_v31 = vadd.f32 %v476_v0, %v475_v28  ;;  %v388_v0 = vmul.f32 %v943_v1, %v943_v1  ;;  %v498_v2 = vsel %vm201_vm1, %v387_v25, 0.0  ;;  %v391_v1 = vmul.f32 %v967_v24, %v967_v24 }
  0x72   : > { %v298_v18 = vadd.f32 %v297_v8, %v296_v11  ;;  %v315_v8 = vsel %vm201_vm1, %v1007_v60, 0.0 }
  0x73   : > { %v479_v34 = vadd.f32 %v478_v3, %v477_v31  ;;  %v500_v31 = vsel %vm201_vm1, %v388_v0, 0.0  ;;  %v506_v24 = vsel %vm201_vm1, %v391_v1, 0.0 }
  0x74   : > { %v300_v26 = vadd.f32 %v299_v15, %v298_v18  ;;  %v317_v15 = vsel %vm201_vm1, %v1015_v5, 0.0 }
  0x75   : > { %v481_v37 = vadd.f32 %v480_v14, %v479_v34  ;;  %v502_v14 = vsel %vm201_vm1, %v389_v56, 0.0 }
  0x76   : > { %v302_v33 = vadd.f32 %v301_v23, %v300_v26  ;;  %v319_v23 = vsel %vm201_vm1, %v1023_v9, 0.0 }
  0x77   : > { %v483_v40 = vadd.f32 %v482_v21, %v481_v37 }
  0x78   : > { %v304_v41 = vadd.f32 %v303_v30, %v302_v33  ;;  %v321_v30 = vsel %vm201_vm1, %v1031_v10, 0.0 }
  0x79   : > { %v485_v16 = vadd.f32 %v484_v29, %v483_v40 }
  0x7a   : > { %v306_v48 = vadd.f32 %v305_v38, %v304_v41  ;;  %v323_v38 = vsel %vm201_vm1, %v1039_v13, 0.0 }
  0x7b   : > { %v487_v19 = vadd.f32 %v486_v36, %v485_v16  ;;  %v397_v36 = vmul.f32 %v1015_v5, %v1015_v5 }
  0x7c   : > { %v308_v55 = vadd.f32 %v307_v45, %v306_v48  ;;  %v325_v45 = vsel %vm201_vm1, %v1047_v43, 0.0  ;;  %v1055_v48 = vld [vmem:[%s625_s15 + $0x1f8] sm:$0xff] }
  0x7d   : > { %v489_v22 = vadd.f32 %v488_v44, %v487_v19  ;;  %v399_v44 = vmul.f32 %v1031_v10, %v1031_v10  ;;  %v400_v19 = vmul.f32 %v1039_v13, %v1039_v13 }
  0x7e   : > { %v310_v62 = vadd.f32 %v309_v53, %v308_v55  ;;  %v327_v53 = vsel %vm201_vm1, %v1055_v48, 0.0 }
  0x7f   : > { %v491_v58 = vadd.f32 %v490_v51, %v489_v22  ;;  %v524_v10 = vsel %vm201_vm1, %v400_v19, 0.0 }
  0x80   : > { %v312_v6 = vadd.f32 %v311_v59, %v310_v62  ;;  %v494_v62 = vsel %vm201_vm1, %v385_v50, 0.0  ;;  %v401_v50 = vmul.f32 %v1047_v43, %v1047_v43 }
  0x81   : > { %v493_v52 = vadd.f32 %v492_v57, %v491_v58 }
  0x82   : > { %v314_v11 = vadd.f32 %v313_v4, %v312_v6  ;;  %v496_v4 = vsel %vm201_vm1, %v386_v49, 0.0 }
  0x83   : > { %v495_v28 = vadd.f32 %v494_v62, %v493_v52 }
  0x84   : > { %v316_v18 = vadd.f32 %v315_v8, %v314_v11 }
  0x85   : > { %v497_v3 = vadd.f32 %v496_v4, %v495_v28 }
  0x86   : > { %v318_v26 = vadd.f32 %v317_v15, %v316_v18  ;;  %v504_v18 = vsel %vm201_vm1, %v390_v61, 0.0 }
  0x87   : > { %v499_v11 = vadd.f32 %v498_v2, %v497_v3 }
  0x88   : > { %v320_v33 = vadd.f32 %v319_v23, %v318_v26  ;;  %v393_v23 = vmul.f32 %v983_v39, %v983_v39 }
  0x89   : > { %v501_v15 = vadd.f32 %v500_v31, %v499_v11 }
  0x8a   : > { %v322_v41 = vadd.f32 %v321_v30, %v320_v33  ;;  %v395_v30 = vmul.f32 %v999_v54, %v999_v54  ;;  %v510_v39 = vsel %vm201_vm1, %v393_v23, 0.0  ;;  %v396_v33 = vmul.f32 %v1007_v60, %v1007_v60 }
  0x8b   : > { %v503_v20 = vadd.f32 %v502_v14, %v501_v15  ;;  %v518_v60 = vsel %vm201_vm1, %v397_v36, 0.0 }
  0x8c   : > { %v324_v46 = vadd.f32 %v323_v38, %v322_v41  ;;  %v514_v38 = vsel %vm201_vm1, %v395_v30, 0.0  ;;  %v398_v41 = vmul.f32 %v1023_v9, %v1023_v9  ;;  %v516_v54 = vsel %vm201_vm1, %v396_v33, 0.0 }
  0x8d   : > { %v505_v37 = vadd.f32 %v504_v18, %v503_v20  ;;  %v522_v9 = vsel %vm201_vm1, %v399_v44, 0.0 }
  0x8e   : > { %v326_v55 = vadd.f32 %v325_v45, %v324_v46  ;;  %v520_v5 = vsel %vm201_vm1, %v398_v41, 0.0 }
  0x8f   : > { %v507_v29 = vadd.f32 %v506_v24, %v505_v37 }
  0x90   : > { %v328_v59 = vadd.f32 %v327_v53, %v326_v55  ;;  %v402_v53 = vmul.f32 %v1055_v48, %v1055_v48  ;;  %v526_v55 = vsel %vm201_vm1, %v401_v50, 0.0 }
  0x91   : > { %v509_v40 = vadd.f32 %v508_v32, %v507_v29 }
  0x92   : > { %v329_v63 = vrot.slane %v328_v59, 4  ;;  %v528_v13 = vsel %vm201_vm1, %v402_v53, 0.0 }
  0x93   : > { %v511_v47 = vadd.f32 %v510_v39, %v509_v40 }
  0x94   : > { %v330_v6 = vadd.f32 %v329_v63, %v328_v59  ;;  %v338_v63 = vld [vmem:[%s1134_s2] sm:$0x1] }
  0x95   : > { %v513_v16 = vadd.f32 %v512_v35, %v511_v47 }
  0x96   : > { %v331_v8 = vrot.slane %v330_v6, 2 }
  0x97   : > { %v515_v42 = vadd.f32 %v514_v38, %v513_v16 }
  0x98   : > { %v332_v12 = vadd.f32 %v331_v8, %v330_v6 }
  0x99   : > { %v517_v45 = vadd.f32 %v516_v54, %v515_v42 }
  0x9a   : > { %v333_v34 = vrot.slane %v332_v12, 1 }
  0x9b   : > { %v519_v46 = vadd.f32 %v518_v60, %v517_v45 }
  0x9c   : > { %v334_v21 = vadd.f32 %v333_v34, %v332_v12 }
  0x9d   : > { %v521_v51 = vadd.f32 %v520_v5, %v519_v46 }
  0x9e   : > { %v335_v26 = vadd.f32 %v334_v21, %v200_v17 }
  0x9f   : > { %v523_v22 = vadd.f32 %v522_v9, %v521_v51 }
  0xa0   : > { %337 = vst.msk [vmem:[%s1133_s1] sm:$0x1] %vm336_vm2, %v335_v26 }
  0xa1   : > { %v525_v49 = vadd.f32 %v524_v10, %v523_v22 }
  0xa3   : > { %v527_v57 = vadd.f32 %v526_v55, %v525_v49 }
  0xa5   : > { %v529_v58 = vadd.f32 %v528_v13, %v527_v57 }
  0xa7   : > { %v530_v59 = vrot.slane %v529_v58, 4 }
  0xa9   : > { %v531_v25 = vadd.f32 %v530_v59, %v529_v58 }
  0xab   : > { %v532_v62 = vrot.slane %v531_v25, 2 }
  0xad   : > { %v533_v43 = vadd.f32 %v532_v62, %v531_v25 }
  0xaf   : > { %v534_v52 = vrot.slane %v533_v43, 1 }
  0xb1   : > { %v535_v48 = vadd.f32 %v534_v52, %v533_v43 }
  0xb3   : > { %v536_v0 = vadd.f32 %v535_v48, %v338_v63 }
  0xb5   : > { %537 = vst.msk [vmem:[%s1134_s2] sm:$0x1] %vm336_vm2, %v536_v0 }
  0xb6 PF: > { %s13_s9 = sadd.s32 1, %s596_s9  }
  0xb7   : > { %p10_p5 = scmp.ge.s32.totalorder %s13_s9, 6  }
  0xb9   :  { %12 = sbr.rel (!%p10_p5) target bundleno = 1 (0x1), region = 62 }

// kernel: generator_forward.22
= control target key start
LH: loop header
LB: loop body
LE: loop exit
PB: predicated region body
PF: predicated region fallthrough
CT: control target
= control target key end

     0   :  { %s1686_s9 = smov 0   ;;  %s1688_s10 = smov 0   ;;  %s1837_s0 = inlined_call_operand.vmem [shape: bf16[4,512,128], index: 0, kind: input, shape index: {}]   ;;  %s1838_s1 = inlined_call_operand.vmem [shape: bf16[4,128,128], index: 1, kind: input, shape index: {}]   ;;  %s1839_s2 = inlined_call_operand.vmem [shape: f32[4,512,128], index: 2, kind: output, shape index: {}]  }
   0x1   :  { %s1690_s11 = smov 0  }
   0x2 LB: > { %s38_s12 = sadd.s32 1, %s1665_s10  ;;  %p1395_p0 = scmp.ge.s32.totalorder %s1669_s11, 1  ;;  %s1669_s11 = sphi %s1690_s11, %s12_s11   ;;  %s1665_s10 = sphi %s1688_s10, %s1841_s10   ;;  %s1661_s9 = sphi %s1686_s9, %s1840_s9  }
   0x3   : > { %p40_p1 = scmp.ge.s32.totalorder %s38_s12, 4  ;;  %p176_p2 = scmp.lt.s32.totalorder %s1669_s11, 5 }
   0x5   : > { %s1843_s12 = smov (%p40_p1, %s38_s12), 0  ;;  %p177_p3 = pnand %p1395_p0, %p176_p2 }
   0x6   : > { %p225_p4 = scmp.lt.s32.totalorder (!%p177_p3), %s1661_s9, 3 }
   0x7   : > { %180 = sbr.rel (%p177_p3) target bundleno = 304 (0x130), region = 28 }
   0xc   : > { %s1845_s9 = smov (!%p225_p4, %s1661_s9), 3 }
   0xd   : > { %s1445_s13 = sshll.u32 %s1845_s9, 6  ;;  %s1444_s17 = sshll.u32 %s1845_s9, 8 }
   0xe   : > { %s1710_s16 = scalar_lea.vmem %s1838_s1, %s1445_s13  ;;  %s1719_s20 = scalar_lea.vmem %s1837_s0, %s1444_s17 }
   0xf   : > { %v1607_v0 = vld [vmem:[%s1710_s16 + $0x38] sm:$0xff]   ;;  %v1608_v1 = vld [vmem:[%s1710_s16 + $0x30] sm:$0xff]   ;;  %v1609_v2 = vld [vmem:[%s1710_s16 + $0x28] sm:$0xff]   ;;  %s1446_s21 = sshll.u32 %s1845_s9, 9 }
  0x10   : > { %1487 = vmatprep.subr.bf16.mxu0 %v1607_v0  ;;  %1567 = vmatprep.subr.bf16.mxu1 %v1607_v0  ;;  %v1610_v3 = vld [vmem:[%s1710_s16 + $0x20] sm:$0xff]   ;;  %v1611_v6 = vld [vmem:[%s1710_s16 + $0x18] sm:$0xff]   ;;  %v1612_v7 = vld [vmem:[%s1710_s16 + $0x10] sm:$0xff]   ;;  %s1762_s24 = scalar_lea.vmem %s1839_s2, %s1446_s21 }
  0x11   : > { %1488 = vmatpush3.bf16.msra.mxu0 %v1607_v0  ;;  %1575 = vmatpush3.bf16.msra.mxu1 %v1607_v0  ;;  %v1615_v4 = vld [vmem:[%s1719_s20] sm:$0xff]   ;;  %v1613_v8 = vld [vmem:[%s1710_s16 + $0x8] sm:$0xff]   ;;  %v1619_v12 = vld [vmem:[%s1719_s20 + $0x10] sm:$0xff]  }
  0x12   : > { %1489 = vmatprep.subr.bf16.mxu0 %v1608_v1  ;;  %1568 = vmatprep.subr.bf16.mxu1 %v1608_v1  ;;  %v1616_v5 = vld [vmem:[%s1719_s20 + $0x80] sm:$0xff]   ;;  %v1617_v10 = vld [vmem:[%s1719_s20 + $0x8] sm:$0xff]   ;;  %v1620_v13 = vld [vmem:[%s1719_s20 + $0x90] sm:$0xff]  }
  0x13   : > { %1503 = vmatprep.mubr.bf16.mxu0 %v1615_v4  ;;  %1535 = vmatprep.mubr.bf16.mxu1 %v1616_v5  ;;  %v1614_v9 = vld [vmem:[%s1710_s16] sm:$0xff]   ;;  %v1618_v11 = vld [vmem:[%s1719_s20 + $0x88] sm:$0xff]   ;;  %v1621_v14 = vld [vmem:[%s1719_s20 + $0x18] sm:$0xff]  }
  0x14   : > { %v1622_v15 = vld [vmem:[%s1719_s20 + $0x98] sm:$0xff]   ;;  %v1623_v16 = vld [vmem:[%s1719_s20 + $0x20] sm:$0xff]   ;;  %v1625_v18 = vld [vmem:[%s1719_s20 + $0x28] sm:$0xff]  }
  0x15   : > { %1490 = vmatpush3.bf16.msra.mxu0 %v1608_v1  ;;  %1576 = vmatpush3.bf16.msra.mxu1 %v1608_v1  ;;  %v1624_v17 = vld [vmem:[%s1719_s20 + $0xa0] sm:$0xff]   ;;  %v1626_v19 = vld [vmem:[%s1719_s20 + $0xa8] sm:$0xff]   ;;  %v1627_v20 = vld [vmem:[%s1719_s20 + $0x30] sm:$0xff]  }
  0x16   : > { %1491 = vmatprep.subr.bf16.mxu0 %v1609_v2  ;;  %1569 = vmatprep.subr.bf16.mxu1 %v1609_v2  ;;  %v1628_v21 = vld [vmem:[%s1719_s20 + $0xb0] sm:$0xff]   ;;  %v1629_v22 = vld [vmem:[%s1719_s20 + $0x38] sm:$0xff]   ;;  %v1631_v24 = vld [vmem:[%s1719_s20 + $0x40] sm:$0xff]  }
  0x17   : > { %v1630_v23 = vld [vmem:[%s1719_s20 + $0xb8] sm:$0xff]   ;;  %v1632_v25 = vld [vmem:[%s1719_s20 + $0xc0] sm:$0xff]   ;;  %v1633_v26 = vld [vmem:[%s1719_s20 + $0x48] sm:$0xff]  }
  0x18   : > { %v1634_v27 = vld [vmem:[%s1719_s20 + $0xc8] sm:$0xff]   ;;  %v1635_v28 = vld [vmem:[%s1719_s20 + $0x50] sm:$0xff]   ;;  %v1637_v30 = vld [vmem:[%s1719_s20 + $0x58] sm:$0xff]  }
  0x19   : > { %1492 = vmatpush3.bf16.msra.mxu0 %v1609_v2  ;;  %1577 = vmatpush3.bf16.msra.mxu1 %v1609_v2  ;;  %v1636_v29 = vld [vmem:[%s1719_s20 + $0xd0] sm:$0xff]   ;;  %v1638_v31 = vld [vmem:[%s1719_s20 + $0xd8] sm:$0xff]   ;;  %v1639_v32 = vld [vmem:[%s1719_s20 + $0x60] sm:$0xff]  }
  0x1a   : > { %1493 = vmatprep.subr.bf16.mxu0 %v1610_v3  ;;  %1570 = vmatprep.subr.bf16.mxu1 %v1610_v3  ;;  %v1640_v33 = vld [vmem:[%s1719_s20 + $0xe0] sm:$0xff]   ;;  %v1641_v34 = vld [vmem:[%s1719_s20 + $0x68] sm:$0xff]   ;;  %v1643_v36 = vld [vmem:[%s1719_s20 + $0x70] sm:$0xff]  }
  0x1b   : > { %v1642_v35 = vld [vmem:[%s1719_s20 + $0xe8] sm:$0xff]   ;;  %v1644_v37 = vld [vmem:[%s1719_s20 + $0xf0] sm:$0xff]   ;;  %v1645_v38 = vld [vmem:[%s1719_s20 + $0x78] sm:$0xff]  }
  0x1c   : > { %v1646_v39 = vld [vmem:[%s1719_s20 + $0xf8] sm:$0xff]  }
  0x1d   : > { %1494 = vmatpush3.bf16.msra.mxu0 %v1610_v3  ;;  %1578 = vmatpush3.bf16.msra.mxu1 %v1610_v3 }
  0x1e   : > { %1495 = vmatprep.subr.bf16.mxu0 %v1611_v6  ;;  %1571 = vmatprep.subr.bf16.mxu1 %v1611_v6 }
  0x21   : > { %1496 = vmatpush3.bf16.msra.mxu0 %v1611_v6  ;;  %1579 = vmatpush3.bf16.msra.mxu1 %v1611_v6 }
  0x22   : > { %1497 = vmatprep.subr.bf16.mxu0 %v1612_v7  ;;  %1572 = vmatprep.subr.bf16.mxu1 %v1612_v7 }
  0x25   : > { %1498 = vmatpush3.bf16.msra.mxu0 %v1612_v7  ;;  %1580 = vmatpush3.bf16.msra.mxu1 %v1612_v7 }
  0x26   : > { %1499 = vmatprep.subr.bf16.mxu0 %v1613_v8  ;;  %1573 = vmatprep.subr.bf16.mxu1 %v1613_v8 }
  0x29   : > { %1500 = vmatpush3.bf16.msra.mxu0 %v1613_v8  ;;  %1581 = vmatpush3.bf16.msra.mxu1 %v1613_v8 }
  0x2a   : > { %1501 = vmatprep.subr.bf16.mxu0 %v1614_v9  ;;  %1574 = vmatprep.subr.bf16.mxu1 %v1614_v9 }
  0x2d   : > { %1502 = vmatpush3.bf16.msra.mxu0 %v1614_v9  ;;  %1582 = vmatpush3.bf16.msra.mxu1 %v1614_v9 }
  0x30   : > { %1504 = vmatmul.mubr.bf16.vlgmr.msra.gmra.mxu0 %v1617_v10  ;;  %1536 = vmatmul.mubr.bf16.vlgmr.msra.gmra.mxu1 %v1618_v11 }
  0x31   : > { %1507 = vmatprep.mubr.bf16.mxu0 %v1619_v12  ;;  %1539 = vmatprep.mubr.bf16.mxu1 %v1620_v13 }
  0x38   : > { %1508 = vmatmul.mubr.bf16.gmra.mxu0 %v1621_v14  ;;  %1540 = vmatmul.mubr.bf16.gmra.mxu1 %v1622_v15 }
  0x39   : > { %1511 = vmatprep.mubr.bf16.mxu0 %v1623_v16  ;;  %1543 = vmatprep.mubr.bf16.mxu1 %v1624_v17 }
  0x40   : > { %1512 = vmatmul.mubr.bf16.gmra.mxu0 %v1625_v18  ;;  %1544 = vmatmul.mubr.bf16.gmra.mxu1 %v1626_v19 }
  0x41   : > { %1515 = vmatprep.mubr.bf16.mxu0 %v1627_v20  ;;  %1547 = vmatprep.mubr.bf16.mxu1 %v1628_v21 }
  0x48   : > { %1516 = vmatmul.mubr.bf16.gmra.mxu0 %v1629_v22  ;;  %1548 = vmatmul.mubr.bf16.gmra.mxu1 %v1630_v23 }
  0x49   : > { %1519 = vmatprep.mubr.bf16.mxu0 %v1631_v24  ;;  %1551 = vmatprep.mubr.bf16.mxu1 %v1632_v25 }
  0x50   : > { %1520 = vmatmul.mubr.bf16.gmra.mxu0 %v1633_v26  ;;  %1552 = vmatmul.mubr.bf16.gmra.mxu1 %v1634_v27 }
  0x51   : > { %1523 = vmatprep.mubr.bf16.mxu0 %v1635_v28  ;;  %1555 = vmatprep.mubr.bf16.mxu1 %v1636_v29 }
  0x58   : > { %1524 = vmatmul.mubr.bf16.gmra.mxu0 %v1637_v30  ;;  %1556 = vmatmul.mubr.bf16.gmra.mxu1 %v1638_v31 }
  0x59   : > { %1527 = vmatprep.mubr.bf16.mxu0 %v1639_v32  ;;  %1559 = vmatprep.mubr.bf16.mxu1 %v1640_v33 }
  0x60   : > { %1528 = vmatmul.mubr.bf16.gmra.mxu0 %v1641_v34  ;;  %1560 = vmatmul.mubr.bf16.gmra.mxu1 %v1642_v35 }
  0x61   : > { %1531 = vmatprep.mubr.bf16.mxu0 %v1643_v36  ;;  %1563 = vmatprep.mubr.bf16.mxu1 %v1644_v37 }
  0x68   : > { %1532 = vmatmul.mubr.bf16.gmra.mxu0 %v1645_v38  ;;  %1564 = vmatmul.mubr.bf16.gmra.mxu1 %v1646_v39 }
  0xf0   : > { %v1505_v40 = vpop.f32.mrf.mxu0  ;;  %v1537_v41 = vpop.f32.mrf.mxu1 }
  0xf1   : > { %1202 = vst [vmem:[%s1762_s24 + $0x10] sm:$0xff] %v1505_v40  ;;  %1234 = vst [vmem:[%s1762_s24 + $0x110] sm:$0xff] %v1537_v41 }
  0xf2   : > { %v750_v42 = vpop.f32.mrf.mxu0  ;;  %v878_v43 = vpop.f32.mrf.mxu1 }
  0xf3   : > { %1200 = vst [vmem:[%s1762_s24] sm:$0xff] %v750_v42  ;;  %1232 = vst [vmem:[%s1762_s24 + $0x100] sm:$0xff] %v878_v43 }
  0xf4   : > { %v1506_v44 = vpop.f32.mrf.mxu0  ;;  %v1538_v45 = vpop.f32.mrf.mxu1 }
  0xf5   : > { %1203 = vst [vmem:[%s1762_s24 + $0x18] sm:$0xff] %v1506_v44  ;;  %1235 = vst [vmem:[%s1762_s24 + $0x118] sm:$0xff] %v1538_v45 }
  0xf6   : > { %v753_v46 = vpop.f32.mrf.mxu0  ;;  %v881_v47 = vpop.f32.mrf.mxu1 }
  0xf7   : > { %1201 = vst [vmem:[%s1762_s24 + $0x8] sm:$0xff] %v753_v46  ;;  %1233 = vst [vmem:[%s1762_s24 + $0x108] sm:$0xff] %v881_v47 }
  0xf8   : > { %v1509_v48 = vpop.f32.mrf.mxu0  ;;  %v1541_v49 = vpop.f32.mrf.mxu1 }
  0xf9   : > { %1206 = vst [vmem:[%s1762_s24 + $0x30] sm:$0xff] %v1509_v48  ;;  %1238 = vst [vmem:[%s1762_s24 + $0x130] sm:$0xff] %v1541_v49 }
  0xfa   : > { %v766_v50 = vpop.f32.mrf.mxu0  ;;  %v894_v51 = vpop.f32.mrf.mxu1 }
  0xfb   : > { %1204 = vst [vmem:[%s1762_s24 + $0x20] sm:$0xff] %v766_v50  ;;  %1236 = vst [vmem:[%s1762_s24 + $0x120] sm:$0xff] %v894_v51 }
  0xfc   : > { %v1510_v52 = vpop.f32.mrf.mxu0  ;;  %v1542_v53 = vpop.f32.mrf.mxu1 }
  0xfd   : > { %1207 = vst [vmem:[%s1762_s24 + $0x38] sm:$0xff] %v1510_v52  ;;  %1239 = vst [vmem:[%s1762_s24 + $0x138] sm:$0xff] %v1542_v53 }
  0xfe   : > { %v769_v54 = vpop.f32.mrf.mxu0  ;;  %v897_v55 = vpop.f32.mrf.mxu1 }
  0xff   : > { %1205 = vst [vmem:[%s1762_s24 + $0x28] sm:$0xff] %v769_v54  ;;  %1237 = vst [vmem:[%s1762_s24 + $0x128] sm:$0xff] %v897_v55 }
 0x100   : > { %v1513_v56 = vpop.f32.mrf.mxu0  ;;  %v1545_v57 = vpop.f32.mrf.mxu1 }
 0x101   : > { %1210 = vst [vmem:[%s1762_s24 + $0x50] sm:$0xff] %v1513_v56  ;;  %1242 = vst [vmem:[%s1762_s24 + $0x150] sm:$0xff] %v1545_v57 }
 0x102   : > { %v782_v58 = vpop.f32.mrf.mxu0  ;;  %v910_v59 = vpop.f32.mrf.mxu1 }
 0x103   : > { %1208 = vst [vmem:[%s1762_s24 + $0x40] sm:$0xff] %v782_v58  ;;  %1240 = vst [vmem:[%s1762_s24 + $0x140] sm:$0xff] %v910_v59 }
 0x104   : > { %v1514_v60 = vpop.f32.mrf.mxu0  ;;  %v1546_v61 = vpop.f32.mrf.mxu1 }
 0x105   : > { %1211 = vst [vmem:[%s1762_s24 + $0x58] sm:$0xff] %v1514_v60  ;;  %1243 = vst [vmem:[%s1762_s24 + $0x158] sm:$0xff] %v1546_v61 }
 0x106   : > { %v785_v62 = vpop.f32.mrf.mxu0  ;;  %v913_v63 = vpop.f32.mrf.mxu1 }
 0x107   : > { %1209 = vst [vmem:[%s1762_s24 + $0x48] sm:$0xff] %v785_v62  ;;  %1241 = vst [vmem:[%s1762_s24 + $0x148] sm:$0xff] %v913_v63 }
 0x108   : > { %v1517_v0 = vpop.f32.mrf.mxu0  ;;  %v1549_v1 = vpop.f32.mrf.mxu1 }
 0x109   : > { %1214 = vst [vmem:[%s1762_s24 + $0x70] sm:$0xff] %v1517_v0  ;;  %1246 = vst [vmem:[%s1762_s24 + $0x170] sm:$0xff] %v1549_v1 }
 0x10a   : > { %v798_v2 = vpop.f32.mrf.mxu0  ;;  %v926_v3 = vpop.f32.mrf.mxu1 }
 0x10b   : > { %1212 = vst [vmem:[%s1762_s24 + $0x60] sm:$0xff] %v798_v2  ;;  %1244 = vst [vmem:[%s1762_s24 + $0x160] sm:$0xff] %v926_v3 }
 0x10c   : > { %v1518_v4 = vpop.f32.mrf.mxu0  ;;  %v1550_v5 = vpop.f32.mrf.mxu1 }
 0x10d   : > { %1215 = vst [vmem:[%s1762_s24 + $0x78] sm:$0xff] %v1518_v4  ;;  %1247 = vst [vmem:[%s1762_s24 + $0x178] sm:$0xff] %v1550_v5 }
 0x10e   : > { %v801_v6 = vpop.f32.mrf.mxu0  ;;  %v929_v7 = vpop.f32.mrf.mxu1 }
 0x10f   : > { %1213 = vst [vmem:[%s1762_s24 + $0x68] sm:$0xff] %v801_v6  ;;  %1245 = vst [vmem:[%s1762_s24 + $0x168] sm:$0xff] %v929_v7 }
 0x110   : > { %v1521_v8 = vpop.f32.mrf.mxu0  ;;  %v1553_v9 = vpop.f32.mrf.mxu1 }
 0x111   : > { %1218 = vst [vmem:[%s1762_s24 + $0x90] sm:$0xff] %v1521_v8  ;;  %1250 = vst [vmem:[%s1762_s24 + $0x190] sm:$0xff] %v1553_v9 }
 0x112   : > { %v814_v10 = vpop.f32.mrf.mxu0  ;;  %v942_v11 = vpop.f32.mrf.mxu1 }
 0x113   : > { %1216 = vst [vmem:[%s1762_s24 + $0x80] sm:$0xff] %v814_v10  ;;  %1248 = vst [vmem:[%s1762_s24 + $0x180] sm:$0xff] %v942_v11 }
 0x114   : > { %v1522_v12 = vpop.f32.mrf.mxu0  ;;  %v1554_v13 = vpop.f32.mrf.mxu1 }
 0x115   : > { %1219 = vst [vmem:[%s1762_s24 + $0x98] sm:$0xff] %v1522_v12  ;;  %1251 = vst [vmem:[%s1762_s24 + $0x198] sm:$0xff] %v1554_v13 }
 0x116   : > { %v817_v14 = vpop.f32.mrf.mxu0  ;;  %v945_v15 = vpop.f32.mrf.mxu1 }
 0x117   : > { %1217 = vst [vmem:[%s1762_s24 + $0x88] sm:$0xff] %v817_v14  ;;  %1249 = vst [vmem:[%s1762_s24 + $0x188] sm:$0xff] %v945_v15 }
 0x118   : > { %v1525_v16 = vpop.f32.mrf.mxu0  ;;  %v1557_v17 = vpop.f32.mrf.mxu1 }
 0x119   : > { %1222 = vst [vmem:[%s1762_s24 + $0xb0] sm:$0xff] %v1525_v16  ;;  %1254 = vst [vmem:[%s1762_s24 + $0x1b0] sm:$0xff] %v1557_v17 }
 0x11a   : > { %v830_v18 = vpop.f32.mrf.mxu0  ;;  %v958_v19 = vpop.f32.mrf.mxu1 }
 0x11b   : > { %1220 = vst [vmem:[%s1762_s24 + $0xa0] sm:$0xff] %v830_v18  ;;  %1252 = vst [vmem:[%s1762_s24 + $0x1a0] sm:$0xff] %v958_v19 }
 0x11c   : > { %v1526_v20 = vpop.f32.mrf.mxu0  ;;  %v1558_v21 = vpop.f32.mrf.mxu1 }
 0x11d   : > { %1223 = vst [vmem:[%s1762_s24 + $0xb8] sm:$0xff] %v1526_v20  ;;  %1255 = vst [vmem:[%s1762_s24 + $0x1b8] sm:$0xff] %v1558_v21 }
 0x11e   : > { %v833_v22 = vpop.f32.mrf.mxu0  ;;  %v961_v23 = vpop.f32.mrf.mxu1 }
 0x11f   : > { %1221 = vst [vmem:[%s1762_s24 + $0xa8] sm:$0xff] %v833_v22  ;;  %1253 = vst [vmem:[%s1762_s24 + $0x1a8] sm:$0xff] %v961_v23 }
 0x120   : > { %v1529_v24 = vpop.f32.mrf.mxu0  ;;  %v1561_v25 = vpop.f32.mrf.mxu1 }
 0x121   : > { %1226 = vst [vmem:[%s1762_s24 + $0xd0] sm:$0xff] %v1529_v24  ;;  %1258 = vst [vmem:[%s1762_s24 + $0x1d0] sm:$0xff] %v1561_v25 }
 0x122   : > { %v846_v26 = vpop.f32.mrf.mxu0  ;;  %v974_v27 = vpop.f32.mrf.mxu1 }
 0x123   : > { %1224 = vst [vmem:[%s1762_s24 + $0xc0] sm:$0xff] %v846_v26  ;;  %1256 = vst [vmem:[%s1762_s24 + $0x1c0] sm:$0xff] %v974_v27 }
 0x124   : > { %v1530_v28 = vpop.f32.mrf.mxu0  ;;  %v1562_v29 = vpop.f32.mrf.mxu1 }
 0x125   : > { %1227 = vst [vmem:[%s1762_s24 + $0xd8] sm:$0xff] %v1530_v28  ;;  %1259 = vst [vmem:[%s1762_s24 + $0x1d8] sm:$0xff] %v1562_v29 }
 0x126   : > { %v849_v30 = vpop.f32.mrf.mxu0  ;;  %v977_v31 = vpop.f32.mrf.mxu1 }
 0x127   : > { %1225 = vst [vmem:[%s1762_s24 + $0xc8] sm:$0xff] %v849_v30  ;;  %1257 = vst [vmem:[%s1762_s24 + $0x1c8] sm:$0xff] %v977_v31 }
 0x128   : > { %v1533_v32 = vpop.f32.mrf.mxu0  ;;  %v1565_v33 = vpop.f32.mrf.mxu1 }
 0x129   : > { %1230 = vst [vmem:[%s1762_s24 + $0xf0] sm:$0xff] %v1533_v32  ;;  %1262 = vst [vmem:[%s1762_s24 + $0x1f0] sm:$0xff] %v1565_v33 }
 0x12a   : > { %v862_v34 = vpop.f32.mrf.mxu0  ;;  %v990_v35 = vpop.f32.mrf.mxu1 }
 0x12b   : > { %1228 = vst [vmem:[%s1762_s24 + $0xe0] sm:$0xff] %v862_v34  ;;  %1260 = vst [vmem:[%s1762_s24 + $0x1e0] sm:$0xff] %v990_v35 }
 0x12c   : > { %v1534_v36 = vpop.f32.mrf.mxu0  ;;  %v1566_v37 = vpop.f32.mrf.mxu1 }
 0x12d   : > { %1231 = vst [vmem:[%s1762_s24 + $0xf8] sm:$0xff] %v1534_v36  ;;  %1263 = vst [vmem:[%s1762_s24 + $0x1f8] sm:$0xff] %v1566_v37 }
 0x12e   : > { %v865_v38 = vpop.f32.mrf.mxu0  ;;  %v993_v39 = vpop.f32.mrf.mxu1 }
 0x12f   : > { %1229 = vst [vmem:[%s1762_s24 + $0xe8] sm:$0xff] %v865_v38  ;;  %1261 = vst [vmem:[%s1762_s24 + $0x1e8] sm:$0xff] %v993_v39 }
 0x130 PF: > { %s12_s11 = sadd.s32 1, %s1669_s11   ;;  %s1840_s9 = smov %s1665_s10 }
 0x131   : > { %p9_p5 = scmp.ge.s32.totalorder %s12_s11, 6   ;;  %s1841_s10 = smov %s1843_s12 }
 0x133   :  { %11 = sbr.rel (!%p9_p5) target bundleno = 2 (0x2), region = 69 }

// kernel: generator_forward.24
= control target key start
LH: loop header
LB: loop body
LE: loop exit
PB: predicated region body
PF: predicated region fallthrough
CT: control target
= control target key end

     0   :  { %s998_s12 = smov 0   ;;  %s1353_s0 = inlined_call_operand.vmem [shape: f32[2048,8], index: 0, kind: input, shape index: {}]   ;;  %s1354_s1 = inlined_call_operand.vmem [shape: f32[1,8], index: 1, kind: input, shape index: {}]   ;;  %s1355_s2 = inlined_call_operand.vmem [shape: f32[1,8], index: 2, kind: input, shape index: {}]   ;;  %s1356_s3 = inlined_call_operand.vmem [shape: bf16[2048,8], index: 3, kind: output, shape index: {}]  }
   0x1 LB: > { %s821_s13 = sadd.s32 4294967295, %s976_s12   ;;  %p825_p0 = scmp.ge.s32.totalorder %s976_s12, 1  ;;  %s976_s12 = sphi %s998_s12, %s13_s12  }
   0x2   : > { %p138_p1 = scmp.lt.s32.totalorder %s976_s12, 5 }
   0x4   : > { %p139_p2 = pnand %p825_p0, %p138_p1 }
   0x5   : > { %s826_s14 = sshll.u32 (!%p139_p2), %s821_s13, 6 }
   0x6   : > { %142 = sbr.rel (%p139_p2) target bundleno = 90 (0x5a), region = 32  ;;  %p163_p3 = scmp.lt.s32.totalorder (!%p139_p2), %s826_s14, 255 }
   0xb   : > { %s1358_s14 = smov (!%p163_p3, %s826_s14), 255  ;;  %v1012_v0 = vld [vmem:[%s1354_s1] ss:$0 sm:$0xff]  ;;  %vm700_vm0 = vcmask 60416  }
   0xc   : > { %s827_s15 = sshll.u32 %s1358_s14, 3  ;;  %v1022_v1 = vld [vmem:[%s1355_s2] ss:$0 sm:$0xff]  ;;  %s829_s23 = sshll.u32 %s1358_s14, 2 }
   0xd   : > { %s1017_s20 = scalar_lea.vmem %s1353_s0, %s827_s15  ;;  %s1051_s26 = scalar_lea.vmem %s1356_s3, %s829_s23 }
   0xe   : > { %v174_v2 = vld [vmem:[%s1017_s20] sm:$0xff]  ;;  %v175_v3 = vld [vmem:[%s1017_s20 + $0x8] sm:$0xff]  ;;  %v176_v4 = vld [vmem:[%s1017_s20 + $0x10] sm:$0xff] }
   0xf   : > { %v245_v5 = vmul.f32 %v1012_v0, %v174_v2  ;;  %v246_v6 = vmul.f32 %v1012_v0, %v175_v3  ;;  %v247_v7 = vmul.f32 %v1012_v0, %v176_v4  ;;  %v177_v8 = vld [vmem:[%s1017_s20 + $0x18] sm:$0xff]  ;;  %v178_v9 = vld [vmem:[%s1017_s20 + $0x20] sm:$0xff]  ;;  %v179_v10 = vld [vmem:[%s1017_s20 + $0x28] sm:$0xff] }
  0x10   : > { %v248_v11 = vmul.f32 %v1012_v0, %v177_v8  ;;  %v249_v12 = vmul.f32 %v1012_v0, %v178_v9  ;;  %v250_v13 = vmul.f32 %v1012_v0, %v179_v10  ;;  %v180_v14 = vld [vmem:[%s1017_s20 + $0x30] sm:$0xff]  ;;  %v181_v15 = vld [vmem:[%s1017_s20 + $0x38] sm:$0xff]  ;;  %v182_v32 = vld [vmem:[%s1017_s20 + $0x40] sm:$0xff] }
  0x11   : > { %v316_v16 = vadd.f32 %v1022_v1, %v245_v5  ;;  %v317_v17 = vadd.f32 %v1022_v1, %v246_v6  ;;  %v318_v18 = vadd.f32 %v1022_v1, %v247_v7  ;;  %v251_v19 = vmul.f32 %v1012_v0, %v180_v14  ;;  %v183_v33 = vld [vmem:[%s1017_s20 + $0x48] sm:$0xff]  ;;  %v184_v34 = vld [vmem:[%s1017_s20 + $0x50] sm:$0xff]  ;;  %v185_v39 = vld [vmem:[%s1017_s20 + $0x58] sm:$0xff] }
  0x12   : > { %v319_v20 = vadd.f32 %v1022_v1, %v248_v11  ;;  %v320_v21 = vadd.f32 %v1022_v1, %v249_v12  ;;  %v321_v22 = vadd.f32 %v1022_v1, %v250_v13  ;;  %v252_v23 = vmul.f32 %v1012_v0, %v181_v15  ;;  %v186_v40 = vld [vmem:[%s1017_s20 + $0x60] sm:$0xff]  ;;  %v187_v41 = vld [vmem:[%s1017_s20 + $0x68] sm:$0xff]  ;;  %v188_v46 = vld [vmem:[%s1017_s20 + $0x70] sm:$0xff] }
  0x13   : > { %v380_v24 = vmax.f32 %v316_v16, 0.0  ;;  %v381_v25 = vmax.f32 %v317_v17, 0.0  ;;  %v382_v26 = vmax.f32 %v318_v18, 0.0  ;;  %v322_v27 = vadd.f32 %v1022_v1, %v251_v19  ;;  %v189_v51 = vld [vmem:[%s1017_s20 + $0x78] sm:$0xff]  ;;  %v190_v10 = vld [vmem:[%s1017_s20 + $0x80] sm:$0xff]  ;;  %v191_v11 = vld [vmem:[%s1017_s20 + $0x88] sm:$0xff] }
  0x14   : > { %v383_v28 = vmax.f32 %v319_v20, 0.0  ;;  %v384_v29 = vmax.f32 %v320_v21, 0.0  ;;  %v385_v30 = vmax.f32 %v321_v22, 0.0  ;;  %v323_v31 = vadd.f32 %v1022_v1, %v252_v23  ;;  %v192_v12 = vld [vmem:[%s1017_s20 + $0x90] sm:$0xff]  ;;  %v193_v17 = vld [vmem:[%s1017_s20 + $0x98] sm:$0xff]  ;;  %v194_v18 = vld [vmem:[%s1017_s20 + $0xa0] sm:$0xff] }
  0x15   : > { %v898_v35 = vpack.c.bf16 %v380_v24, %v380_v24  ;;  %v899_v36 = vpack.c.bf16 %v381_v25, %v381_v25  ;;  %v900_v37 = vpack.c.bf16 %v382_v26, %v382_v26  ;;  %v386_v38 = vmax.f32 %v322_v27, 0.0  ;;  %v195_v19 = vld [vmem:[%s1017_s20 + $0xa8] sm:$0xff]  ;;  %v196_v24 = vld [vmem:[%s1017_s20 + $0xb0] sm:$0xff] }
  0x16   : > { %v901_v42 = vpack.c.bf16 %v383_v28, %v383_v28  ;;  %v902_v43 = vpack.c.bf16 %v384_v29, %v384_v29  ;;  %v903_v44 = vpack.c.bf16 %v385_v30, %v385_v30  ;;  %v387_v45 = vmax.f32 %v323_v31, 0.0  ;;  %v197_v29 = vld [vmem:[%s1017_s20 + $0xb8] sm:$0xff] }
  0x17   : > { %701 = vst.msk [vmem:[%s1051_s26] sm:$0xf] %vm700_vm0, %v898_v35  ;;  %702 = vst.msk [vmem:[%s1051_s26 + $0x4] sm:$0xf] %vm700_vm0, %v899_v36  ;;  %v904_v47 = vpack.c.bf16 %v386_v38, %v386_v38  ;;  %v253_v48 = vmul.f32 %v1012_v0, %v182_v32  ;;  %v254_v49 = vmul.f32 %v1012_v0, %v183_v33 }
  0x18   : > { %703 = vst.msk [vmem:[%s1051_s26 + $0x8] sm:$0xf] %vm700_vm0, %v900_v37  ;;  %v255_v50 = vmul.f32 %v1012_v0, %v184_v34  ;;  %704 = vst.msk [vmem:[%s1051_s26 + $0xc] sm:$0xf] %vm700_vm0, %v901_v42  ;;  %v905_v52 = vpack.c.bf16 %v387_v45, %v387_v45  ;;  %v256_v53 = vmul.f32 %v1012_v0, %v185_v39 }
  0x19   : > { %705 = vst.msk [vmem:[%s1051_s26 + $0x10] sm:$0xf] %vm700_vm0, %v902_v43  ;;  %706 = vst.msk [vmem:[%s1051_s26 + $0x14] sm:$0xf] %vm700_vm0, %v903_v44  ;;  %v257_v54 = vmul.f32 %v1012_v0, %v186_v40  ;;  %v258_v55 = vmul.f32 %v1012_v0, %v187_v41  ;;  %v324_v56 = vadd.f32 %v1022_v1, %v253_v48 }
  0x1a   : > { %707 = vst.msk [vmem:[%s1051_s26 + $0x18] sm:$0xf] %vm700_vm0, %v904_v47  ;;  %v325_v57 = vadd.f32 %v1022_v1, %v254_v49  ;;  %v326_v58 = vadd.f32 %v1022_v1, %v255_v50  ;;  %v259_v59 = vmul.f32 %v1012_v0, %v188_v46  ;;  %708 = vst.msk [vmem:[%s1051_s26 + $0x1c] sm:$0xf] %vm700_vm0, %v905_v52  ;;  %v198_v50 = vld [vmem:[%s1017_s20 + $0xc0] sm:$0xff]  ;;  %v200_v52 = vld [vmem:[%s1017_s20 + $0xd0] sm:$0xff] }
  0x1b   : > { %v327_v60 = vadd.f32 %v1022_v1, %v256_v53  ;;  %v328_v61 = vadd.f32 %v1022_v1, %v257_v54  ;;  %v329_v62 = vadd.f32 %v1022_v1, %v258_v55  ;;  %v260_v63 = vmul.f32 %v1012_v0, %v189_v51  ;;  %v199_v51 = vld [vmem:[%s1017_s20 + $0xc8] sm:$0xff] }
  0x1c   : > { %v388_v2 = vmax.f32 %v324_v56, 0.0  ;;  %v389_v3 = vmax.f32 %v325_v57, 0.0  ;;  %v390_v4 = vmax.f32 %v326_v58, 0.0  ;;  %v330_v5 = vadd.f32 %v1022_v1, %v259_v59  ;;  %v201_v57 = vld [vmem:[%s1017_s20 + $0xd8] sm:$0xff]  ;;  %v202_v58 = vld [vmem:[%s1017_s20 + $0xe0] sm:$0xff]  ;;  %v203_v59 = vld [vmem:[%s1017_s20 + $0xe8] sm:$0xff] }
  0x1d   : > { %v391_v6 = vmax.f32 %v327_v60, 0.0  ;;  %v392_v7 = vmax.f32 %v328_v61, 0.0  ;;  %v393_v8 = vmax.f32 %v329_v62, 0.0  ;;  %v331_v9 = vadd.f32 %v1022_v1, %v260_v63 }
  0x1e   : > { %v906_v13 = vpack.c.bf16 %v388_v2, %v388_v2  ;;  %v907_v14 = vpack.c.bf16 %v389_v3, %v389_v3  ;;  %v908_v15 = vpack.c.bf16 %v390_v4, %v390_v4  ;;  %v394_v16 = vmax.f32 %v330_v5, 0.0  ;;  %v204_v2 = vld [vmem:[%s1017_s20 + $0xf0] sm:$0xff] }
  0x1f   : > { %v909_v20 = vpack.c.bf16 %v391_v6, %v391_v6  ;;  %v910_v21 = vpack.c.bf16 %v392_v7, %v392_v7  ;;  %v911_v22 = vpack.c.bf16 %v393_v8, %v393_v8  ;;  %v395_v23 = vmax.f32 %v331_v9, 0.0  ;;  %v205_v7 = vld [vmem:[%s1017_s20 + $0xf8] sm:$0xff] }
  0x20   : > { %709 = vst.msk [vmem:[%s1051_s26 + $0x20] sm:$0xf] %vm700_vm0, %v906_v13  ;;  %710 = vst.msk [vmem:[%s1051_s26 + $0x24] sm:$0xf] %vm700_vm0, %v907_v14  ;;  %v912_v25 = vpack.c.bf16 %v394_v16, %v394_v16  ;;  %v261_v26 = vmul.f32 %v1012_v0, %v190_v10  ;;  %v262_v27 = vmul.f32 %v1012_v0, %v191_v11 }
  0x21   : > { %711 = vst.msk [vmem:[%s1051_s26 + $0x28] sm:$0xf] %vm700_vm0, %v908_v15  ;;  %v263_v28 = vmul.f32 %v1012_v0, %v192_v12  ;;  %712 = vst.msk [vmem:[%s1051_s26 + $0x2c] sm:$0xf] %vm700_vm0, %v909_v20  ;;  %v913_v30 = vpack.c.bf16 %v395_v23, %v395_v23  ;;  %v264_v31 = vmul.f32 %v1012_v0, %v193_v17 }
  0x22   : > { %713 = vst.msk [vmem:[%s1051_s26 + $0x30] sm:$0xf] %vm700_vm0, %v910_v21  ;;  %714 = vst.msk [vmem:[%s1051_s26 + $0x34] sm:$0xf] %vm700_vm0, %v911_v22  ;;  %v265_v32 = vmul.f32 %v1012_v0, %v194_v18  ;;  %v266_v33 = vmul.f32 %v1012_v0, %v195_v19  ;;  %v332_v34 = vadd.f32 %v1022_v1, %v261_v26 }
  0x23   : > { %715 = vst.msk [vmem:[%s1051_s26 + $0x38] sm:$0xf] %vm700_vm0, %v912_v25  ;;  %v333_v35 = vadd.f32 %v1022_v1, %v262_v27  ;;  %v334_v36 = vadd.f32 %v1022_v1, %v263_v28  ;;  %v267_v37 = vmul.f32 %v1012_v0, %v196_v24  ;;  %716 = vst.msk [vmem:[%s1051_s26 + $0x3c] sm:$0xf] %vm700_vm0, %v913_v30  ;;  %v206_v28 = vld [vmem:[%s1017_s20 + $0x100] sm:$0xff]  ;;  %v208_v30 = vld [vmem:[%s1017_s20 + $0x110] sm:$0xff] }
  0x24   : > { %v335_v38 = vadd.f32 %v1022_v1, %v264_v31  ;;  %v336_v39 = vadd.f32 %v1022_v1, %v265_v32  ;;  %v337_v40 = vadd.f32 %v1022_v1, %v266_v33  ;;  %v268_v41 = vmul.f32 %v1012_v0, %v197_v29  ;;  %v207_v29 = vld [vmem:[%s1017_s20 + $0x108] sm:$0xff] }
  0x25   : > { %v396_v42 = vmax.f32 %v332_v34, 0.0  ;;  %v397_v43 = vmax.f32 %v333_v35, 0.0  ;;  %v398_v44 = vmax.f32 %v334_v36, 0.0  ;;  %v338_v45 = vadd.f32 %v1022_v1, %v267_v37  ;;  %v209_v35 = vld [vmem:[%s1017_s20 + $0x118] sm:$0xff]  ;;  %v210_v36 = vld [vmem:[%s1017_s20 + $0x120] sm:$0xff]  ;;  %v211_v37 = vld [vmem:[%s1017_s20 + $0x128] sm:$0xff] }
  0x26   : > { %v399_v46 = vmax.f32 %v335_v38, 0.0  ;;  %v400_v47 = vmax.f32 %v336_v39, 0.0  ;;  %v401_v48 = vmax.f32 %v337_v40, 0.0  ;;  %v339_v49 = vadd.f32 %v1022_v1, %v268_v41 }
  0x27   : > { %v914_v53 = vpack.c.bf16 %v396_v42, %v396_v42  ;;  %v915_v54 = vpack.c.bf16 %v397_v43, %v397_v43  ;;  %v916_v55 = vpack.c.bf16 %v398_v44, %v398_v44  ;;  %v402_v56 = vmax.f32 %v338_v45, 0.0  ;;  %v212_v42 = vld [vmem:[%s1017_s20 + $0x130] sm:$0xff] }
  0x28   : > { %v917_v60 = vpack.c.bf16 %v399_v46, %v399_v46  ;;  %v918_v61 = vpack.c.bf16 %v400_v47, %v400_v47  ;;  %v919_v62 = vpack.c.bf16 %v401_v48, %v401_v48  ;;  %v403_v63 = vmax.f32 %v339_v49, 0.0  ;;  %v213_v47 = vld [vmem:[%s1017_s20 + $0x138] sm:$0xff] }
  0x29   : > { %717 = vst.msk [vmem:[%s1051_s26 + $0x40] sm:$0xf] %vm700_vm0, %v914_v53  ;;  %718 = vst.msk [vmem:[%s1051_s26 + $0x44] sm:$0xf] %vm700_vm0, %v915_v54  ;;  %v920_v3 = vpack.c.bf16 %v402_v56, %v402_v56  ;;  %v269_v4 = vmul.f32 %v1012_v0, %v198_v50  ;;  %v270_v5 = vmul.f32 %v1012_v0, %v199_v51 }
  0x2a   : > { %719 = vst.msk [vmem:[%s1051_s26 + $0x48] sm:$0xf] %vm700_vm0, %v916_v55  ;;  %v271_v6 = vmul.f32 %v1012_v0, %v200_v52  ;;  %720 = vst.msk [vmem:[%s1051_s26 + $0x4c] sm:$0xf] %vm700_vm0, %v917_v60  ;;  %v921_v8 = vpack.c.bf16 %v403_v63, %v403_v63  ;;  %v272_v9 = vmul.f32 %v1012_v0, %v201_v57 }
  0x2b   : > { %721 = vst.msk [vmem:[%s1051_s26 + $0x50] sm:$0xf] %vm700_vm0, %v918_v61  ;;  %722 = vst.msk [vmem:[%s1051_s26 + $0x54] sm:$0xf] %vm700_vm0, %v919_v62  ;;  %v273_v10 = vmul.f32 %v1012_v0, %v202_v58  ;;  %v274_v11 = vmul.f32 %v1012_v0, %v203_v59  ;;  %v340_v12 = vadd.f32 %v1022_v1, %v269_v4 }
  0x2c   : > { %723 = vst.msk [vmem:[%s1051_s26 + $0x58] sm:$0xf] %vm700_vm0, %v920_v3  ;;  %v341_v13 = vadd.f32 %v1022_v1, %v270_v5  ;;  %v342_v14 = vadd.f32 %v1022_v1, %v271_v6  ;;  %v275_v15 = vmul.f32 %v1012_v0, %v204_v2  ;;  %724 = vst.msk [vmem:[%s1051_s26 + $0x5c] sm:$0xf] %vm700_vm0, %v921_v8  ;;  %v214_v6 = vld [vmem:[%s1017_s20 + $0x140] sm:$0xff]  ;;  %v216_v8 = vld [vmem:[%s1017_s20 + $0x150] sm:$0xff] }
  0x2d   : > { %v343_v16 = vadd.f32 %v1022_v1, %v272_v9  ;;  %v344_v17 = vadd.f32 %v1022_v1, %v273_v10  ;;  %v345_v18 = vadd.f32 %v1022_v1, %v274_v11  ;;  %v276_v19 = vmul.f32 %v1012_v0, %v205_v7  ;;  %v215_v7 = vld [vmem:[%s1017_s20 + $0x148] sm:$0xff] }
  0x2e   : > { %v404_v20 = vmax.f32 %v340_v12, 0.0  ;;  %v405_v21 = vmax.f32 %v341_v13, 0.0  ;;  %v406_v22 = vmax.f32 %v342_v14, 0.0  ;;  %v346_v23 = vadd.f32 %v1022_v1, %v275_v15  ;;  %v217_v13 = vld [vmem:[%s1017_s20 + $0x158] sm:$0xff]  ;;  %v218_v14 = vld [vmem:[%s1017_s20 + $0x160] sm:$0xff]  ;;  %v219_v15 = vld [vmem:[%s1017_s20 + $0x168] sm:$0xff] }
  0x2f   : > { %v407_v24 = vmax.f32 %v343_v16, 0.0  ;;  %v408_v25 = vmax.f32 %v344_v17, 0.0  ;;  %v409_v26 = vmax.f32 %v345_v18, 0.0  ;;  %v347_v27 = vadd.f32 %v1022_v1, %v276_v19 }
  0x30   : > { %v922_v31 = vpack.c.bf16 %v404_v20, %v404_v20  ;;  %v923_v32 = vpack.c.bf16 %v405_v21, %v405_v21  ;;  %v924_v33 = vpack.c.bf16 %v406_v22, %v406_v22  ;;  %v410_v34 = vmax.f32 %v346_v23, 0.0  ;;  %v220_v20 = vld [vmem:[%s1017_s20 + $0x170] sm:$0xff] }
  0x31   : > { %v925_v38 = vpack.c.bf16 %v407_v24, %v407_v24  ;;  %v926_v39 = vpack.c.bf16 %v408_v25, %v408_v25  ;;  %v927_v40 = vpack.c.bf16 %v409_v26, %v409_v26  ;;  %v411_v41 = vmax.f32 %v347_v27, 0.0  ;;  %v221_v25 = vld [vmem:[%s1017_s20 + $0x178] sm:$0xff] }
  0x32   : > { %725 = vst.msk [vmem:[%s1051_s26 + $0x60] sm:$0xf] %vm700_vm0, %v922_v31  ;;  %726 = vst.msk [vmem:[%s1051_s26 + $0x64] sm:$0xf] %vm700_vm0, %v923_v32  ;;  %v928_v43 = vpack.c.bf16 %v410_v34, %v410_v34  ;;  %v277_v44 = vmul.f32 %v1012_v0, %v206_v28  ;;  %v278_v45 = vmul.f32 %v1012_v0, %v207_v29 }
  0x33   : > { %727 = vst.msk [vmem:[%s1051_s26 + $0x68] sm:$0xf] %vm700_vm0, %v924_v33  ;;  %v279_v46 = vmul.f32 %v1012_v0, %v208_v30  ;;  %728 = vst.msk [vmem:[%s1051_s26 + $0x6c] sm:$0xf] %vm700_vm0, %v925_v38  ;;  %v929_v48 = vpack.c.bf16 %v411_v41, %v411_v41  ;;  %v280_v49 = vmul.f32 %v1012_v0, %v209_v35 }
  0x34   : > { %729 = vst.msk [vmem:[%s1051_s26 + $0x70] sm:$0xf] %vm700_vm0, %v926_v39  ;;  %730 = vst.msk [vmem:[%s1051_s26 + $0x74] sm:$0xf] %vm700_vm0, %v927_v40  ;;  %v281_v50 = vmul.f32 %v1012_v0, %v210_v36  ;;  %v282_v51 = vmul.f32 %v1012_v0, %v211_v37  ;;  %v348_v52 = vadd.f32 %v1022_v1, %v277_v44 }
  0x35   : > { %731 = vst.msk [vmem:[%s1051_s26 + $0x78] sm:$0xf] %vm700_vm0, %v928_v43  ;;  %v349_v53 = vadd.f32 %v1022_v1, %v278_v45  ;;  %v350_v54 = vadd.f32 %v1022_v1, %v279_v46  ;;  %v283_v55 = vmul.f32 %v1012_v0, %v212_v42  ;;  %732 = vst.msk [vmem:[%s1051_s26 + $0x7c] sm:$0xf] %vm700_vm0, %v929_v48  ;;  %v222_v46 = vld [vmem:[%s1017_s20 + $0x180] sm:$0xff]  ;;  %v224_v48 = vld [vmem:[%s1017_s20 + $0x190] sm:$0xff] }
  0x36   : > { %v351_v56 = vadd.f32 %v1022_v1, %v280_v49  ;;  %v352_v57 = vadd.f32 %v1022_v1, %v281_v50  ;;  %v353_v58 = vadd.f32 %v1022_v1, %v282_v51  ;;  %v284_v59 = vmul.f32 %v1012_v0, %v213_v47  ;;  %v223_v47 = vld [vmem:[%s1017_s20 + $0x188] sm:$0xff] }
  0x37   : > { %v412_v60 = vmax.f32 %v348_v52, 0.0  ;;  %v413_v61 = vmax.f32 %v349_v53, 0.0  ;;  %v414_v62 = vmax.f32 %v350_v54, 0.0  ;;  %v354_v63 = vadd.f32 %v1022_v1, %v283_v55  ;;  %v225_v53 = vld [vmem:[%s1017_s20 + $0x198] sm:$0xff]  ;;  %v226_v54 = vld [vmem:[%s1017_s20 + $0x1a0] sm:$0xff]  ;;  %v227_v55 = vld [vmem:[%s1017_s20 + $0x1a8] sm:$0xff] }
  0x38   : > { %v415_v2 = vmax.f32 %v351_v56, 0.0  ;;  %v416_v3 = vmax.f32 %v352_v57, 0.0  ;;  %v417_v4 = vmax.f32 %v353_v58, 0.0  ;;  %v355_v5 = vadd.f32 %v1022_v1, %v284_v59 }
  0x39   : > { %v930_v9 = vpack.c.bf16 %v412_v60, %v412_v60  ;;  %v931_v10 = vpack.c.bf16 %v413_v61, %v413_v61  ;;  %v932_v11 = vpack.c.bf16 %v414_v62, %v414_v62  ;;  %v418_v12 = vmax.f32 %v354_v63, 0.0  ;;  %v228_v60 = vld [vmem:[%s1017_s20 + $0x1b0] sm:$0xff] }
  0x3a   : > { %v933_v16 = vpack.c.bf16 %v415_v2, %v415_v2  ;;  %v934_v17 = vpack.c.bf16 %v416_v3, %v416_v3  ;;  %v935_v18 = vpack.c.bf16 %v417_v4, %v417_v4  ;;  %v419_v19 = vmax.f32 %v355_v5, 0.0  ;;  %v229_v3 = vld [vmem:[%s1017_s20 + $0x1b8] sm:$0xff] }
  0x3b   : > { %733 = vst.msk [vmem:[%s1051_s26 + $0x80] sm:$0xf] %vm700_vm0, %v930_v9  ;;  %734 = vst.msk [vmem:[%s1051_s26 + $0x84] sm:$0xf] %vm700_vm0, %v931_v10  ;;  %v936_v21 = vpack.c.bf16 %v418_v12, %v418_v12  ;;  %v285_v22 = vmul.f32 %v1012_v0, %v214_v6  ;;  %v286_v23 = vmul.f32 %v1012_v0, %v215_v7 }
  0x3c   : > { %735 = vst.msk [vmem:[%s1051_s26 + $0x88] sm:$0xf] %vm700_vm0, %v932_v11  ;;  %v287_v24 = vmul.f32 %v1012_v0, %v216_v8  ;;  %736 = vst.msk [vmem:[%s1051_s26 + $0x8c] sm:$0xf] %vm700_vm0, %v933_v16  ;;  %v937_v26 = vpack.c.bf16 %v419_v19, %v419_v19  ;;  %v288_v27 = vmul.f32 %v1012_v0, %v217_v13 }
  0x3d   : > { %737 = vst.msk [vmem:[%s1051_s26 + $0x90] sm:$0xf] %vm700_vm0, %v934_v17  ;;  %738 = vst.msk [vmem:[%s1051_s26 + $0x94] sm:$0xf] %vm700_vm0, %v935_v18  ;;  %v289_v28 = vmul.f32 %v1012_v0, %v218_v14  ;;  %v290_v29 = vmul.f32 %v1012_v0, %v219_v15  ;;  %v356_v30 = vadd.f32 %v1022_v1, %v285_v22 }
  0x3e   : > { %739 = vst.msk [vmem:[%s1051_s26 + $0x98] sm:$0xf] %vm700_vm0, %v936_v21  ;;  %v357_v31 = vadd.f32 %v1022_v1, %v286_v23  ;;  %v358_v32 = vadd.f32 %v1022_v1, %v287_v24  ;;  %v291_v33 = vmul.f32 %v1012_v0, %v220_v20  ;;  %740 = vst.msk [vmem:[%s1051_s26 + $0x9c] sm:$0xf] %vm700_vm0, %v937_v26  ;;  %v230_v24 = vld [vmem:[%s1017_s20 + $0x1c0] sm:$0xff]  ;;  %v232_v26 = vld [vmem:[%s1017_s20 + $0x1d0] sm:$0xff] }
  0x3f   : > { %v359_v34 = vadd.f32 %v1022_v1, %v288_v27  ;;  %v360_v35 = vadd.f32 %v1022_v1, %v289_v28  ;;  %v361_v36 = vadd.f32 %v1022_v1, %v290_v29  ;;  %v292_v37 = vmul.f32 %v1012_v0, %v221_v25  ;;  %v231_v25 = vld [vmem:[%s1017_s20 + $0x1c8] sm:$0xff] }
  0x40   : > { %v420_v38 = vmax.f32 %v356_v30, 0.0  ;;  %v421_v39 = vmax.f32 %v357_v31, 0.0  ;;  %v422_v40 = vmax.f32 %v358_v32, 0.0  ;;  %v362_v41 = vadd.f32 %v1022_v1, %v291_v33  ;;  %v233_v31 = vld [vmem:[%s1017_s20 + $0x1d8] sm:$0xff]  ;;  %v234_v32 = vld [vmem:[%s1017_s20 + $0x1e0] sm:$0xff]  ;;  %v235_v33 = vld [vmem:[%s1017_s20 + $0x1e8] sm:$0xff] }
  0x41   : > { %v423_v42 = vmax.f32 %v359_v34, 0.0  ;;  %v424_v43 = vmax.f32 %v360_v35, 0.0  ;;  %v425_v44 = vmax.f32 %v361_v36, 0.0  ;;  %v363_v45 = vadd.f32 %v1022_v1, %v292_v37 }
  0x42   : > { %v938_v49 = vpack.c.bf16 %v420_v38, %v420_v38  ;;  %v939_v50 = vpack.c.bf16 %v421_v39, %v421_v39  ;;  %v940_v51 = vpack.c.bf16 %v422_v40, %v422_v40  ;;  %v426_v52 = vmax.f32 %v362_v41, 0.0  ;;  %v236_v38 = vld [vmem:[%s1017_s20 + $0x1f0] sm:$0xff] }
  0x43   : > { %v941_v56 = vpack.c.bf16 %v423_v42, %v423_v42  ;;  %v942_v57 = vpack.c.bf16 %v424_v43, %v424_v43  ;;  %v943_v58 = vpack.c.bf16 %v425_v44, %v425_v44  ;;  %v427_v59 = vmax.f32 %v363_v45, 0.0  ;;  %v237_v43 = vld [vmem:[%s1017_s20 + $0x1f8] sm:$0xff] }
  0x44   : > { %741 = vst.msk [vmem:[%s1051_s26 + $0xa0] sm:$0xf] %vm700_vm0, %v938_v49  ;;  %742 = vst.msk [vmem:[%s1051_s26 + $0xa4] sm:$0xf] %vm700_vm0, %v939_v50  ;;  %v944_v61 = vpack.c.bf16 %v426_v52, %v426_v52  ;;  %v293_v62 = vmul.f32 %v1012_v0, %v222_v46  ;;  %v294_v63 = vmul.f32 %v1012_v0, %v223_v47 }
  0x45   : > { %743 = vst.msk [vmem:[%s1051_s26 + $0xa8] sm:$0xf] %vm700_vm0, %v940_v51  ;;  %v295_v2 = vmul.f32 %v1012_v0, %v224_v48  ;;  %744 = vst.msk [vmem:[%s1051_s26 + $0xac] sm:$0xf] %vm700_vm0, %v941_v56  ;;  %v945_v4 = vpack.c.bf16 %v427_v59, %v427_v59  ;;  %v296_v5 = vmul.f32 %v1012_v0, %v225_v53 }
  0x46   : > { %745 = vst.msk [vmem:[%s1051_s26 + $0xb0] sm:$0xf] %vm700_vm0, %v942_v57  ;;  %746 = vst.msk [vmem:[%s1051_s26 + $0xb4] sm:$0xf] %vm700_vm0, %v943_v58  ;;  %v297_v6 = vmul.f32 %v1012_v0, %v226_v54  ;;  %v298_v7 = vmul.f32 %v1012_v0, %v227_v55  ;;  %v364_v8 = vadd.f32 %v1022_v1, %v293_v62 }
  0x47   : > { %747 = vst.msk [vmem:[%s1051_s26 + $0xb8] sm:$0xf] %vm700_vm0, %v944_v61  ;;  %v365_v9 = vadd.f32 %v1022_v1, %v294_v63  ;;  %v366_v10 = vadd.f32 %v1022_v1, %v295_v2  ;;  %v299_v11 = vmul.f32 %v1012_v0, %v228_v60  ;;  %748 = vst.msk [vmem:[%s1051_s26 + $0xbc] sm:$0xf] %vm700_vm0, %v945_v4 }
  0x48   : > { %v367_v12 = vadd.f32 %v1022_v1, %v296_v5  ;;  %v368_v13 = vadd.f32 %v1022_v1, %v297_v6  ;;  %v369_v14 = vadd.f32 %v1022_v1, %v298_v7  ;;  %v300_v15 = vmul.f32 %v1012_v0, %v229_v3 }
  0x49   : > { %v428_v16 = vmax.f32 %v364_v8, 0.0  ;;  %v429_v17 = vmax.f32 %v365_v9, 0.0  ;;  %v430_v18 = vmax.f32 %v366_v10, 0.0  ;;  %v370_v19 = vadd.f32 %v1022_v1, %v299_v11 }
  0x4a   : > { %v431_v20 = vmax.f32 %v367_v12, 0.0  ;;  %v432_v21 = vmax.f32 %v368_v13, 0.0  ;;  %v433_v22 = vmax.f32 %v369_v14, 0.0  ;;  %v371_v23 = vadd.f32 %v1022_v1, %v300_v15 }
  0x4b   : > { %v946_v27 = vpack.c.bf16 %v428_v16, %v428_v16  ;;  %v947_v28 = vpack.c.bf16 %v429_v17, %v429_v17  ;;  %v948_v29 = vpack.c.bf16 %v430_v18, %v430_v18  ;;  %v434_v30 = vmax.f32 %v370_v19, 0.0 }
  0x4c   : > { %v949_v34 = vpack.c.bf16 %v431_v20, %v431_v20  ;;  %v950_v35 = vpack.c.bf16 %v432_v21, %v432_v21  ;;  %v951_v36 = vpack.c.bf16 %v433_v22, %v433_v22  ;;  %v435_v37 = vmax.f32 %v371_v23, 0.0 }
  0x4d   : > { %749 = vst.msk [vmem:[%s1051_s26 + $0xc0] sm:$0xf] %vm700_vm0, %v946_v27  ;;  %750 = vst.msk [vmem:[%s1051_s26 + $0xc4] sm:$0xf] %vm700_vm0, %v947_v28  ;;  %v952_v39 = vpack.c.bf16 %v434_v30, %v434_v30  ;;  %v301_v40 = vmul.f32 %v1012_v0, %v230_v24  ;;  %v302_v41 = vmul.f32 %v1012_v0, %v231_v25 }
  0x4e   : > { %751 = vst.msk [vmem:[%s1051_s26 + $0xc8] sm:$0xf] %vm700_vm0, %v948_v29  ;;  %v303_v42 = vmul.f32 %v1012_v0, %v232_v26  ;;  %752 = vst.msk [vmem:[%s1051_s26 + $0xcc] sm:$0xf] %vm700_vm0, %v949_v34  ;;  %v953_v44 = vpack.c.bf16 %v435_v37, %v435_v37  ;;  %v304_v45 = vmul.f32 %v1012_v0, %v233_v31 }
  0x4f   : > { %753 = vst.msk [vmem:[%s1051_s26 + $0xd0] sm:$0xf] %vm700_vm0, %v950_v35  ;;  %754 = vst.msk [vmem:[%s1051_s26 + $0xd4] sm:$0xf] %vm700_vm0, %v951_v36  ;;  %v305_v46 = vmul.f32 %v1012_v0, %v234_v32  ;;  %v306_v47 = vmul.f32 %v1012_v0, %v235_v33  ;;  %v372_v48 = vadd.f32 %v1022_v1, %v301_v40 }
  0x50   : > { %755 = vst.msk [vmem:[%s1051_s26 + $0xd8] sm:$0xf] %vm700_vm0, %v952_v39  ;;  %v373_v49 = vadd.f32 %v1022_v1, %v302_v41  ;;  %v374_v50 = vadd.f32 %v1022_v1, %v303_v42  ;;  %v307_v51 = vmul.f32 %v1012_v0, %v236_v38  ;;  %756 = vst.msk [vmem:[%s1051_s26 + $0xdc] sm:$0xf] %vm700_vm0, %v953_v44 }
  0x51   : > { %v375_v52 = vadd.f32 %v1022_v1, %v304_v45  ;;  %v376_v53 = vadd.f32 %v1022_v1, %v305_v46  ;;  %v377_v54 = vadd.f32 %v1022_v1, %v306_v47  ;;  %v308_v55 = vmul.f32 %v1012_v0, %v237_v43 }
  0x52   : > { %v436_v56 = vmax.f32 %v372_v48, 0.0  ;;  %v437_v57 = vmax.f32 %v373_v49, 0.0  ;;  %v438_v58 = vmax.f32 %v374_v50, 0.0  ;;  %v378_v59 = vadd.f32 %v1022_v1, %v307_v51 }
  0x53   : > { %v439_v60 = vmax.f32 %v375_v52, 0.0  ;;  %v440_v61 = vmax.f32 %v376_v53, 0.0  ;;  %v441_v62 = vmax.f32 %v377_v54, 0.0  ;;  %v379_v63 = vadd.f32 %v1022_v1, %v308_v55 }
  0x54   : > { %v954_v2 = vpack.c.bf16 %v436_v56, %v436_v56  ;;  %v955_v3 = vpack.c.bf16 %v437_v57, %v437_v57  ;;  %v956_v0 = vpack.c.bf16 %v438_v58, %v438_v58  ;;  %v442_v4 = vmax.f32 %v378_v59, 0.0 }
  0x55   : > { %v957_v5 = vpack.c.bf16 %v439_v60, %v439_v60  ;;  %v958_v6 = vpack.c.bf16 %v440_v61, %v440_v61  ;;  %v959_v7 = vpack.c.bf16 %v441_v62, %v441_v62  ;;  %v443_v8 = vmax.f32 %v379_v63, 0.0 }
  0x56   : > { %757 = vst.msk [vmem:[%s1051_s26 + $0xe0] sm:$0xf] %vm700_vm0, %v954_v2  ;;  %758 = vst.msk [vmem:[%s1051_s26 + $0xe4] sm:$0xf] %vm700_vm0, %v955_v3  ;;  %v960_v9 = vpack.c.bf16 %v442_v4, %v442_v4 }
  0x57   : > { %759 = vst.msk [vmem:[%s1051_s26 + $0xe8] sm:$0xf] %vm700_vm0, %v956_v0  ;;  %760 = vst.msk [vmem:[%s1051_s26 + $0xec] sm:$0xf] %vm700_vm0, %v957_v5  ;;  %v961_v1 = vpack.c.bf16 %v443_v8, %v443_v8 }
  0x58   : > { %761 = vst.msk [vmem:[%s1051_s26 + $0xf0] sm:$0xf] %vm700_vm0, %v958_v6  ;;  %762 = vst.msk [vmem:[%s1051_s26 + $0xf4] sm:$0xf] %vm700_vm0, %v959_v7 }
  0x59   : > { %763 = vst.msk [vmem:[%s1051_s26 + $0xf8] sm:$0xf] %vm700_vm0, %v960_v9  ;;  %764 = vst.msk [vmem:[%s1051_s26 + $0xfc] sm:$0xf] %vm700_vm0, %v961_v1 }
  0x5a PF: > { %s13_s12 = sadd.s32 1, %s976_s12  }
  0x5b   : > { %p10_p4 = scmp.ge.s32.totalorder %s13_s12, 6  }
  0x5d   :  { %12 = sbr.rel (!%p10_p4) target bundleno = 1 (0x1), region = 62 }

// kernel: generator_forward.25
= control target key start
LH: loop header
LB: loop body
LE: loop exit
PB: predicated region body
PF: predicated region fallthrough
CT: control target
= control target key end

     0   :  { %s1021_s9 = smov 0   ;;  %s1023_s10 = smov 0   ;;  %s1228_s0 = inlined_call_operand.vmem [shape: bf16[4,16,128], index: 0, kind: input, shape index: {}]   ;;  %s1229_s1 = inlined_call_operand.vmem [shape: bf16[4,128,2048], index: 1, kind: input, shape index: {}]   ;;  %s1230_s2 = inlined_call_operand.vmem [shape: f32[4,16,2048], index: 2, kind: output, shape index: {}]  }
   0x1   :  { %s1025_s11 = smov 0   ;;  %s1027_s12 = smov 0  }
   0x2   :  { %s1029_s13 = smov 0   ;;  %s1031_s14 = smov 0  }
   0x3   :  { %s1033_s15 = smov 0  }
   0x4 LB: > { %s27_s16 = sadd.s32 1, %s995_s13  ;;  %s31_s17 = sadd.s32 1, %s999_s14  ;;  %s1003_s15 = sphi %s1033_s15, %s12_s15   ;;  %s999_s14 = sphi %s1031_s14, %s1237_s14   ;;  %s995_s13 = sphi %s1029_s13, %s1236_s13   ;;  %s991_s12 = sphi %s1027_s12, %s1235_s12   ;;  %s987_s11 = sphi %s1025_s11, %s1234_s11   ;;  %s983_s10 = sphi %s1023_s10, %s1233_s10   ;;  %s979_s9 = sphi %s1021_s9, %s1232_s9  }
   0x5   : > { %p29_p0 = scmp.ge.s32.totalorder %s27_s16, 4  ;;  %s774_s18 = sadd.s32 4294967295, %s1003_s15  }
   0x6   : > { %p77_p1 = scmp.ne.s32.totalorder %s983_s10, %s979_s9  ;;  %p78_p2 = scmp.eq.s32.totalorder %s1003_s15, 0 }
   0x7   : > { %s1239_s16 = smov (%p29_p0, %s27_s16), 0  ;;  %s1241_s17 = smov (!%p29_p0, %s31_s17), %s999_s14 }
   0x8   : > { %p33_p3 = scmp.ge.s32.totalorder %s1241_s17, 4  ;;  %p109_p4 = scmp.eq.s32.totalorder %s774_s18, 15 }
   0x9   : > { %s66_s19 = ssub.s32 %s995_s13, %s1239_s16  ;;  %p79_p5 = por %p78_p2, %p77_p1 }
   0xa   : > { %s1243_s17 = smov (%p33_p3, %s1241_s17), 0  ;;  %p1069_p6 = por %p109_p4, %p77_p1 }
   0xb   : > { %s63_s21 = ssub.s32 %s999_s14, %s1243_s17  ;;  %s70_s23 = sadd.s32 1, %s983_s10 }
   0xc   : > { %s67_s22 = sor.u32 %s66_s19, %s63_s21  ;;  %p777_p8 = scmp.ge.s32.totalorder %s1003_s15, 16 }
   0xd   : > { %p68_p7 = scmp.eq.s32.totalorder %s67_s22, 0 }
   0xe   : > { %131 = sbr.rel (%p777_p8) target bundleno = 42 (0x2a), region = 16 }
   0xf   : > { %s1077_s24 = scalar_select %p68_p7, %s983_s10, %s70_s23  }
  0x13   : > { %145 = sbr.rel (!%p79_p5) target bundleno = 42 (0x2a), region = 24  ;;  %s147_s25 = sand.u32 (%p79_p5), 1, %s983_s10  }
  0x14   : > { %s779_s26 = sshll.u32 (%p79_p5), %s995_s13, 2  ;;  %s778_s27 = sshll.u32 (%p79_p5), %s147_s25, 8 }
  0x15   : > { %s780_s28 = sshll.u32 (%p79_p5), %s999_s14, 8  ;;  %s1091_s6 = scalar_lea.vmem (%p79_p5), [#allocation3], %s778_s27 }
  0x16   : > { %s155_s29 = sadd.s32 (%p79_p5), %s780_s28, %s779_s26 }
  0x17   : > { %s781_s30 = sshll.u32 (%p79_p5), %s155_s29, 2 }
  0x18   : > { %s1086_s5 = scalar_lea.vmem %s1229_s1, %s781_s30 }
  0x19   : > { %v170_v0 = vld [vmem:[%s1086_s5] sm:$0xff]  ;;  %v172_v1 = vld [vmem:[%s1086_s5 + $0x8] sm:$0xff] }
  0x1a   : > { %v174_v2 = vld [vmem:[%s1086_s5 + $0x40] sm:$0xff]  ;;  %171 = vst [vmem:[%s1091_s6] sm:$0xff] %v170_v0  ;;  %173 = vst [vmem:[%s1091_s6 + $0x8] sm:$0xff] %v172_v1  ;;  %v176_v3 = vld [vmem:[%s1086_s5 + $0x48] sm:$0xff] }
  0x1b   : > { %175 = vst [vmem:[%s1091_s6 + $0x10] sm:$0xff] %v174_v2  ;;  %v178_v4 = vld [vmem:[%s1086_s5 + $0x80] sm:$0xff]  ;;  %v180_v5 = vld [vmem:[%s1086_s5 + $0x88] sm:$0xff]  ;;  %177 = vst [vmem:[%s1091_s6 + $0x18] sm:$0xff] %v176_v3 }
  0x1c   : > { %179 = vst [vmem:[%s1091_s6 + $0x20] sm:$0xff] %v178_v4  ;;  %181 = vst [vmem:[%s1091_s6 + $0x28] sm:$0xff] %v180_v5  ;;  %v182_v6 = vld [vmem:[%s1086_s5 + $0xc0] sm:$0xff]  ;;  %v184_v7 = vld [vmem:[%s1086_s5 + $0xc8] sm:$0xff] }
  0x1d   : > { %v186_v8 = vld [vmem:[%s1086_s5 + $0x100] sm:$0xff]  ;;  %183 = vst [vmem:[%s1091_s6 + $0x30] sm:$0xff] %v182_v6  ;;  %185 = vst [vmem:[%s1091_s6 + $0x38] sm:$0xff] %v184_v7  ;;  %v188_v9 = vld [vmem:[%s1086_s5 + $0x108] sm:$0xff] }
  0x1e   : > { %187 = vst [vmem:[%s1091_s6 + $0x40] sm:$0xff] %v186_v8  ;;  %v190_v10 = vld [vmem:[%s1086_s5 + $0x140] sm:$0xff]  ;;  %v192_v11 = vld [vmem:[%s1086_s5 + $0x148] sm:$0xff]  ;;  %189 = vst [vmem:[%s1091_s6 + $0x48] sm:$0xff] %v188_v9 }
  0x1f   : > { %191 = vst [vmem:[%s1091_s6 + $0x50] sm:$0xff] %v190_v10  ;;  %193 = vst [vmem:[%s1091_s6 + $0x58] sm:$0xff] %v192_v11  ;;  %v194_v12 = vld [vmem:[%s1086_s5 + $0x180] sm:$0xff]  ;;  %v196_v13 = vld [vmem:[%s1086_s5 + $0x188] sm:$0xff] }
  0x20   : > { %v198_v14 = vld [vmem:[%s1086_s5 + $0x1c0] sm:$0xff]  ;;  %195 = vst [vmem:[%s1091_s6 + $0x60] sm:$0xff] %v194_v12  ;;  %197 = vst [vmem:[%s1091_s6 + $0x68] sm:$0xff] %v196_v13  ;;  %v200_v15 = vld [vmem:[%s1086_s5 + $0x1c8] sm:$0xff] }
  0x21   : > { %199 = vst [vmem:[%s1091_s6 + $0x70] sm:$0xff] %v198_v14  ;;  %v202_v16 = vld [vmem:[%s1086_s5 + $0x200] sm:$0xff]  ;;  %v204_v17 = vld [vmem:[%s1086_s5 + $0x208] sm:$0xff]  ;;  %201 = vst [vmem:[%s1091_s6 + $0x78] sm:$0xff] %v200_v15 }
  0x22   : > { %203 = vst [vmem:[%s1091_s6 + $0x80] sm:$0xff] %v202_v16  ;;  %205 = vst [vmem:[%s1091_s6 + $0x88] sm:$0xff] %v204_v17  ;;  %v206_v18 = vld [vmem:[%s1086_s5 + $0x240] sm:$0xff]  ;;  %v208_v19 = vld [vmem:[%s1086_s5 + $0x248] sm:$0xff] }
  0x23   : > { %v210_v20 = vld [vmem:[%s1086_s5 + $0x280] sm:$0xff]  ;;  %207 = vst [vmem:[%s1091_s6 + $0x90] sm:$0xff] %v206_v18  ;;  %209 = vst [vmem:[%s1091_s6 + $0x98] sm:$0xff] %v208_v19  ;;  %v212_v21 = vld [vmem:[%s1086_s5 + $0x288] sm:$0xff] }
  0x24   : > { %211 = vst [vmem:[%s1091_s6 + $0xa0] sm:$0xff] %v210_v20  ;;  %v214_v22 = vld [vmem:[%s1086_s5 + $0x2c0] sm:$0xff]  ;;  %v216_v23 = vld [vmem:[%s1086_s5 + $0x2c8] sm:$0xff]  ;;  %213 = vst [vmem:[%s1091_s6 + $0xa8] sm:$0xff] %v212_v21 }
  0x25   : > { %215 = vst [vmem:[%s1091_s6 + $0xb0] sm:$0xff] %v214_v22  ;;  %217 = vst [vmem:[%s1091_s6 + $0xb8] sm:$0xff] %v216_v23  ;;  %v218_v24 = vld [vmem:[%s1086_s5 + $0x300] sm:$0xff]  ;;  %v220_v25 = vld [vmem:[%s1086_s5 + $0x308] sm:$0xff] }
  0x26   : > { %v222_v26 = vld [vmem:[%s1086_s5 + $0x340] sm:$0xff]  ;;  %219 = vst [vmem:[%s1091_s6 + $0xc0] sm:$0xff] %v218_v24  ;;  %221 = vst [vmem:[%s1091_s6 + $0xc8] sm:$0xff] %v220_v25  ;;  %v224_v27 = vld [vmem:[%s1086_s5 + $0x348] sm:$0xff] }
  0x27   : > { %223 = vst [vmem:[%s1091_s6 + $0xd0] sm:$0xff] %v222_v26  ;;  %v226_v28 = vld [vmem:[%s1086_s5 + $0x380] sm:$0xff]  ;;  %v228_v29 = vld [vmem:[%s1086_s5 + $0x388] sm:$0xff]  ;;  %225 = vst [vmem:[%s1091_s6 + $0xd8] sm:$0xff] %v224_v27 }
  0x28   : > { %227 = vst [vmem:[%s1091_s6 + $0xe0] sm:$0xff] %v226_v28  ;;  %229 = vst [vmem:[%s1091_s6 + $0xe8] sm:$0xff] %v228_v29  ;;  %v230_v30 = vld [vmem:[%s1086_s5 + $0x3c0] sm:$0xff]  ;;  %v232_v31 = vld [vmem:[%s1086_s5 + $0x3c8] sm:$0xff] }
  0x29   : > { %231 = vst [vmem:[%s1091_s6 + $0xf0] sm:$0xff] %v230_v30  ;;  %233 = vst [vmem:[%s1091_s6 + $0xf8] sm:$0xff] %v232_v31 }
  0x2a PF: > { %p782_p9 = scmp.ge.s32.totalorder %s1003_s15, 1  ;;  %p238_p10 = scmp.lt.s32.totalorder %s1003_s15, 17 }
  0x2c   : > { %p239_p11 = pnand %p782_p9, %p238_p10 }
  0x2d   : > { %s245_s7 = sand.u32 (!%p239_p11), 1, %s979_s9   ;;  %p273_p12 = scmp.lt.s32.totalorder (!%p239_p11), %s991_s12, 3 }
  0x2e   : > { %242 = sbr.rel (%p239_p11) target bundleno = 308 (0x134), region = 47  ;;  %s783_s8 = sshll.u32 (!%p239_p11), %s245_s7, 8 }
  0x2f   : > { %s1159_s18 = scalar_lea.vmem (!%p239_p11), [#allocation3], %s783_s8  ;;  %s784_s26 = sshll.u32 (!%p239_p11), %s245_s7, 6 }
  0x30   : > { %s272_s27 = scalar_lea.vmem (!%p239_p11), [#allocation4], %s784_s26 }
  0x33   : > { %v1005_v32 = vmov 0   ;;  %v884_v33 = vld [vmem:[%s1159_s18 + $0xe4] ss:$16 sps:$4 sm:$0xff]   ;;  %v886_v34 = vld [vmem:[%s1159_s18 + $0xec] ss:$16 sps:$4 sm:$0xff]   ;;  %s274_s19 = scalar_select %p273_p12, %s991_s12, 3 }
  0x34   : > { %537 = vmatprep.mubr.bf16.mxu0 %v1005_v32  ;;  %580 = vmatprep.mubr.bf16.mxu1 %v1005_v32  ;;  %v888_v35 = vld [vmem:[%s1159_s18 + $0xe0] ss:$16 sps:$4 sm:$0xff]   ;;  %v889_v36 = vld [vmem:[%s1159_s18 + $0xe8] ss:$16 sps:$4 sm:$0xff]   ;;  %v890_v37 = vld [vmem:[%s1159_s18 + $0xc4] ss:$16 sps:$4 sm:$0xff]  }
  0x35   : > { %505 = vmatprep.subr.bf16.mxu0 %v884_v33  ;;  %548 = vmatprep.subr.bf16.mxu1 %v886_v34  ;;  %v892_v38 = vld [vmem:[%s1159_s18 + $0xcc] ss:$16 sps:$4 sm:$0xff]   ;;  %v894_v39 = vld [vmem:[%s1159_s18 + $0xc0] ss:$16 sps:$4 sm:$0xff]   ;;  %v895_v40 = vld [vmem:[%s1159_s18 + $0xc8] ss:$16 sps:$4 sm:$0xff]  }
  0x36   : > { %506 = vmatpush1.bf16.msra.mxu0 %v888_v35  ;;  %549 = vmatpush1.bf16.msra.mxu1 %v889_v36  ;;  %v896_v41 = vld [vmem:[%s1159_s18 + $0xa4] ss:$16 sps:$4 sm:$0xff]   ;;  %v898_v42 = vld [vmem:[%s1159_s18 + $0xac] ss:$16 sps:$4 sm:$0xff]   ;;  %v900_v43 = vld [vmem:[%s1159_s18 + $0xa0] ss:$16 sps:$4 sm:$0xff]  }
  0x37   : > { %507 = vmatprep.subr.bf16.mxu0 %v890_v37  ;;  %550 = vmatprep.subr.bf16.mxu1 %v892_v38  ;;  %v901_v44 = vld [vmem:[%s1159_s18 + $0xa8] ss:$16 sps:$4 sm:$0xff]   ;;  %v902_v45 = vld [vmem:[%s1159_s18 + $0x84] ss:$16 sps:$4 sm:$0xff]   ;;  %v904_v46 = vld [vmem:[%s1159_s18 + $0x8c] ss:$16 sps:$4 sm:$0xff]  }
  0x38   : > { %v906_v47 = vld [vmem:[%s1159_s18 + $0x80] ss:$16 sps:$4 sm:$0xff]   ;;  %v907_v48 = vld [vmem:[%s1159_s18 + $0x88] ss:$16 sps:$4 sm:$0xff]   ;;  %v908_v49 = vld [vmem:[%s1159_s18 + $0x64] ss:$16 sps:$4 sm:$0xff]  }
  0x39   : > { %v910_v50 = vld [vmem:[%s1159_s18 + $0x6c] ss:$16 sps:$4 sm:$0xff]   ;;  %v912_v51 = vld [vmem:[%s1159_s18 + $0x60] ss:$16 sps:$4 sm:$0xff]   ;;  %v913_v52 = vld [vmem:[%s1159_s18 + $0x68] ss:$16 sps:$4 sm:$0xff]  }
  0x3a   : > { %508 = vmatpush1.bf16.msra.mxu0 %v894_v39  ;;  %551 = vmatpush1.bf16.msra.mxu1 %v895_v40  ;;  %v914_v53 = vld [vmem:[%s1159_s18 + $0x44] ss:$16 sps:$4 sm:$0xff]   ;;  %v916_v54 = vld [vmem:[%s1159_s18 + $0x4c] ss:$16 sps:$4 sm:$0xff]   ;;  %s826_s21 = sshll.u32 %s274_s19, 3  ;;  %s821_s9 = sshll.u32 (%p1069_p6), %s987_s11, 2 }
  0x3b   : > { %509 = vmatprep.subr.bf16.mxu0 %v896_v41  ;;  %552 = vmatprep.subr.bf16.mxu1 %v898_v42  ;;  %v918_v55 = vld [vmem:[%s1159_s18 + $0x40] ss:$16 sps:$4 sm:$0xff]   ;;  %v919_v56 = vld [vmem:[%s1159_s18 + $0x48] ss:$16 sps:$4 sm:$0xff]   ;;  %v920_v57 = vld [vmem:[%s1159_s18 + $0x24] ss:$16 sps:$4 sm:$0xff]   ;;  %s280_s25 = scalar_lea.vmem %s1228_s0, %s826_s21 }
  0x3c   : > { %v922_v58 = vld [vmem:[%s1159_s18 + $0x2c] ss:$16 sps:$4 sm:$0xff]   ;;  %v924_v59 = vld [vmem:[%s1159_s18 + $0x20] ss:$16 sps:$4 sm:$0xff]   ;;  %v925_v60 = vld [vmem:[%s1159_s18 + $0x28] ss:$16 sps:$4 sm:$0xff]  }
  0x3d   : > { %v926_v61 = vld [vmem:[%s1159_s18 + $0x4] ss:$16 sps:$4 sm:$0xff]   ;;  %v928_v62 = vld [vmem:[%s1159_s18 + $0xc] ss:$16 sps:$4 sm:$0xff]   ;;  %v930_v63 = vld [vmem:[%s1159_s18] ss:$16 sps:$4 sm:$0xff]  }
  0x3e   : > { %510 = vmatpush1.bf16.msra.mxu0 %v900_v43  ;;  %553 = vmatpush1.bf16.msra.mxu1 %v901_v44  ;;  %v931_v0 = vld [vmem:[%s1159_s18 + $0x8] ss:$16 sps:$4 sm:$0xff]   ;;  %v932_v1 = vld [vmem:[%s280_s25] sm:$0xff]   ;;  %s822_s28 = sshll.u32 (%p1069_p6), %s991_s12, 5 }
  0x3f   : > { %511 = vmatprep.subr.bf16.mxu0 %v902_v45  ;;  %554 = vmatprep.subr.bf16.mxu1 %v904_v46  ;;  %s643_s29 = sadd.s32 (%p1069_p6), %s822_s28, %s821_s9 }
  0x40   : > { %s823_s30 = sshll.u32 (%p1069_p6), %s643_s29, 3 }
  0x41   : > { %s645_s5 = scalar_lea.vmem (%p1069_p6), %s1230_s2, %s823_s30 }
  0x42   : > { %512 = vmatpush1.bf16.msra.mxu0 %v906_v47  ;;  %555 = vmatpush1.bf16.msra.mxu1 %v907_v48 }
  0x43   : > { %513 = vmatprep.subr.bf16.mxu0 %v908_v49  ;;  %556 = vmatprep.subr.bf16.mxu1 %v910_v50 }
  0x46   : > { %514 = vmatpush1.bf16.msra.mxu0 %v912_v51  ;;  %557 = vmatpush1.bf16.msra.mxu1 %v913_v52 }
  0x47   : > { %515 = vmatprep.subr.bf16.mxu0 %v914_v53  ;;  %558 = vmatprep.subr.bf16.mxu1 %v916_v54 }
  0x4a   : > { %516 = vmatpush1.bf16.msra.mxu0 %v918_v55  ;;  %559 = vmatpush1.bf16.msra.mxu1 %v919_v56 }
  0x4b   : > { %517 = vmatprep.subr.bf16.mxu0 %v920_v57  ;;  %560 = vmatprep.subr.bf16.mxu1 %v922_v58 }
  0x4e   : > { %518 = vmatpush1.bf16.msra.mxu0 %v924_v59  ;;  %561 = vmatpush1.bf16.msra.mxu1 %v925_v60 }
  0x4f   : > { %519 = vmatprep.subr.bf16.mxu0 %v926_v61  ;;  %562 = vmatprep.subr.bf16.mxu1 %v928_v62 }
  0x52   : > { %520 = vmatpush1.bf16.msra.mxu0 %v930_v63  ;;  %563 = vmatpush1.bf16.msra.mxu1 %v931_v0 }
  0x55   : > { %538 = vmatmul.mubr.bf16.vlgmr.msra.gmra.mxu0 %v932_v1  ;;  %581 = vmatmul.mubr.bf16.vlgmr.msra.gmra.mxu1 %v932_v1 }
 0x115   : > { %v539_v2 = vpop.f32.mrf.mxu0  ;;  %v582_v3 = vpop.f32.mrf.mxu1 }
 0x116   : > { %933 = vtanh.f32 %v539_v2 }
 0x117   : > { %935 = vtanh.f32 %v582_v3  ;;  %v541_v4 = vpop.f32.mrf.mxu0  ;;  %v584_v5 = vpop.f32.mrf.mxu1 }
 0x118   : > { %937 = vtanh.f32 %v541_v4 }
 0x119   : > { %939 = vtanh.f32 %v584_v5  ;;  %v543_v6 = vpop.f32.mrf.mxu0  ;;  %v586_v7 = vpop.f32.mrf.mxu1 }
 0x11a   : > { %941 = vtanh.f32 %v543_v6 }
 0x11b   : > { %943 = vtanh.f32 %v586_v7  ;;  %v545_v8 = vpop.f32.mrf.mxu0  ;;  %v588_v9 = vpop.f32.mrf.mxu1 }
 0x11c   : > { %945 = vtanh.f32 %v545_v8 }
 0x11d   : > { %947 = vtanh.f32 %v588_v9 }
 0x123   : > { %v934_v10 = vpop.eup %933 }
 0x124   : > { %v936_v11 = vpop.eup %935  ;;  %626 = vst [vmem:[%s272_s27] sm:$0xff] %v934_v10 }
 0x125   : > { %v938_v12 = vpop.eup %937  ;;  %628 = vst [vmem:[%s272_s27 + $0x10] sm:$0xff] %v936_v11 }
 0x126   : > { %v940_v13 = vpop.eup %939  ;;  %627 = vst [vmem:[%s272_s27 + $0x8] sm:$0xff] %v938_v12 }
 0x127   : > { %v942_v14 = vpop.eup %941  ;;  %629 = vst [vmem:[%s272_s27 + $0x18] sm:$0xff] %v940_v13  ;;  %640 = sbr.rel (!%p1069_p6) target bundleno = 308 (0x134), region = 63 }
 0x128   : > { %v944_v15 = vpop.eup %943  ;;  %630 = vst [vmem:[%s272_s27 + $0x20] sm:$0xff] %v942_v14 }
 0x129   : > { %v946_v16 = vpop.eup %945  ;;  %632 = vst [vmem:[%s272_s27 + $0x30] sm:$0xff] %v944_v15 }
 0x12a   : > { %v948_v17 = vpop.eup %947  ;;  %631 = vst [vmem:[%s272_s27 + $0x28] sm:$0xff] %v946_v16 }
 0x12b   : > { %633 = vst [vmem:[%s272_s27 + $0x38] sm:$0xff] %v948_v17  ;;  %v658_v18 = vld [vmem:[%s272_s27] sm:$0xff] (%p1069_p6) }
 0x12c   : > { %v662_v20 = vld [vmem:[%s272_s27 + $0x10] sm:$0xff]  ;;  %659 = vst [vmem:[%s645_s5] sm:$0xff] %v658_v18 }
 0x12d   : > { %v660_v19 = vld [vmem:[%s272_s27 + $0x8] sm:$0xff]  ;;  %663 = vst [vmem:[%s645_s5 + $0x10] sm:$0xff] %v662_v20 }
 0x12e   : > { %v664_v21 = vld [vmem:[%s272_s27 + $0x18] sm:$0xff]  ;;  %661 = vst [vmem:[%s645_s5 + $0x8] sm:$0xff] %v660_v19 }
 0x12f   : > { %v666_v22 = vld [vmem:[%s272_s27 + $0x20] sm:$0xff]  ;;  %665 = vst [vmem:[%s645_s5 + $0x18] sm:$0xff] %v664_v21 }
 0x130   : > { %v670_v24 = vld [vmem:[%s272_s27 + $0x30] sm:$0xff]  ;;  %667 = vst [vmem:[%s645_s5 + $0x80] sm:$0xff] %v666_v22 }
 0x131   : > { %v668_v23 = vld [vmem:[%s272_s27 + $0x28] sm:$0xff]  ;;  %671 = vst [vmem:[%s645_s5 + $0x90] sm:$0xff] %v670_v24 }
 0x132   : > { %v672_v25 = vld [vmem:[%s272_s27 + $0x38] sm:$0xff]  ;;  %669 = vst [vmem:[%s645_s5 + $0x88] sm:$0xff] %v668_v23 }
 0x133   : > { %673 = vst [vmem:[%s645_s5 + $0x98] sm:$0xff] %v672_v25 }
 0x134 PF: > { %s12_s15 = sadd.s32 1, %s1003_s15   ;;  %s1232_s9 = smov %s983_s10 }
 0x135   : > { %p9_p13 = scmp.ge.s32.totalorder %s12_s15, 18   ;;  %s1233_s10 = smov %s1077_s24 }
 0x136   : > { %s1234_s11 = smov %s995_s13  ;;  %s1235_s12 = smov %s999_s14 }
 0x137   : > { %s1236_s13 = smov %s1239_s16  ;;  %s1237_s14 = smov %s1243_s17 }
 0x138   :  { %11 = sbr.rel (!%p9_p13) target bundleno = 4 (0x4), region = 120 }

</bundles_post_ra>
